<compile_context>
chip_gen: v7x
topology: tpu7x:2x2x1
jax: 0.10.0
libtpu: 0.0.40
codegen_flags: <defaults>
</compile_context>

<pallas_src>
import functools

import jax
import jax.numpy as jnp
from jax.experimental import pallas as pl
from jax.experimental.pallas import tpu as pltpu

EPS = 1e-5
LEAK = 0.001  # a_value of Leaky_ReLU6 / leaky_hsigmoid


def _leaky_relu6(y):
    # min(6, max(a*y, y))
    return jnp.minimum(6.0, jnp.maximum(LEAK * y, y))


def _leaky_hsigmoid(y):
    z = y + 3.0
    return jnp.minimum(6.0, jnp.maximum(LEAK * z, z)) * (1.0 / 6.0)


# --------------------------------------------------------------------------------------
# Packed-weight slab layout (all BN scales pre-folded into the weights)
# --------------------------------------------------------------------------------------
def _build_layout(Cin, Cexp, Cout, Cr1, Cr2):
    """Column layout of the single (nrows, ncols) f32 weight slab."""
    layout = {}
    col = [0]

    def place(name, nrows, ncols, row0=0):
        layout[name] = (row0, nrows, col[0], ncols)
        col[0] += ncols

    place("w1", Cexp, Cin)            # conv1 (BN1 scale folded)
    place("b1", Cexp, 1)              # BN1 bias
    place("wpw", Cexp, Cexp)          # BSConv pointwise (BN scale folded)
    place("bpw", Cexp, 1)
    place("wdw", Cexp, 9)             # depthwise 3x3 taps (BN scale folded)
    place("bdw", Cexp, 1)
    place("se_w1t", Cexp, Cr1)        # SE linear1 [in,out] (BN scale folded)
    place("se_w2", Cexp, Cr1)         # SE linear2 [out,in]
    place("w3sc", 2 * Cout, Cexp + Cin)  # block-diag [conv3|0 ; 0|shortcut] (BN folded)
    place("b3sc", 2 * Cout, 1)        # [bn3 bias ; shortcut BN bias]
    place("cb_w1t", Cout, Cr2)        # CBAM channel-gate linear1 (BN scale folded)
    place("cb_w2", Cout, Cr2)
    # the two (1, Cr) row-vector biases share one column range on different rows
    layout["se_b"] = (0, 1, col[0], Cr1)
    layout["cb_b"] = (1, 1, col[0], Cr2)
    col[0] += max(Cr1, Cr2)
    place("sg_w", 2, 7 * 7)           # 7x7 spatial-gate taps (BN scale folded)
    nrows = max(2 * Cout, Cexp, 8)
    return layout, nrows, col[0]


def pack_params(P):
    """Fold BN scales into conv weights and pack everything into one VMEM slab."""
    Cexp, Cin = P["conv1_w"].shape
    Cout = P["conv3_w"].shape[0]
    Cr1 = P["se1_w1t"].shape[1]
    Cr2 = P["cb_w1t"].shape[1]
    layout, nrows, ncols = _build_layout(Cin, Cexp, Cout, Cr1, Cr2)
    ncols_pad = ((ncols + 127) // 128) * 128

    # --- BN-scale folding ---
    w1 = P["bn1_s"] * P["conv1_w"]
    wpw = P["bs_bn1_s"] * P["bs_pw_w"]
    wdw = P["bs_bn2_s"] * P["bs_dw_w"]
    se_w1t = P["se1_w1t"] * P["se1_s"]
    w3 = P["bn3_s"] * P["conv3_w"]
    wsc = P["sc_bn_s"] * P["sc_w"]
    cb_w1t = P["cb_w1t"] * P["cb_s"]
    sg_w = P["sg_bn"][0] * P["sg_w"]

    # --- conv3 + shortcut as ONE block-diagonal matmul (outputs kept separate: CBAM
    #     is applied to the conv3 branch before the residual add) ---
    w3sc = jnp.zeros((2 * Cout, Cexp + Cin), jnp.float32)
    w3sc = w3sc.at[:Cout, :Cexp].set(w3).at[Cout:, Cexp:].set(wsc)
    b3sc = jnp.concatenate([P["bn3_b"], P["sc_bn_b"]], axis=0)

    entries = {
        "w1": w1, "b1": P["bn1_b"],
        "wpw": wpw, "bpw": P["bs_bn1_b"],
        "wdw": wdw, "bdw": P["bs_bn2_b"],
        "se_w1t": se_w1t, "se_w2": P["se1_w2"], "se_b": P["se1_b"],
        "w3sc": w3sc, "b3sc": b3sc,
        "cb_w1t": cb_w1t, "cb_w2": P["cb_w2"], "cb_b": P["cb_b"],
        "sg_w": sg_w,
    }
    slab = jnp.zeros((nrows, ncols_pad), jnp.float32)
    for name, arr in entries.items():
        r0, nr, c0, nc = layout[name]
        slab = slab.at[r0:r0 + nr, c0:c0 + nc].set(arr.reshape(nr, nc))

    sg_bias = P["sg_bn"][1:2]  # (1,) -> SMEM
    cfg = dict(layout=layout, nrows=nrows, ncols=ncols_pad,
               Cin=Cin, Cexp=Cexp, Cout=Cout)
    return slab, sg_bias, cfg


# --------------------------------------------------------------------------------------
# In-kernel building blocks (all operate on (C, H*W): channels on sublanes, spatial on lanes)
# --------------------------------------------------------------------------------------
def _pw(w, x, b):
    """1x1 conv (BN scale pre-folded into w) as (Cout,Cin)@(Cin,HW) + bias."""
    return jnp.dot(w, x, preferred_element_type=jnp.float32) + b


def _se_gate(y, w1t, b, w2):
    """SeModule: avgpool -> 1x1(+folded BN) -> ReLU -> 1x1 -> leaky_hsigmoid -> scale.

    y: (C, HW).  w1t: (C, Cr) stored [in,out], BN scale folded.  b: (1, Cr).
    w2: (C, Cr) stored [out,in].  Broadcast-multiplies + tiny reduces only.
    """
    pooled = jnp.mean(y, axis=1, keepdims=True)            # (C, 1)   lane reduce
    h = jnp.sum(w1t * pooled, axis=0, keepdims=True)       # (1, Cr)  sublane reduce
    h = jnp.maximum(h + b, 0.0)                            # bias + ReLU
    g = jnp.sum(w2 * h, axis=1, keepdims=True)             # (C, 1)   lane reduce
    return y * _leaky_hsigmoid(g)


def _depthwise3x3(y, wdw, col_masks, H, W):
    """Depthwise 3x3, stride 1, zero pad 1, on the flattened spatial axis.

    y: (C, HW).  wdw: (C, 9) with tap index (ky*3+kx), BN scale pre-folded.
    Loop grouped by dx so each column mask is applied once per dx.
    """
    C, HW = y.shape
    P = W + 1                                              # >= max |dy*W + dx|
    z = jnp.zeros((C, P), jnp.float32)
    yp = jnp.concatenate([z, y, z], axis=1)                # (C, HW + 2P) zero halo
    acc = None
    for dx in (-1, 0, 1):
        part = None
        for dy in (-1, 0, 1):
            k = (dy + 1) * 3 + (dx + 1)
            off = dy * W + dx
            tap = yp[:, P + off:P + off + HW]              # static lane shift
            term = tap * wdw[:, k:k + 1]
            part = term if part is None else part + term
        if dx != 0:
            part = part * col_masks[dx]                    # kill row-boundary wrap, once per dx
        acc = part if acc is None else acc + part
    return acc


def _spatial7x7(comp, sg_w, col_masks, H, W):
    """7x7 conv, 2 -> 1 channels, zero pad 3, on the flattened spatial axis.

    comp: (2, HW) [row0=channel-max, row1=channel-mean].  sg_w: (2, 49) VMEM taps
    (BN scale pre-folded).  Accumulate on (2,HW); single sublane reduce at the end;
    dx-grouped masks.
    """
    C, HW = comp.shape
    P = 3 * W + 3                                          # >= max |dy*W + dx|
    z = jnp.zeros((C, P), jnp.float32)
    cp = jnp.concatenate([z, comp, z], axis=1)             # (2, HW + 2P)
    acc2 = None
    for dx in range(-3, 4):
        part = None
        for dy in range(-3, 4):
            k = (dy + 3) * 7 + (dx + 3)
            off = dy * W + dx
            tap = cp[:, P + off:P + off + HW]              # (2, HW)
            term = tap * sg_w[:, k:k + 1]
            part = term if part is None else part + term
        if dx != 0:
            part = part * col_masks[dx]
        acc2 = part if acc2 is None else acc2 + part
    return jnp.sum(acc2, axis=0, keepdims=True)            # (1, HW)


# --------------------------------------------------------------------------------------
# Fused kernel: one grid step == one batch sample
# --------------------------------------------------------------------------------------
def _custom_block_kernel(x_ref, w_ref, sgb_ref, o_ref, *, H, W, layout, Cout):
    HW = H * W
    x = x_ref[0]                                           # (Cin, HW)
    slab = w_ref[...]                                      # packed weight slab

    def g(name):
        r0, nr, c0, nc = layout[name]
        return slab[r0:r0 + nr, c0:c0 + nc]

    # per-dx column masks (shared by the 3x3 depthwise and 7x7 spatial convs), once per step
    col = jax.lax.broadcasted_iota(jnp.int32, (1, HW), 1) % W
    col_masks = {dx: ((col + dx >= 0) & (col + dx < W)).astype(jnp.float32)
                 for dx in range(-3, 4) if dx != 0}

    # conv1 (+ folded BN1) -> Leaky_ReLU6
    y = _leaky_relu6(_pw(g("w1"), x, g("b1")))

    # BSConvU: pointwise 1x1 (+ folded BN), depthwise 3x3 (BN scale folded into taps) + bias
    y = _pw(g("wpw"), y, g("bpw"))
    y = _depthwise3x3(y, g("wdw"), col_masks, H, W) + g("bdw")

    # SE (reduction=4), BN scale folded into the first linear
    y = _se_gate(y, g("se_w1t"), g("se_b"), g("se_w2"))

    # conv3+bn3 and shortcut (1x1 conv + BN) as ONE block-diagonal matmul
    both = _pw(g("w3sc"), jnp.concatenate([y, x], axis=0), g("b3sc"))   # (2*Cout, HW)
    y = both[0:Cout]                                       # conv3 branch (feeds CBAM)
    sc = both[Cout:2 * Cout]                               # shortcut branch

    # CBAM channel gate (SE, reduction=16)
    y = _se_gate(y, g("cb_w1t"), g("cb_b"), g("cb_w2"))

    # CBAM spatial gate: channel max/mean -> 7x7 conv -> BN -> leaky_hsigmoid -> sigmoid -> scale
    comp = jnp.concatenate([jnp.max(y, axis=0, keepdims=True),
                            jnp.mean(y, axis=0, keepdims=True)], axis=0)   # (2, HW)
    sconv = _spatial7x7(comp, g("sg_w"), col_masks, H, W) + sgb_ref[0]
    y = y * jax.nn.sigmoid(_leaky_hsigmoid(sconv))         # double squash, per reference module

    # residual add + Leaky_ReLU6
    o_ref[0] = _leaky_relu6(y + sc)


# --------------------------------------------------------------------------------------
# Wrapper
# --------------------------------------------------------------------------------------
def custom_block_forward(x_nchw, slab, sg_bias, cfg):
    N, Cin, H, W = x_nchw.shape
    HW = H * W
    Cout = cfg["Cout"]
    x = x_nchw.reshape(N, Cin, HW)                         # NCHW -> (N, C, HW), free reshape

    kernel = functools.partial(_custom_block_kernel, H=H, W=W,
                               layout=cfg["layout"], Cout=Cout)
    out = pl.pallas_call(
        kernel,
        out_shape=jax.ShapeDtypeStruct((N, Cout, HW), jnp.float32),
        grid=(N,),
        in_specs=[
            pl.BlockSpec((1, Cin, HW), lambda n: (n, 0, 0)),
            pl.BlockSpec((cfg["nrows"], cfg["ncols"]), lambda n: (0, 0)),   # packed weights
            pl.BlockSpec(memory_space=pltpu.MemorySpace.SMEM),              # sg BN bias scalar
        ],
        out_specs=pl.BlockSpec((1, Cout, HW), lambda n: (n, 0, 0)),
        compiler_params=pltpu.CompilerParams(dimension_semantics=("parallel",)),
    )(x, slab, sg_bias)
    return out.reshape(N, Cout, H, W)


# --------------------------------------------------------------------------------------
# Parameter init (deterministic, synthetic; BN as per-channel scale/bias, inference mode)
# --------------------------------------------------------------------------------------
def init_params(key, Cin, Cexp, Cout, K=3):
    Cr1 = max(Cexp // 4, 8)    # SE inside block (reduction=4)
    Cr2 = max(Cout // 16, 8)   # CBAM channel gate (reduction=16)
    ks = jax.random.split(key, 18)

    def nrm(k, shape, s=0.3):
        return s * jax.random.normal(k, shape, jnp.float32)

    def bn_fold(k, c):
        k1, k2, k3, k4 = jax.random.split(k, 4)
        gamma = 1.0 + 0.1 * jax.random.normal(k1, (c,), jnp.float32)
        beta = 0.1 * jax.random.normal(k2, (c,), jnp.float32)
        mean = 0.1 * jax.random.normal(k3, (c,), jnp.float32)
        var = 1.0 + 0.1 * jnp.abs(jax.random.normal(k4, (c,), jnp.float32))
        s = gamma * jax.lax.rsqrt(var + EPS)
        return s, beta - mean * s

    P = {}
    P["conv1_w"] = nrm(ks[0], (Cexp, Cin))                      # [out, in]
    s, b = bn_fold(ks[1], Cexp); P["bn1_s"], P["bn1_b"] = s.reshape(Cexp, 1), b.reshape(Cexp, 1)
    P["bs_pw_w"] = nrm(ks[2], (Cexp, Cexp))
    s, b = bn_fold(ks[3], Cexp); P["bs_bn1_s"], P["bs_bn1_b"] = s.reshape(Cexp, 1), b.reshape(Cexp, 1)
    P["bs_dw_w"] = nrm(ks[4], (Cexp, K * K))                    # depthwise taps [c, ky*K+kx]
    s, b = bn_fold(ks[5], Cexp); P["bs_bn2_s"], P["bs_bn2_b"] = s.reshape(Cexp, 1), b.reshape(Cexp, 1)
    P["se1_w1t"] = nrm(ks[6], (Cexp, Cr1))                      # layer1 stored [in, out]
    s, b = bn_fold(ks[7], Cr1); P["se1_s"], P["se1_b"] = s.reshape(1, Cr1), b.reshape(1, Cr1)
    P["se1_w2"] = nrm(ks[8], (Cexp, Cr1))                       # layer2 stored [out, in]
    P["conv3_w"] = nrm(ks[9], (Cout, Cexp))
    s, b = bn_fold(ks[10], Cout); P["bn3_s"], P["bn3_b"] = s.reshape(Cout, 1), b.reshape(Cout, 1)
    P["cb_w1t"] = nrm(ks[11], (Cout, Cr2))
    s, b = bn_fold(ks[12], Cr2); P["cb_s"], P["cb_b"] = s.reshape(1, Cr2), b.reshape(1, Cr2)
    P["cb_w2"] = nrm(ks[13], (Cout, Cr2))
    P["sg_w"] = nrm(ks[14], (2, 7 * 7))                         # 7x7 taps: [ch {0:max,1:mean}, ky*7+kx]
    sgs, sgb = bn_fold(ks[15], 1)
    P["sg_bn"] = jnp.concatenate([sgs, sgb])                    # (2,) [scale, bias]
    P["sc_w"] = nrm(ks[16], (Cout, Cin))                        # shortcut 1x1 conv
    s, b = bn_fold(ks[17], Cout); P["sc_bn_s"], P["sc_bn_b"] = s.reshape(Cout, 1), b.reshape(Cout, 1)
    return P


# --------------------------------------------------------------------------------------
# Pure-JAX reference (same raw params, BN applied as scale/bias) for the correctness check
# --------------------------------------------------------------------------------------
def _reference_forward(x_nchw, P, K=3):
    hp = "highest"
    Cexp = P["conv1_w"].shape[0]

    def conv1x1(x, w):
        return jnp.einsum("oi,nihw->nohw", w, x, precision=hp)

    def bn(x, s, b):
        return x * s.reshape(1, -1, 1, 1) + b.reshape(1, -1, 1, 1)

    def se(x, w1t, s, b, w2):
        pooled = jnp.mean(x, axis=(2, 3))                                   # (N, C)
        h = jnp.einsum("cr,nc->nr", w1t, pooled, precision=hp)
        h = jnp.maximum(h * s.reshape(1, -1) + b.reshape(1, -1), 0.0)
        g = jnp.einsum("cr,nr->nc", w2, h, precision=hp)
        return x * _leaky_hsigmoid(g)[:, :, None, None]

    y = _leaky_relu6(bn(conv1x1(x_nchw, P["conv1_w"]), P["bn1_s"], P["bn1_b"]))
    y = bn(conv1x1(y, P["bs_pw_w"]), P["bs_bn1_s"], P["bs_bn1_b"])
    wdw = P["bs_dw_w"].reshape(Cexp, 1, K, K)
    y = jax.lax.conv_general_dilated(
        y, wdw, window_strides=(1, 1), padding=((1, 1), (1, 1)),
        dimension_numbers=("NCHW", "OIHW", "NCHW"),
        feature_group_count=Cexp, precision=hp)
    y = bn(y, P["bs_bn2_s"], P["bs_bn2_b"])
    y = se(y, P["se1_w1t"], P["se1_s"], P["se1_b"], P["se1_w2"])
    y = bn(conv1x1(y, P["conv3_w"]), P["bn3_s"], P["bn3_b"])
    y = se(y, P["cb_w1t"], P["cb_s"], P["cb_b"], P["cb_w2"])
    comp = jnp.concatenate([jnp.max(y, axis=1, keepdims=True),
                            jnp.mean(y, axis=1, keepdims=True)], axis=1)
    wsg = P["sg_w"].reshape(2, 7, 7)[None]                                  # (1, 2, 7, 7) OIHW
    sconv = jax.lax.conv_general_dilated(
        comp, wsg, window_strides=(1, 1), padding=((3, 3), (3, 3)),
        dimension_numbers=("NCHW", "OIHW", "NCHW"), precision=hp)
    sconv = sconv * P["sg_bn"][0] + P["sg_bn"][1]
    y = y * jax.nn.sigmoid(_leaky_hsigmoid(sconv))
    sc = bn(conv1x1(x_nchw, P["sc_w"]), P["sc_bn_s"], P["sc_bn_b"])
    return _leaky_relu6(y + sc)


if __name__ == "__main__":
    key = jax.random.PRNGKey(0)
    kx, kp = jax.random.split(key)
    N, Cin, H, W = 2, 4, 16, 16
    Cexp, Cout = 8, 8
    x = jax.random.normal(kx, (N, Cin, H, W), jnp.float32)
    P = init_params(kp, Cin, Cexp, Cout, K=3)

    slab, sg_bias, cfg = pack_params(P)                     # fold BN + pack once, host side
    fwd = jax.jit(lambda xx: custom_block_forward(xx, slab, sg_bias, cfg))
    out = fwd(x)
    jax.block_until_ready(out)
    assert out.shape == (N, Cout, H, W)
    assert bool(jnp.all(jnp.isfinite(out)))

    ref = _reference_forward(x, P)
    max_err = float(jnp.max(jnp.abs(out - ref)))
    assert jnp.allclose(out, ref, atol=1e-2, rtol=1e-2), max_err
    print("KERNEL_OK")
</pallas_src>

<mosaic_0001>
module attributes {stable_mosaic.version = 11 : i64} {
  func.func @_custom_block_kernel(%arg0: i32, %arg1: memref<1x4x256xf32, #tpu.memory_space<vmem>>, %arg2: memref<16x128xf32, #tpu.memory_space<vmem>>, %arg3: memref<1xf32, #tpu.memory_space<smem>>, %arg4: memref<1x8x256xf32, #tpu.memory_space<vmem>>) attributes {dimension_semantics = [#tpu.dimension_semantics<parallel>], iteration_bounds = array<i64: 2>, scalar_prefetch = 0 : i64, scratch_operands = 0 : i64, tpu.core_type = #tpu.core_type<tc>, window_params = [{transform_indices = @transform_0, window_bounds = array<i64: 1, 4, 256>}, {pipeline_mode = #tpu.pipeline_mode<synchronous>, transform_indices = @transform_1, window_bounds = array<i64: 16, 128>}, {transform_indices = @transform_2, window_bounds = array<i64: 1>}, {transform_indices = @transform_3, window_bounds = array<i64: 1, 8, 256>}]} {
    %c0 = arith.constant 0 : index
    %c0_0 = arith.constant 0 : index
    %c0_1 = arith.constant 0 : index
    %0 = vector.load %arg1[%c0, %c0_0, %c0_1] : memref<1x4x256xf32, #tpu.memory_space<vmem>>, vector<1x4x256xf32>
    %1 = vector.shape_cast %0 : vector<1x4x256xf32> to vector<4x256xf32>
    %c0_2 = arith.constant 0 : index
    %c0_3 = arith.constant 0 : index
    %2 = vector.load %arg2[%c0_2, %c0_3] : memref<16x128xf32, #tpu.memory_space<vmem>>, vector<16x128xf32>
    %3 = tpu.iota {dimensions = array<i32: 1>} : vector<1x256xi32>
    %c16_i32 = arith.constant 16 : i32
    %c0_i32 = arith.constant 0 : i32
    %4 = arith.cmpi eq, %c16_i32, %c0_i32 : i32
    %c1_i32 = arith.constant 1 : i32
    %5 = arith.select %4, %c1_i32, %c16_i32 : i32
    %6 = vector.broadcast %5 : i32 to vector<1x256xi32>
    %7 = arith.remsi %3, %6 : vector<1x256xi32>
    %c0_i32_4 = arith.constant 0 : i32
    %8 = vector.broadcast %c0_i32_4 : i32 to vector<1x256xi32>
    %9 = arith.cmpi ne, %7, %8 : vector<1x256xi32>
    %c0_i32_5 = arith.constant 0 : i32
    %10 = vector.broadcast %c0_i32_5 : i32 to vector<1x256xi32>
    %11 = arith.cmpi slt, %7, %10 : vector<1x256xi32>
    %c0_i32_6 = arith.constant 0 : i32
    %12 = arith.cmpi slt, %5, %c0_i32_6 : i32
    %13 = vector.broadcast %12 : i1 to vector<1x256xi1>
    %14 = vector.broadcast %13 : vector<1x256xi1> to vector<1x256xi1>
    %15 = arith.xori %11, %14 : vector<1x256xi1>
    %16 = arith.andi %15, %9 : vector<1x256xi1>
    %17 = vector.broadcast %5 : i32 to vector<1x256xi32>
    %18 = arith.addi %7, %17 : vector<1x256xi32>
    %19 = arith.select %16, %18, %7 : vector<1x256xi1>, vector<1x256xi32>
    %c-3_i32 = arith.constant -3 : i32
    %20 = vector.broadcast %c-3_i32 : i32 to vector<1x256xi32>
    %21 = arith.addi %19, %20 : vector<1x256xi32>
    %c0_i32_7 = arith.constant 0 : i32
    %22 = vector.broadcast %c0_i32_7 : i32 to vector<1x256xi32>
    %23 = arith.cmpi sge, %21, %22 : vector<1x256xi32>
    %c-3_i32_8 = arith.constant -3 : i32
    %24 = vector.broadcast %c-3_i32_8 : i32 to vector<1x256xi32>
    %25 = arith.addi %19, %24 : vector<1x256xi32>
    %c16_i32_9 = arith.constant 16 : i32
    %26 = vector.broadcast %c16_i32_9 : i32 to vector<1x256xi32>
    %27 = arith.cmpi slt, %25, %26 : vector<1x256xi32>
    %28 = arith.andi %23, %27 : vector<1x256xi1>
    %29 = arith.extui %28 : vector<1x256xi1> to vector<1x256xi32>
    %30 = arith.sitofp %29 : vector<1x256xi32> to vector<1x256xf32>
    %c-2_i32 = arith.constant -2 : i32
    %31 = vector.broadcast %c-2_i32 : i32 to vector<1x256xi32>
    %32 = arith.addi %19, %31 : vector<1x256xi32>
    %c0_i32_10 = arith.constant 0 : i32
    %33 = vector.broadcast %c0_i32_10 : i32 to vector<1x256xi32>
    %34 = arith.cmpi sge, %32, %33 : vector<1x256xi32>
    %c-2_i32_11 = arith.constant -2 : i32
    %35 = vector.broadcast %c-2_i32_11 : i32 to vector<1x256xi32>
    %36 = arith.addi %19, %35 : vector<1x256xi32>
    %c16_i32_12 = arith.constant 16 : i32
    %37 = vector.broadcast %c16_i32_12 : i32 to vector<1x256xi32>
    %38 = arith.cmpi slt, %36, %37 : vector<1x256xi32>
    %39 = arith.andi %34, %38 : vector<1x256xi1>
    %40 = arith.extui %39 : vector<1x256xi1> to vector<1x256xi32>
    %41 = arith.sitofp %40 : vector<1x256xi32> to vector<1x256xf32>
    %c-1_i32 = arith.constant -1 : i32
    %42 = vector.broadcast %c-1_i32 : i32 to vector<1x256xi32>
    %43 = arith.addi %19, %42 : vector<1x256xi32>
    %c0_i32_13 = arith.constant 0 : i32
    %44 = vector.broadcast %c0_i32_13 : i32 to vector<1x256xi32>
    %45 = arith.cmpi sge, %43, %44 : vector<1x256xi32>
    %c-1_i32_14 = arith.constant -1 : i32
    %46 = vector.broadcast %c-1_i32_14 : i32 to vector<1x256xi32>
    %47 = arith.addi %19, %46 : vector<1x256xi32>
    %c16_i32_15 = arith.constant 16 : i32
    %48 = vector.broadcast %c16_i32_15 : i32 to vector<1x256xi32>
    %49 = arith.cmpi slt, %47, %48 : vector<1x256xi32>
    %50 = arith.andi %45, %49 : vector<1x256xi1>
    %51 = arith.extui %50 : vector<1x256xi1> to vector<1x256xi32>
    %52 = arith.sitofp %51 : vector<1x256xi32> to vector<1x256xf32>
    %c1_i32_16 = arith.constant 1 : i32
    %53 = vector.broadcast %c1_i32_16 : i32 to vector<1x256xi32>
    %54 = arith.addi %19, %53 : vector<1x256xi32>
    %c0_i32_17 = arith.constant 0 : i32
    %55 = vector.broadcast %c0_i32_17 : i32 to vector<1x256xi32>
    %56 = arith.cmpi sge, %54, %55 : vector<1x256xi32>
    %c1_i32_18 = arith.constant 1 : i32
    %57 = vector.broadcast %c1_i32_18 : i32 to vector<1x256xi32>
    %58 = arith.addi %19, %57 : vector<1x256xi32>
    %c16_i32_19 = arith.constant 16 : i32
    %59 = vector.broadcast %c16_i32_19 : i32 to vector<1x256xi32>
    %60 = arith.cmpi slt, %58, %59 : vector<1x256xi32>
    %61 = arith.andi %56, %60 : vector<1x256xi1>
    %62 = arith.extui %61 : vector<1x256xi1> to vector<1x256xi32>
    %63 = arith.sitofp %62 : vector<1x256xi32> to vector<1x256xf32>
    %c2_i32 = arith.constant 2 : i32
    %64 = vector.broadcast %c2_i32 : i32 to vector<1x256xi32>
    %65 = arith.addi %19, %64 : vector<1x256xi32>
    %c0_i32_20 = arith.constant 0 : i32
    %66 = vector.broadcast %c0_i32_20 : i32 to vector<1x256xi32>
    %67 = arith.cmpi sge, %65, %66 : vector<1x256xi32>
    %c2_i32_21 = arith.constant 2 : i32
    %68 = vector.broadcast %c2_i32_21 : i32 to vector<1x256xi32>
    %69 = arith.addi %19, %68 : vector<1x256xi32>
    %c16_i32_22 = arith.constant 16 : i32
    %70 = vector.broadcast %c16_i32_22 : i32 to vector<1x256xi32>
    %71 = arith.cmpi slt, %69, %70 : vector<1x256xi32>
    %72 = arith.andi %67, %71 : vector<1x256xi1>
    %73 = arith.extui %72 : vector<1x256xi1> to vector<1x256xi32>
    %74 = arith.sitofp %73 : vector<1x256xi32> to vector<1x256xf32>
    %c3_i32 = arith.constant 3 : i32
    %75 = vector.broadcast %c3_i32 : i32 to vector<1x256xi32>
    %76 = arith.addi %19, %75 : vector<1x256xi32>
    %c0_i32_23 = arith.constant 0 : i32
    %77 = vector.broadcast %c0_i32_23 : i32 to vector<1x256xi32>
    %78 = arith.cmpi sge, %76, %77 : vector<1x256xi32>
    %c3_i32_24 = arith.constant 3 : i32
    %79 = vector.broadcast %c3_i32_24 : i32 to vector<1x256xi32>
    %80 = arith.addi %19, %79 : vector<1x256xi32>
    %c16_i32_25 = arith.constant 16 : i32
    %81 = vector.broadcast %c16_i32_25 : i32 to vector<1x256xi32>
    %82 = arith.cmpi slt, %80, %81 : vector<1x256xi32>
    %83 = arith.andi %78, %82 : vector<1x256xi1>
    %84 = arith.extui %83 : vector<1x256xi1> to vector<1x256xi32>
    %85 = arith.sitofp %84 : vector<1x256xi32> to vector<1x256xf32>
    %86 = vector.extract_strided_slice %2 {offsets = [0, 0], sizes = [8, 4], strides = [1, 1]} : vector<16x128xf32> to vector<8x4xf32>
    %87 = vector.extract_strided_slice %2 {offsets = [0, 4], sizes = [8, 1], strides = [1, 1]} : vector<16x128xf32> to vector<8x1xf32>
    %cst = arith.constant dense<0.000000e+00> : vector<8x256xf32>
    %88 = tpu.matmul %86, %1, %cst {dimension_numbers = #tpu.dot_dimension_numbers<[1], [0], [0], [1], [0, 0, 1, 1], [], []>} : vector<8x4xf32>, vector<4x256xf32>, vector<8x256xf32> -> vector<8x256xf32>
    %89 = vector.broadcast %87 : vector<8x1xf32> to vector<8x256xf32>
    %90 = arith.addf %88, %89 : vector<8x256xf32>
    %cst_26 = arith.constant 1.000000e-03 : f32
    %91 = vector.broadcast %cst_26 : f32 to vector<8x256xf32>
    %92 = arith.mulf %91, %90 : vector<8x256xf32>
    %93 = arith.maximumf %92, %90 : vector<8x256xf32>
    %cst_27 = arith.constant 6.000000e+00 : f32
    %94 = vector.broadcast %cst_27 : f32 to vector<8x256xf32>
    %95 = arith.minimumf %94, %93 : vector<8x256xf32>
    %96 = vector.extract_strided_slice %2 {offsets = [0, 5], sizes = [8, 8], strides = [1, 1]} : vector<16x128xf32> to vector<8x8xf32>
    %97 = vector.extract_strided_slice %2 {offsets = [0, 13], sizes = [8, 1], strides = [1, 1]} : vector<16x128xf32> to vector<8x1xf32>
    %cst_28 = arith.constant dense<0.000000e+00> : vector<8x256xf32>
    %98 = tpu.matmul %96, %95, %cst_28 {dimension_numbers = #tpu.dot_dimension_numbers<[1], [0], [0], [1], [0, 0, 1, 1], [], []>} : vector<8x8xf32>, vector<8x256xf32>, vector<8x256xf32> -> vector<8x256xf32>
    %99 = vector.broadcast %97 : vector<8x1xf32> to vector<8x256xf32>
    %100 = arith.addf %98, %99 : vector<8x256xf32>
    %101 = vector.extract_strided_slice %2 {offsets = [0, 14], sizes = [8, 9], strides = [1, 1]} : vector<16x128xf32> to vector<8x9xf32>
    %cst_29 = arith.constant 0.000000e+00 : f32
    %102 = vector.broadcast %cst_29 : f32 to vector<8x17xf32>
    %103 = tpu.concatenate %102, %100, %102 in 1 : vector<8x17xf32>, vector<8x256xf32>, vector<8x17xf32> -> vector<8x290xf32>
    %104 = vector.extract_strided_slice %103 {offsets = [0, 0], sizes = [8, 256], strides = [1, 1]} : vector<8x290xf32> to vector<8x256xf32>
    %105 = vector.extract_strided_slice %101 {offsets = [0, 0], sizes = [8, 1], strides = [1, 1]} : vector<8x9xf32> to vector<8x1xf32>
    %106 = vector.broadcast %105 : vector<8x1xf32> to vector<8x256xf32>
    %107 = arith.mulf %104, %106 : vector<8x256xf32>
    %108 = vector.extract_strided_slice %103 {offsets = [0, 16], sizes = [8, 256], strides = [1, 1]} : vector<8x290xf32> to vector<8x256xf32>
    %109 = vector.extract_strided_slice %101 {offsets = [0, 3], sizes = [8, 1], strides = [1, 1]} : vector<8x9xf32> to vector<8x1xf32>
    %110 = vector.broadcast %109 : vector<8x1xf32> to vector<8x256xf32>
    %111 = arith.mulf %108, %110 : vector<8x256xf32>
    %112 = arith.addf %107, %111 : vector<8x256xf32>
    %113 = vector.extract_strided_slice %103 {offsets = [0, 32], sizes = [8, 256], strides = [1, 1]} : vector<8x290xf32> to vector<8x256xf32>
    %114 = vector.extract_strided_slice %101 {offsets = [0, 6], sizes = [8, 1], strides = [1, 1]} : vector<8x9xf32> to vector<8x1xf32>
    %115 = vector.broadcast %114 : vector<8x1xf32> to vector<8x256xf32>
    %116 = arith.mulf %113, %115 : vector<8x256xf32>
    %117 = arith.addf %112, %116 : vector<8x256xf32>
    %118 = vector.broadcast %52 : vector<1x256xf32> to vector<8x256xf32>
    %119 = arith.mulf %117, %118 : vector<8x256xf32>
    %120 = vector.extract_strided_slice %103 {offsets = [0, 1], sizes = [8, 256], strides = [1, 1]} : vector<8x290xf32> to vector<8x256xf32>
    %121 = vector.extract_strided_slice %101 {offsets = [0, 1], sizes = [8, 1], strides = [1, 1]} : vector<8x9xf32> to vector<8x1xf32>
    %122 = vector.broadcast %121 : vector<8x1xf32> to vector<8x256xf32>
    %123 = arith.mulf %120, %122 : vector<8x256xf32>
    %124 = vector.extract_strided_slice %103 {offsets = [0, 17], sizes = [8, 256], strides = [1, 1]} : vector<8x290xf32> to vector<8x256xf32>
    %125 = vector.extract_strided_slice %101 {offsets = [0, 4], sizes = [8, 1], strides = [1, 1]} : vector<8x9xf32> to vector<8x1xf32>
    %126 = vector.broadcast %125 : vector<8x1xf32> to vector<8x256xf32>
    %127 = arith.mulf %124, %126 : vector<8x256xf32>
    %128 = arith.addf %123, %127 : vector<8x256xf32>
    %129 = vector.extract_strided_slice %103 {offsets = [0, 33], sizes = [8, 256], strides = [1, 1]} : vector<8x290xf32> to vector<8x256xf32>
    %130 = vector.extract_strided_slice %101 {offsets = [0, 7], sizes = [8, 1], strides = [1, 1]} : vector<8x9xf32> to vector<8x1xf32>
    %131 = vector.broadcast %130 : vector<8x1xf32> to vector<8x256xf32>
    %132 = arith.mulf %129, %131 : vector<8x256xf32>
    %133 = arith.addf %128, %132 : vector<8x256xf32>
    %134 = arith.addf %119, %133 : vector<8x256xf32>
    %135 = vector.extract_strided_slice %103 {offsets = [0, 2], sizes = [8, 256], strides = [1, 1]} : vector<8x290xf32> to vector<8x256xf32>
    %136 = vector.extract_strided_slice %101 {offsets = [0, 2], sizes = [8, 1], strides = [1, 1]} : vector<8x9xf32> to vector<8x1xf32>
    %137 = vector.broadcast %136 : vector<8x1xf32> to vector<8x256xf32>
    %138 = arith.mulf %135, %137 : vector<8x256xf32>
    %139 = vector.extract_strided_slice %103 {offsets = [0, 18], sizes = [8, 256], strides = [1, 1]} : vector<8x290xf32> to vector<8x256xf32>
    %140 = vector.extract_strided_slice %101 {offsets = [0, 5], sizes = [8, 1], strides = [1, 1]} : vector<8x9xf32> to vector<8x1xf32>
    %141 = vector.broadcast %140 : vector<8x1xf32> to vector<8x256xf32>
    %142 = arith.mulf %139, %141 : vector<8x256xf32>
    %143 = arith.addf %138, %142 : vector<8x256xf32>
    %144 = vector.extract_strided_slice %103 {offsets = [0, 34], sizes = [8, 256], strides = [1, 1]} : vector<8x290xf32> to vector<8x256xf32>
    %145 = vector.extract_strided_slice %101 {offsets = [0, 8], sizes = [8, 1], strides = [1, 1]} : vector<8x9xf32> to vector<8x1xf32>
    %146 = vector.broadcast %145 : vector<8x1xf32> to vector<8x256xf32>
    %147 = arith.mulf %144, %146 : vector<8x256xf32>
    %148 = arith.addf %143, %147 : vector<8x256xf32>
    %149 = vector.broadcast %63 : vector<1x256xf32> to vector<8x256xf32>
    %150 = arith.mulf %148, %149 : vector<8x256xf32>
    %151 = arith.addf %134, %150 : vector<8x256xf32>
    %152 = vector.extract_strided_slice %2 {offsets = [0, 23], sizes = [8, 1], strides = [1, 1]} : vector<16x128xf32> to vector<8x1xf32>
    %153 = vector.broadcast %152 : vector<8x1xf32> to vector<8x256xf32>
    %154 = arith.addf %151, %153 : vector<8x256xf32>
    %155 = vector.extract_strided_slice %2 {offsets = [0, 24], sizes = [8, 8], strides = [1, 1]} : vector<16x128xf32> to vector<8x8xf32>
    %156 = vector.extract_strided_slice %2 {offsets = [0, 69], sizes = [1, 8], strides = [1, 1]} : vector<16x128xf32> to vector<1x8xf32>
    %157 = vector.extract_strided_slice %2 {offsets = [0, 32], sizes = [8, 8], strides = [1, 1]} : vector<16x128xf32> to vector<8x8xf32>
    %cst_30 = arith.constant dense<0.000000e+00> : vector<8xf32>
    %158 = vector.multi_reduction <add>, %154, %cst_30 [1] : vector<8x256xf32> to vector<8xf32>
    %159 = vector.shape_cast %158 : vector<8xf32> to vector<8x1xf32>
    %cst_31 = arith.constant 2.560000e+02 : f32
    %160 = vector.broadcast %cst_31 : f32 to vector<8x1xf32>
    %161 = arith.divf %159, %160 : vector<8x1xf32>
    %162 = vector.broadcast %161 : vector<8x1xf32> to vector<8x8xf32>
    %163 = arith.mulf %155, %162 : vector<8x8xf32>
    %cst_32 = arith.constant dense<0.000000e+00> : vector<8xf32>
    %164 = vector.multi_reduction <add>, %163, %cst_32 [0] : vector<8x8xf32> to vector<8xf32>
    %165 = vector.shape_cast %164 : vector<8xf32> to vector<1x8xf32>
    %166 = arith.addf %165, %156 : vector<1x8xf32>
    %cst_33 = arith.constant 0.000000e+00 : f32
    %167 = vector.broadcast %cst_33 : f32 to vector<1x8xf32>
    %168 = arith.maximumf %166, %167 : vector<1x8xf32>
    %169 = vector.broadcast %168 : vector<1x8xf32> to vector<8x8xf32>
    %170 = arith.mulf %157, %169 : vector<8x8xf32>
    %cst_34 = arith.constant dense<0.000000e+00> : vector<8xf32>
    %171 = vector.multi_reduction <add>, %170, %cst_34 [1] : vector<8x8xf32> to vector<8xf32>
    %172 = vector.shape_cast %171 : vector<8xf32> to vector<8x1xf32>
    %cst_35 = arith.constant 3.000000e+00 : f32
    %173 = vector.broadcast %cst_35 : f32 to vector<8x1xf32>
    %174 = arith.addf %172, %173 : vector<8x1xf32>
    %cst_36 = arith.constant 1.000000e-03 : f32
    %175 = vector.broadcast %cst_36 : f32 to vector<8x1xf32>
    %176 = arith.mulf %175, %174 : vector<8x1xf32>
    %177 = arith.maximumf %176, %174 : vector<8x1xf32>
    %cst_37 = arith.constant 6.000000e+00 : f32
    %178 = vector.broadcast %cst_37 : f32 to vector<8x1xf32>
    %179 = arith.minimumf %178, %177 : vector<8x1xf32>
    %cst_38 = arith.constant 0.166666672 : f32
    %180 = vector.broadcast %cst_38 : f32 to vector<8x1xf32>
    %181 = arith.mulf %179, %180 : vector<8x1xf32>
    %182 = vector.broadcast %181 : vector<8x1xf32> to vector<8x256xf32>
    %183 = arith.mulf %154, %182 : vector<8x256xf32>
    %184 = vector.extract_strided_slice %2 {offsets = [0, 40], sizes = [16, 12], strides = [1, 1]} : vector<16x128xf32> to vector<16x12xf32>
    %185 = tpu.concatenate %183, %1 in 0 : vector<8x256xf32>, vector<4x256xf32> -> vector<12x256xf32>
    %186 = vector.extract_strided_slice %2 {offsets = [0, 52], sizes = [16, 1], strides = [1, 1]} : vector<16x128xf32> to vector<16x1xf32>
    %cst_39 = arith.constant dense<0.000000e+00> : vector<16x256xf32>
    %187 = tpu.matmul %184, %185, %cst_39 {dimension_numbers = #tpu.dot_dimension_numbers<[1], [0], [0], [1], [0, 0, 1, 1], [], []>} : vector<16x12xf32>, vector<12x256xf32>, vector<16x256xf32> -> vector<16x256xf32>
    %188 = vector.broadcast %186 : vector<16x1xf32> to vector<16x256xf32>
    %189 = arith.addf %187, %188 : vector<16x256xf32>
    %190 = vector.extract_strided_slice %189 {offsets = [0, 0], sizes = [8, 256], strides = [1, 1]} : vector<16x256xf32> to vector<8x256xf32>
    %191 = vector.extract_strided_slice %189 {offsets = [8, 0], sizes = [8, 256], strides = [1, 1]} : vector<16x256xf32> to vector<8x256xf32>
    %192 = vector.extract_strided_slice %2 {offsets = [0, 53], sizes = [8, 8], strides = [1, 1]} : vector<16x128xf32> to vector<8x8xf32>
    %193 = vector.extract_strided_slice %2 {offsets = [1, 69], sizes = [1, 8], strides = [1, 1]} : vector<16x128xf32> to vector<1x8xf32>
    %194 = vector.extract_strided_slice %2 {offsets = [0, 61], sizes = [8, 8], strides = [1, 1]} : vector<16x128xf32> to vector<8x8xf32>
    %cst_40 = arith.constant dense<0.000000e+00> : vector<8xf32>
    %195 = vector.multi_reduction <add>, %190, %cst_40 [1] : vector<8x256xf32> to vector<8xf32>
    %196 = vector.shape_cast %195 : vector<8xf32> to vector<8x1xf32>
    %cst_41 = arith.constant 2.560000e+02 : f32
    %197 = vector.broadcast %cst_41 : f32 to vector<8x1xf32>
    %198 = arith.divf %196, %197 : vector<8x1xf32>
    %199 = vector.broadcast %198 : vector<8x1xf32> to vector<8x8xf32>
    %200 = arith.mulf %192, %199 : vector<8x8xf32>
    %cst_42 = arith.constant dense<0.000000e+00> : vector<8xf32>
    %201 = vector.multi_reduction <add>, %200, %cst_42 [0] : vector<8x8xf32> to vector<8xf32>
    %202 = vector.shape_cast %201 : vector<8xf32> to vector<1x8xf32>
    %203 = arith.addf %202, %193 : vector<1x8xf32>
    %cst_43 = arith.constant 0.000000e+00 : f32
    %204 = vector.broadcast %cst_43 : f32 to vector<1x8xf32>
    %205 = arith.maximumf %203, %204 : vector<1x8xf32>
    %206 = vector.broadcast %205 : vector<1x8xf32> to vector<8x8xf32>
    %207 = arith.mulf %194, %206 : vector<8x8xf32>
    %cst_44 = arith.constant dense<0.000000e+00> : vector<8xf32>
    %208 = vector.multi_reduction <add>, %207, %cst_44 [1] : vector<8x8xf32> to vector<8xf32>
    %209 = vector.shape_cast %208 : vector<8xf32> to vector<8x1xf32>
    %cst_45 = arith.constant 3.000000e+00 : f32
    %210 = vector.broadcast %cst_45 : f32 to vector<8x1xf32>
    %211 = arith.addf %209, %210 : vector<8x1xf32>
    %cst_46 = arith.constant 1.000000e-03 : f32
    %212 = vector.broadcast %cst_46 : f32 to vector<8x1xf32>
    %213 = arith.mulf %212, %211 : vector<8x1xf32>
    %214 = arith.maximumf %213, %211 : vector<8x1xf32>
    %cst_47 = arith.constant 6.000000e+00 : f32
    %215 = vector.broadcast %cst_47 : f32 to vector<8x1xf32>
    %216 = arith.minimumf %215, %214 : vector<8x1xf32>
    %cst_48 = arith.constant 0.166666672 : f32
    %217 = vector.broadcast %cst_48 : f32 to vector<8x1xf32>
    %218 = arith.mulf %216, %217 : vector<8x1xf32>
    %219 = vector.broadcast %218 : vector<8x1xf32> to vector<8x256xf32>
    %220 = arith.mulf %190, %219 : vector<8x256xf32>
    %cst_49 = arith.constant dense<0xFF800000> : vector<256xf32>
    %221 = vector.multi_reduction <maximumf>, %220, %cst_49 [0] : vector<8x256xf32> to vector<256xf32>
    %222 = vector.shape_cast %221 : vector<256xf32> to vector<1x256xf32>
    %cst_50 = arith.constant dense<0.000000e+00> : vector<256xf32>
    %223 = vector.multi_reduction <add>, %220, %cst_50 [0] : vector<8x256xf32> to vector<256xf32>
    %224 = vector.shape_cast %223 : vector<256xf32> to vector<1x256xf32>
    %cst_51 = arith.constant 8.000000e+00 : f32
    %225 = vector.broadcast %cst_51 : f32 to vector<1x256xf32>
    %226 = arith.divf %224, %225 : vector<1x256xf32>
    %227 = tpu.concatenate %222, %226 in 0 : vector<1x256xf32>, vector<1x256xf32> -> vector<2x256xf32>
    %228 = vector.extract_strided_slice %2 {offsets = [0, 77], sizes = [2, 49], strides = [1, 1]} : vector<16x128xf32> to vector<2x49xf32>
    %cst_52 = arith.constant 0.000000e+00 : f32
    %229 = vector.broadcast %cst_52 : f32 to vector<2x51xf32>
    %230 = tpu.concatenate %229, %227, %229 in 1 : vector<2x51xf32>, vector<2x256xf32>, vector<2x51xf32> -> vector<2x358xf32>
    %231 = vector.extract_strided_slice %230 {offsets = [0, 0], sizes = [2, 256], strides = [1, 1]} : vector<2x358xf32> to vector<2x256xf32>
    %232 = vector.extract_strided_slice %228 {offsets = [0, 0], sizes = [2, 1], strides = [1, 1]} : vector<2x49xf32> to vector<2x1xf32>
    %233 = vector.broadcast %232 : vector<2x1xf32> to vector<2x256xf32>
    %234 = arith.mulf %231, %233 : vector<2x256xf32>
    %235 = vector.extract_strided_slice %230 {offsets = [0, 16], sizes = [2, 256], strides = [1, 1]} : vector<2x358xf32> to vector<2x256xf32>
    %236 = vector.extract_strided_slice %228 {offsets = [0, 7], sizes = [2, 1], strides = [1, 1]} : vector<2x49xf32> to vector<2x1xf32>
    %237 = vector.broadcast %236 : vector<2x1xf32> to vector<2x256xf32>
    %238 = arith.mulf %235, %237 : vector<2x256xf32>
    %239 = arith.addf %234, %238 : vector<2x256xf32>
    %240 = vector.extract_strided_slice %230 {offsets = [0, 32], sizes = [2, 256], strides = [1, 1]} : vector<2x358xf32> to vector<2x256xf32>
    %241 = vector.extract_strided_slice %228 {offsets = [0, 14], sizes = [2, 1], strides = [1, 1]} : vector<2x49xf32> to vector<2x1xf32>
    %242 = vector.broadcast %241 : vector<2x1xf32> to vector<2x256xf32>
    %243 = arith.mulf %240, %242 : vector<2x256xf32>
    %244 = arith.addf %239, %243 : vector<2x256xf32>
    %245 = vector.extract_strided_slice %230 {offsets = [0, 48], sizes = [2, 256], strides = [1, 1]} : vector<2x358xf32> to vector<2x256xf32>
    %246 = vector.extract_strided_slice %228 {offsets = [0, 21], sizes = [2, 1], strides = [1, 1]} : vector<2x49xf32> to vector<2x1xf32>
    %247 = vector.broadcast %246 : vector<2x1xf32> to vector<2x256xf32>
    %248 = arith.mulf %245, %247 : vector<2x256xf32>
    %249 = arith.addf %244, %248 : vector<2x256xf32>
    %250 = vector.extract_strided_slice %230 {offsets = [0, 64], sizes = [2, 256], strides = [1, 1]} : vector<2x358xf32> to vector<2x256xf32>
    %251 = vector.extract_strided_slice %228 {offsets = [0, 28], sizes = [2, 1], strides = [1, 1]} : vector<2x49xf32> to vector<2x1xf32>
    %252 = vector.broadcast %251 : vector<2x1xf32> to vector<2x256xf32>
    %253 = arith.mulf %250, %252 : vector<2x256xf32>
    %254 = arith.addf %249, %253 : vector<2x256xf32>
    %255 = vector.extract_strided_slice %230 {offsets = [0, 80], sizes = [2, 256], strides = [1, 1]} : vector<2x358xf32> to vector<2x256xf32>
    %256 = vector.extract_strided_slice %228 {offsets = [0, 35], sizes = [2, 1], strides = [1, 1]} : vector<2x49xf32> to vector<2x1xf32>
    %257 = vector.broadcast %256 : vector<2x1xf32> to vector<2x256xf32>
    %258 = arith.mulf %255, %257 : vector<2x256xf32>
    %259 = arith.addf %254, %258 : vector<2x256xf32>
    %260 = vector.extract_strided_slice %230 {offsets = [0, 96], sizes = [2, 256], strides = [1, 1]} : vector<2x358xf32> to vector<2x256xf32>
    %261 = vector.extract_strided_slice %228 {offsets = [0, 42], sizes = [2, 1], strides = [1, 1]} : vector<2x49xf32> to vector<2x1xf32>
    %262 = vector.broadcast %261 : vector<2x1xf32> to vector<2x256xf32>
    %263 = arith.mulf %260, %262 : vector<2x256xf32>
    %264 = arith.addf %259, %263 : vector<2x256xf32>
    %265 = vector.broadcast %30 : vector<1x256xf32> to vector<2x256xf32>
    %266 = arith.mulf %264, %265 : vector<2x256xf32>
    %267 = vector.extract_strided_slice %230 {offsets = [0, 1], sizes = [2, 256], strides = [1, 1]} : vector<2x358xf32> to vector<2x256xf32>
    %268 = vector.extract_strided_slice %228 {offsets = [0, 1], sizes = [2, 1], strides = [1, 1]} : vector<2x49xf32> to vector<2x1xf32>
    %269 = vector.broadcast %268 : vector<2x1xf32> to vector<2x256xf32>
    %270 = arith.mulf %267, %269 : vector<2x256xf32>
    %271 = vector.extract_strided_slice %230 {offsets = [0, 17], sizes = [2, 256], strides = [1, 1]} : vector<2x358xf32> to vector<2x256xf32>
    %272 = vector.extract_strided_slice %228 {offsets = [0, 8], sizes = [2, 1], strides = [1, 1]} : vector<2x49xf32> to vector<2x1xf32>
    %273 = vector.broadcast %272 : vector<2x1xf32> to vector<2x256xf32>
    %274 = arith.mulf %271, %273 : vector<2x256xf32>
    %275 = arith.addf %270, %274 : vector<2x256xf32>
    %276 = vector.extract_strided_slice %230 {offsets = [0, 33], sizes = [2, 256], strides = [1, 1]} : vector<2x358xf32> to vector<2x256xf32>
    %277 = vector.extract_strided_slice %228 {offsets = [0, 15], sizes = [2, 1], strides = [1, 1]} : vector<2x49xf32> to vector<2x1xf32>
    %278 = vector.broadcast %277 : vector<2x1xf32> to vector<2x256xf32>
    %279 = arith.mulf %276, %278 : vector<2x256xf32>
    %280 = arith.addf %275, %279 : vector<2x256xf32>
    %281 = vector.extract_strided_slice %230 {offsets = [0, 49], sizes = [2, 256], strides = [1, 1]} : vector<2x358xf32> to vector<2x256xf32>
    %282 = vector.extract_strided_slice %228 {offsets = [0, 22], sizes = [2, 1], strides = [1, 1]} : vector<2x49xf32> to vector<2x1xf32>
    %283 = vector.broadcast %282 : vector<2x1xf32> to vector<2x256xf32>
    %284 = arith.mulf %281, %283 : vector<2x256xf32>
    %285 = arith.addf %280, %284 : vector<2x256xf32>
    %286 = vector.extract_strided_slice %230 {offsets = [0, 65], sizes = [2, 256], strides = [1, 1]} : vector<2x358xf32> to vector<2x256xf32>
    %287 = vector.extract_strided_slice %228 {offsets = [0, 29], sizes = [2, 1], strides = [1, 1]} : vector<2x49xf32> to vector<2x1xf32>
    %288 = vector.broadcast %287 : vector<2x1xf32> to vector<2x256xf32>
    %289 = arith.mulf %286, %288 : vector<2x256xf32>
    %290 = arith.addf %285, %289 : vector<2x256xf32>
    %291 = vector.extract_strided_slice %230 {offsets = [0, 81], sizes = [2, 256], strides = [1, 1]} : vector<2x358xf32> to vector<2x256xf32>
    %292 = vector.extract_strided_slice %228 {offsets = [0, 36], sizes = [2, 1], strides = [1, 1]} : vector<2x49xf32> to vector<2x1xf32>
    %293 = vector.broadcast %292 : vector<2x1xf32> to vector<2x256xf32>
    %294 = arith.mulf %291, %293 : vector<2x256xf32>
    %295 = arith.addf %290, %294 : vector<2x256xf32>
    %296 = vector.extract_strided_slice %230 {offsets = [0, 97], sizes = [2, 256], strides = [1, 1]} : vector<2x358xf32> to vector<2x256xf32>
    %297 = vector.extract_strided_slice %228 {offsets = [0, 43], sizes = [2, 1], strides = [1, 1]} : vector<2x49xf32> to vector<2x1xf32>
    %298 = vector.broadcast %297 : vector<2x1xf32> to vector<2x256xf32>
    %299 = arith.mulf %296, %298 : vector<2x256xf32>
    %300 = arith.addf %295, %299 : vector<2x256xf32>
    %301 = vector.broadcast %41 : vector<1x256xf32> to vector<2x256xf32>
    %302 = arith.mulf %300, %301 : vector<2x256xf32>
    %303 = arith.addf %266, %302 : vector<2x256xf32>
    %304 = vector.extract_strided_slice %230 {offsets = [0, 2], sizes = [2, 256], strides = [1, 1]} : vector<2x358xf32> to vector<2x256xf32>
    %305 = vector.extract_strided_slice %228 {offsets = [0, 2], sizes = [2, 1], strides = [1, 1]} : vector<2x49xf32> to vector<2x1xf32>
    %306 = vector.broadcast %305 : vector<2x1xf32> to vector<2x256xf32>
    %307 = arith.mulf %304, %306 : vector<2x256xf32>
    %308 = vector.extract_strided_slice %230 {offsets = [0, 18], sizes = [2, 256], strides = [1, 1]} : vector<2x358xf32> to vector<2x256xf32>
    %309 = vector.extract_strided_slice %228 {offsets = [0, 9], sizes = [2, 1], strides = [1, 1]} : vector<2x49xf32> to vector<2x1xf32>
    %310 = vector.broadcast %309 : vector<2x1xf32> to vector<2x256xf32>
    %311 = arith.mulf %308, %310 : vector<2x256xf32>
    %312 = arith.addf %307, %311 : vector<2x256xf32>
    %313 = vector.extract_strided_slice %230 {offsets = [0, 34], sizes = [2, 256], strides = [1, 1]} : vector<2x358xf32> to vector<2x256xf32>
    %314 = vector.extract_strided_slice %228 {offsets = [0, 16], sizes = [2, 1], strides = [1, 1]} : vector<2x49xf32> to vector<2x1xf32>
    %315 = vector.broadcast %314 : vector<2x1xf32> to vector<2x256xf32>
    %316 = arith.mulf %313, %315 : vector<2x256xf32>
    %317 = arith.addf %312, %316 : vector<2x256xf32>
    %318 = vector.extract_strided_slice %230 {offsets = [0, 50], sizes = [2, 256], strides = [1, 1]} : vector<2x358xf32> to vector<2x256xf32>
    %319 = vector.extract_strided_slice %228 {offsets = [0, 23], sizes = [2, 1], strides = [1, 1]} : vector<2x49xf32> to vector<2x1xf32>
    %320 = vector.broadcast %319 : vector<2x1xf32> to vector<2x256xf32>
    %321 = arith.mulf %318, %320 : vector<2x256xf32>
    %322 = arith.addf %317, %321 : vector<2x256xf32>
    %323 = vector.extract_strided_slice %230 {offsets = [0, 66], sizes = [2, 256], strides = [1, 1]} : vector<2x358xf32> to vector<2x256xf32>
    %324 = vector.extract_strided_slice %228 {offsets = [0, 30], sizes = [2, 1], strides = [1, 1]} : vector<2x49xf32> to vector<2x1xf32>
    %325 = vector.broadcast %324 : vector<2x1xf32> to vector<2x256xf32>
    %326 = arith.mulf %323, %325 : vector<2x256xf32>
    %327 = arith.addf %322, %326 : vector<2x256xf32>
    %328 = vector.extract_strided_slice %230 {offsets = [0, 82], sizes = [2, 256], strides = [1, 1]} : vector<2x358xf32> to vector<2x256xf32>
    %329 = vector.extract_strided_slice %228 {offsets = [0, 37], sizes = [2, 1], strides = [1, 1]} : vector<2x49xf32> to vector<2x1xf32>
    %330 = vector.broadcast %329 : vector<2x1xf32> to vector<2x256xf32>
    %331 = arith.mulf %328, %330 : vector<2x256xf32>
    %332 = arith.addf %327, %331 : vector<2x256xf32>
    %333 = vector.extract_strided_slice %230 {offsets = [0, 98], sizes = [2, 256], strides = [1, 1]} : vector<2x358xf32> to vector<2x256xf32>
    %334 = vector.extract_strided_slice %228 {offsets = [0, 44], sizes = [2, 1], strides = [1, 1]} : vector<2x49xf32> to vector<2x1xf32>
    %335 = vector.broadcast %334 : vector<2x1xf32> to vector<2x256xf32>
    %336 = arith.mulf %333, %335 : vector<2x256xf32>
    %337 = arith.addf %332, %336 : vector<2x256xf32>
    %338 = vector.broadcast %52 : vector<1x256xf32> to vector<2x256xf32>
    %339 = arith.mulf %337, %338 : vector<2x256xf32>
    %340 = arith.addf %303, %339 : vector<2x256xf32>
    %341 = vector.extract_strided_slice %230 {offsets = [0, 3], sizes = [2, 256], strides = [1, 1]} : vector<2x358xf32> to vector<2x256xf32>
    %342 = vector.extract_strided_slice %228 {offsets = [0, 3], sizes = [2, 1], strides = [1, 1]} : vector<2x49xf32> to vector<2x1xf32>
    %343 = vector.broadcast %342 : vector<2x1xf32> to vector<2x256xf32>
    %344 = arith.mulf %341, %343 : vector<2x256xf32>
    %345 = vector.extract_strided_slice %230 {offsets = [0, 19], sizes = [2, 256], strides = [1, 1]} : vector<2x358xf32> to vector<2x256xf32>
    %346 = vector.extract_strided_slice %228 {offsets = [0, 10], sizes = [2, 1], strides = [1, 1]} : vector<2x49xf32> to vector<2x1xf32>
    %347 = vector.broadcast %346 : vector<2x1xf32> to vector<2x256xf32>
    %348 = arith.mulf %345, %347 : vector<2x256xf32>
    %349 = arith.addf %344, %348 : vector<2x256xf32>
    %350 = vector.extract_strided_slice %230 {offsets = [0, 35], sizes = [2, 256], strides = [1, 1]} : vector<2x358xf32> to vector<2x256xf32>
    %351 = vector.extract_strided_slice %228 {offsets = [0, 17], sizes = [2, 1], strides = [1, 1]} : vector<2x49xf32> to vector<2x1xf32>
    %352 = vector.broadcast %351 : vector<2x1xf32> to vector<2x256xf32>
    %353 = arith.mulf %350, %352 : vector<2x256xf32>
    %354 = arith.addf %349, %353 : vector<2x256xf32>
    %355 = vector.extract_strided_slice %230 {offsets = [0, 51], sizes = [2, 256], strides = [1, 1]} : vector<2x358xf32> to vector<2x256xf32>
    %356 = vector.extract_strided_slice %228 {offsets = [0, 24], sizes = [2, 1], strides = [1, 1]} : vector<2x49xf32> to vector<2x1xf32>
    %357 = vector.broadcast %356 : vector<2x1xf32> to vector<2x256xf32>
    %358 = arith.mulf %355, %357 : vector<2x256xf32>
    %359 = arith.addf %354, %358 : vector<2x256xf32>
    %360 = vector.extract_strided_slice %230 {offsets = [0, 67], sizes = [2, 256], strides = [1, 1]} : vector<2x358xf32> to vector<2x256xf32>
    %361 = vector.extract_strided_slice %228 {offsets = [0, 31], sizes = [2, 1], strides = [1, 1]} : vector<2x49xf32> to vector<2x1xf32>
    %362 = vector.broadcast %361 : vector<2x1xf32> to vector<2x256xf32>
    %363 = arith.mulf %360, %362 : vector<2x256xf32>
    %364 = arith.addf %359, %363 : vector<2x256xf32>
    %365 = vector.extract_strided_slice %230 {offsets = [0, 83], sizes = [2, 256], strides = [1, 1]} : vector<2x358xf32> to vector<2x256xf32>
    %366 = vector.extract_strided_slice %228 {offsets = [0, 38], sizes = [2, 1], strides = [1, 1]} : vector<2x49xf32> to vector<2x1xf32>
    %367 = vector.broadcast %366 : vector<2x1xf32> to vector<2x256xf32>
    %368 = arith.mulf %365, %367 : vector<2x256xf32>
    %369 = arith.addf %364, %368 : vector<2x256xf32>
    %370 = vector.extract_strided_slice %230 {offsets = [0, 99], sizes = [2, 256], strides = [1, 1]} : vector<2x358xf32> to vector<2x256xf32>
    %371 = vector.extract_strided_slice %228 {offsets = [0, 45], sizes = [2, 1], strides = [1, 1]} : vector<2x49xf32> to vector<2x1xf32>
    %372 = vector.broadcast %371 : vector<2x1xf32> to vector<2x256xf32>
    %373 = arith.mulf %370, %372 : vector<2x256xf32>
    %374 = arith.addf %369, %373 : vector<2x256xf32>
    %375 = arith.addf %340, %374 : vector<2x256xf32>
    %376 = vector.extract_strided_slice %230 {offsets = [0, 4], sizes = [2, 256], strides = [1, 1]} : vector<2x358xf32> to vector<2x256xf32>
    %377 = vector.extract_strided_slice %228 {offsets = [0, 4], sizes = [2, 1], strides = [1, 1]} : vector<2x49xf32> to vector<2x1xf32>
    %378 = vector.broadcast %377 : vector<2x1xf32> to vector<2x256xf32>
    %379 = arith.mulf %376, %378 : vector<2x256xf32>
    %380 = vector.extract_strided_slice %230 {offsets = [0, 20], sizes = [2, 256], strides = [1, 1]} : vector<2x358xf32> to vector<2x256xf32>
    %381 = vector.extract_strided_slice %228 {offsets = [0, 11], sizes = [2, 1], strides = [1, 1]} : vector<2x49xf32> to vector<2x1xf32>
    %382 = vector.broadcast %381 : vector<2x1xf32> to vector<2x256xf32>
    %383 = arith.mulf %380, %382 : vector<2x256xf32>
    %384 = arith.addf %379, %383 : vector<2x256xf32>
    %385 = vector.extract_strided_slice %230 {offsets = [0, 36], sizes = [2, 256], strides = [1, 1]} : vector<2x358xf32> to vector<2x256xf32>
    %386 = vector.extract_strided_slice %228 {offsets = [0, 18], sizes = [2, 1], strides = [1, 1]} : vector<2x49xf32> to vector<2x1xf32>
    %387 = vector.broadcast %386 : vector<2x1xf32> to vector<2x256xf32>
    %388 = arith.mulf %385, %387 : vector<2x256xf32>
    %389 = arith.addf %384, %388 : vector<2x256xf32>
    %390 = vector.extract_strided_slice %230 {offsets = [0, 52], sizes = [2, 256], strides = [1, 1]} : vector<2x358xf32> to vector<2x256xf32>
    %391 = vector.extract_strided_slice %228 {offsets = [0, 25], sizes = [2, 1], strides = [1, 1]} : vector<2x49xf32> to vector<2x1xf32>
    %392 = vector.broadcast %391 : vector<2x1xf32> to vector<2x256xf32>
    %393 = arith.mulf %390, %392 : vector<2x256xf32>
    %394 = arith.addf %389, %393 : vector<2x256xf32>
    %395 = vector.extract_strided_slice %230 {offsets = [0, 68], sizes = [2, 256], strides = [1, 1]} : vector<2x358xf32> to vector<2x256xf32>
    %396 = vector.extract_strided_slice %228 {offsets = [0, 32], sizes = [2, 1], strides = [1, 1]} : vector<2x49xf32> to vector<2x1xf32>
    %397 = vector.broadcast %396 : vector<2x1xf32> to vector<2x256xf32>
    %398 = arith.mulf %395, %397 : vector<2x256xf32>
    %399 = arith.addf %394, %398 : vector<2x256xf32>
    %400 = vector.extract_strided_slice %230 {offsets = [0, 84], sizes = [2, 256], strides = [1, 1]} : vector<2x358xf32> to vector<2x256xf32>
    %401 = vector.extract_strided_slice %228 {offsets = [0, 39], sizes = [2, 1], strides = [1, 1]} : vector<2x49xf32> to vector<2x1xf32>
    %402 = vector.broadcast %401 : vector<2x1xf32> to vector<2x256xf32>
    %403 = arith.mulf %400, %402 : vector<2x256xf32>
    %404 = arith.addf %399, %403 : vector<2x256xf32>
    %405 = vector.extract_strided_slice %230 {offsets = [0, 100], sizes = [2, 256], strides = [1, 1]} : vector<2x358xf32> to vector<2x256xf32>
    %406 = vector.extract_strided_slice %228 {offsets = [0, 46], sizes = [2, 1], strides = [1, 1]} : vector<2x49xf32> to vector<2x1xf32>
    %407 = vector.broadcast %406 : vector<2x1xf32> to vector<2x256xf32>
    %408 = arith.mulf %405, %407 : vector<2x256xf32>
    %409 = arith.addf %404, %408 : vector<2x256xf32>
    %410 = vector.broadcast %63 : vector<1x256xf32> to vector<2x256xf32>
    %411 = arith.mulf %409, %410 : vector<2x256xf32>
    %412 = arith.addf %375, %411 : vector<2x256xf32>
    %413 = vector.extract_strided_slice %230 {offsets = [0, 5], sizes = [2, 256], strides = [1, 1]} : vector<2x358xf32> to vector<2x256xf32>
    %414 = vector.extract_strided_slice %228 {offsets = [0, 5], sizes = [2, 1], strides = [1, 1]} : vector<2x49xf32> to vector<2x1xf32>
    %415 = vector.broadcast %414 : vector<2x1xf32> to vector<2x256xf32>
    %416 = arith.mulf %413, %415 : vector<2x256xf32>
    %417 = vector.extract_strided_slice %230 {offsets = [0, 21], sizes = [2, 256], strides = [1, 1]} : vector<2x358xf32> to vector<2x256xf32>
    %418 = vector.extract_strided_slice %228 {offsets = [0, 12], sizes = [2, 1], strides = [1, 1]} : vector<2x49xf32> to vector<2x1xf32>
    %419 = vector.broadcast %418 : vector<2x1xf32> to vector<2x256xf32>
    %420 = arith.mulf %417, %419 : vector<2x256xf32>
    %421 = arith.addf %416, %420 : vector<2x256xf32>
    %422 = vector.extract_strided_slice %230 {offsets = [0, 37], sizes = [2, 256], strides = [1, 1]} : vector<2x358xf32> to vector<2x256xf32>
    %423 = vector.extract_strided_slice %228 {offsets = [0, 19], sizes = [2, 1], strides = [1, 1]} : vector<2x49xf32> to vector<2x1xf32>
    %424 = vector.broadcast %423 : vector<2x1xf32> to vector<2x256xf32>
    %425 = arith.mulf %422, %424 : vector<2x256xf32>
    %426 = arith.addf %421, %425 : vector<2x256xf32>
    %427 = vector.extract_strided_slice %230 {offsets = [0, 53], sizes = [2, 256], strides = [1, 1]} : vector<2x358xf32> to vector<2x256xf32>
    %428 = vector.extract_strided_slice %228 {offsets = [0, 26], sizes = [2, 1], strides = [1, 1]} : vector<2x49xf32> to vector<2x1xf32>
    %429 = vector.broadcast %428 : vector<2x1xf32> to vector<2x256xf32>
    %430 = arith.mulf %427, %429 : vector<2x256xf32>
    %431 = arith.addf %426, %430 : vector<2x256xf32>
    %432 = vector.extract_strided_slice %230 {offsets = [0, 69], sizes = [2, 256], strides = [1, 1]} : vector<2x358xf32> to vector<2x256xf32>
    %433 = vector.extract_strided_slice %228 {offsets = [0, 33], sizes = [2, 1], strides = [1, 1]} : vector<2x49xf32> to vector<2x1xf32>
    %434 = vector.broadcast %433 : vector<2x1xf32> to vector<2x256xf32>
    %435 = arith.mulf %432, %434 : vector<2x256xf32>
    %436 = arith.addf %431, %435 : vector<2x256xf32>
    %437 = vector.extract_strided_slice %230 {offsets = [0, 85], sizes = [2, 256], strides = [1, 1]} : vector<2x358xf32> to vector<2x256xf32>
    %438 = vector.extract_strided_slice %228 {offsets = [0, 40], sizes = [2, 1], strides = [1, 1]} : vector<2x49xf32> to vector<2x1xf32>
    %439 = vector.broadcast %438 : vector<2x1xf32> to vector<2x256xf32>
    %440 = arith.mulf %437, %439 : vector<2x256xf32>
    %441 = arith.addf %436, %440 : vector<2x256xf32>
    %442 = vector.extract_strided_slice %230 {offsets = [0, 101], sizes = [2, 256], strides = [1, 1]} : vector<2x358xf32> to vector<2x256xf32>
    %443 = vector.extract_strided_slice %228 {offsets = [0, 47], sizes = [2, 1], strides = [1, 1]} : vector<2x49xf32> to vector<2x1xf32>
    %444 = vector.broadcast %443 : vector<2x1xf32> to vector<2x256xf32>
    %445 = arith.mulf %442, %444 : vector<2x256xf32>
    %446 = arith.addf %441, %445 : vector<2x256xf32>
    %447 = vector.broadcast %74 : vector<1x256xf32> to vector<2x256xf32>
    %448 = arith.mulf %446, %447 : vector<2x256xf32>
    %449 = arith.addf %412, %448 : vector<2x256xf32>
    %450 = vector.extract_strided_slice %230 {offsets = [0, 6], sizes = [2, 256], strides = [1, 1]} : vector<2x358xf32> to vector<2x256xf32>
    %451 = vector.extract_strided_slice %228 {offsets = [0, 6], sizes = [2, 1], strides = [1, 1]} : vector<2x49xf32> to vector<2x1xf32>
    %452 = vector.broadcast %451 : vector<2x1xf32> to vector<2x256xf32>
    %453 = arith.mulf %450, %452 : vector<2x256xf32>
    %454 = vector.extract_strided_slice %230 {offsets = [0, 22], sizes = [2, 256], strides = [1, 1]} : vector<2x358xf32> to vector<2x256xf32>
    %455 = vector.extract_strided_slice %228 {offsets = [0, 13], sizes = [2, 1], strides = [1, 1]} : vector<2x49xf32> to vector<2x1xf32>
    %456 = vector.broadcast %455 : vector<2x1xf32> to vector<2x256xf32>
    %457 = arith.mulf %454, %456 : vector<2x256xf32>
    %458 = arith.addf %453, %457 : vector<2x256xf32>
    %459 = vector.extract_strided_slice %230 {offsets = [0, 38], sizes = [2, 256], strides = [1, 1]} : vector<2x358xf32> to vector<2x256xf32>
    %460 = vector.extract_strided_slice %228 {offsets = [0, 20], sizes = [2, 1], strides = [1, 1]} : vector<2x49xf32> to vector<2x1xf32>
    %461 = vector.broadcast %460 : vector<2x1xf32> to vector<2x256xf32>
    %462 = arith.mulf %459, %461 : vector<2x256xf32>
    %463 = arith.addf %458, %462 : vector<2x256xf32>
    %464 = vector.extract_strided_slice %230 {offsets = [0, 54], sizes = [2, 256], strides = [1, 1]} : vector<2x358xf32> to vector<2x256xf32>
    %465 = vector.extract_strided_slice %228 {offsets = [0, 27], sizes = [2, 1], strides = [1, 1]} : vector<2x49xf32> to vector<2x1xf32>
    %466 = vector.broadcast %465 : vector<2x1xf32> to vector<2x256xf32>
    %467 = arith.mulf %464, %466 : vector<2x256xf32>
    %468 = arith.addf %463, %467 : vector<2x256xf32>
    %469 = vector.extract_strided_slice %230 {offsets = [0, 70], sizes = [2, 256], strides = [1, 1]} : vector<2x358xf32> to vector<2x256xf32>
    %470 = vector.extract_strided_slice %228 {offsets = [0, 34], sizes = [2, 1], strides = [1, 1]} : vector<2x49xf32> to vector<2x1xf32>
    %471 = vector.broadcast %470 : vector<2x1xf32> to vector<2x256xf32>
    %472 = arith.mulf %469, %471 : vector<2x256xf32>
    %473 = arith.addf %468, %472 : vector<2x256xf32>
    %474 = vector.extract_strided_slice %230 {offsets = [0, 86], sizes = [2, 256], strides = [1, 1]} : vector<2x358xf32> to vector<2x256xf32>
    %475 = vector.extract_strided_slice %228 {offsets = [0, 41], sizes = [2, 1], strides = [1, 1]} : vector<2x49xf32> to vector<2x1xf32>
    %476 = vector.broadcast %475 : vector<2x1xf32> to vector<2x256xf32>
    %477 = arith.mulf %474, %476 : vector<2x256xf32>
    %478 = arith.addf %473, %477 : vector<2x256xf32>
    %479 = vector.extract_strided_slice %230 {offsets = [0, 102], sizes = [2, 256], strides = [1, 1]} : vector<2x358xf32> to vector<2x256xf32>
    %480 = vector.extract_strided_slice %228 {offsets = [0, 48], sizes = [2, 1], strides = [1, 1]} : vector<2x49xf32> to vector<2x1xf32>
    %481 = vector.broadcast %480 : vector<2x1xf32> to vector<2x256xf32>
    %482 = arith.mulf %479, %481 : vector<2x256xf32>
    %483 = arith.addf %478, %482 : vector<2x256xf32>
    %484 = vector.broadcast %85 : vector<1x256xf32> to vector<2x256xf32>
    %485 = arith.mulf %483, %484 : vector<2x256xf32>
    %486 = arith.addf %449, %485 : vector<2x256xf32>
    %cst_53 = arith.constant dense<0.000000e+00> : vector<256xf32>
    %487 = vector.multi_reduction <add>, %486, %cst_53 [0] : vector<2x256xf32> to vector<256xf32>
    %488 = vector.shape_cast %487 : vector<256xf32> to vector<1x256xf32>
    %c0_54 = arith.constant 0 : index
    %489 = memref.load %arg3[%c0_54] : memref<1xf32, #tpu.memory_space<smem>>
    %490 = vector.broadcast %489 : f32 to vector<1x256xf32>
    %491 = arith.addf %488, %490 : vector<1x256xf32>
    %cst_55 = arith.constant 3.000000e+00 : f32
    %492 = vector.broadcast %cst_55 : f32 to vector<1x256xf32>
    %493 = arith.addf %491, %492 : vector<1x256xf32>
    %cst_56 = arith.constant 1.000000e-03 : f32
    %494 = vector.broadcast %cst_56 : f32 to vector<1x256xf32>
    %495 = arith.mulf %494, %493 : vector<1x256xf32>
    %496 = arith.maximumf %495, %493 : vector<1x256xf32>
    %cst_57 = arith.constant 6.000000e+00 : f32
    %497 = vector.broadcast %cst_57 : f32 to vector<1x256xf32>
    %498 = arith.minimumf %497, %496 : vector<1x256xf32>
    %cst_58 = arith.constant 0.166666672 : f32
    %499 = vector.broadcast %cst_58 : f32 to vector<1x256xf32>
    %500 = arith.mulf %498, %499 : vector<1x256xf32>
    %501 = arith.negf %500 : vector<1x256xf32>
    %502 = math.exp %501 : vector<1x256xf32>
    %cst_59 = arith.constant 1.000000e+00 : f32
    %503 = vector.broadcast %cst_59 : f32 to vector<1x256xf32>
    %504 = arith.addf %503, %502 : vector<1x256xf32>
    %505 = arith.divf %503, %504 : vector<1x256xf32>
    %506 = vector.broadcast %505 : vector<1x256xf32> to vector<8x256xf32>
    %507 = arith.mulf %220, %506 : vector<8x256xf32>
    %508 = arith.addf %507, %191 : vector<8x256xf32>
    %cst_60 = arith.constant 1.000000e-03 : f32
    %509 = vector.broadcast %cst_60 : f32 to vector<8x256xf32>
    %510 = arith.mulf %509, %508 : vector<8x256xf32>
    %511 = arith.maximumf %510, %508 : vector<8x256xf32>
    %cst_61 = arith.constant 6.000000e+00 : f32
    %512 = vector.broadcast %cst_61 : f32 to vector<8x256xf32>
    %513 = arith.minimumf %512, %511 : vector<8x256xf32>
    %c0_62 = arith.constant 0 : index
    %c0_63 = arith.constant 0 : index
    %c0_64 = arith.constant 0 : index
    %514 = vector.load %arg4[%c0_62, %c0_63, %c0_64] : memref<1x8x256xf32, #tpu.memory_space<vmem>>, vector<1x8x256xf32>
    %515 = vector.shape_cast %514 : vector<1x8x256xf32> to vector<8x256xf32>
    %516 = vector.shape_cast %513 : vector<8x256xf32> to vector<1x8x256xf32>
    tpu.vector_store %arg4[%c0_62, %c0_63, %c0_64], %516 {strides = array<i32>} : memref<1x8x256xf32, #tpu.memory_space<vmem>>, vector<1x8x256xf32>,
    return
  }
  func.func @transform_0(%arg0: i32) -> (i32, i32, i32) {
    %c0_i32 = arith.constant 0 : i32
    %c0_i32_0 = arith.constant 0 : i32
    %c0_i32_1 = arith.constant 0 : i32
    return %arg0, %c0_i32, %c0_i32_0 : i32, i32, i32
  }
  func.func @transform_1(%arg0: i32) -> (i32, i32) {
    %c0_i32 = arith.constant 0 : i32
    %c0_i32_0 = arith.constant 0 : i32
    %c0_i32_1 = arith.constant 0 : i32
    return %c0_i32, %c0_i32_0 : i32, i32
  }
  func.func @transform_2(%arg0: i32) -> i32 {
    %c0_i32 = arith.constant 0 : i32
    %c0_i32_0 = arith.constant 0 : i32
    return %c0_i32 : i32
  }
  func.func @transform_3(%arg0: i32) -> (i32, i32, i32) {
    %c0_i32 = arith.constant 0 : i32
    %c0_i32_0 = arith.constant 0 : i32
    %c0_i32_1 = arith.constant 0 : i32
    return %arg0, %c0_i32, %c0_i32_0 : i32, i32, i32
  }
}

</mosaic_0001>

<bundles_post_ra>
// kernel: _lambda_.1
= control target key start
LH: loop header
LB: loop body
LE: loop exit
PB: predicated region body
PF: predicated region fallthrough
CT: control target
= control target key end

     0   :  { %s2574_s14 = smov 0   ;;  %s3837_s0 = inlined_call_operand.vmem [shape: f32[2,4,256], index: 0, kind: input, shape index: {}]   ;;  %s3838_s1 = inlined_call_operand.vmem [shape: f32[16,128], index: 1, kind: input, shape index: {}]   ;;  %s3839_s2 = inlined_call_operand.<no memory space> [shape: f32[1], index: 2, kind: input, shape index: {}]   ;;  %s3840_s3 = inlined_call_operand.vmem [shape: f32[2,8,256], index: 3, kind: output, shape index: {}]  }
   0x1   :  { %8 = sst [smem:[#allocation2]] %s3839_s2 }
   0x2 LB: > { %s2215_s15 = sadd.s32 4294967295, %s2462_s14   ;;  %p2219_p0 = scmp.ge.s32.totalorder %s2462_s14, 1  ;;  %s2462_s14 = sphi %s2574_s14, %s14_s14  }
   0x3   : > { %p138_p1 = scmp.lt.s32.totalorder %s2462_s14, 3 }
   0x5   : > { %p139_p2 = pnand %p2219_p0, %p138_p1 }
   0x7   : > { %142 = sbr.rel (%p139_p2) target bundleno = 2905 (0xb59), region = 32 }
   0xe   : > { %p162_p3 = scmp.lt.s32.totalorder %s2215_s15, 1  ;;  %v3841_v0 = vmov 0.0   ;;  %v2586_v1 = vld [vmem:[%s3838_s1] sm:$0xff]  ;;  %v2465_v2 = vmov 4   ;;  %vm284_vm0 = vcmask 1043456   ;;  %s2466_s21 = smov 123   ;;  %v175_v28 = vlaneseq }
   0xf   : > { %353 = vmatprep.mubr.f32.mxu0 %v3841_v0  ;;  %2353 = vset.pattern.permute.xlu0 %v2465_v2  ;;  %vm281_vm1 = vcmask 31744   ;;  %v2467_v5 = vmov 13   ;;  %v2468_v6 = vmov 19   ;;  %v2469_v7 = vmov 18   ;;  %s2474_s22 = smov 17   ;;  %s2479_s23 = smov 96  }
  0x10   : > { %s3948_s15 = smov (!%p162_p3, %s2215_s15), 1  ;;  %276 = vperm.xlu0 %2353, %v2586_v1   ;;  %439 = vmatprep.mubr.f32.mxu1 %v3841_v0  ;;  %v2470_v8 = vmov 21   ;;  %v2471_v9 = vmov 22   ;;  %vm372_vm2 = vcmask 64512   ;;  %v2472_v22 = vmov 17   ;;  %s2480_s24 = smov 112  }
  0x11   : > { %s2248_s17 = sshll.u32 %s3948_s15, 3  ;;  %2354 = vset.pattern.permute.xlu1 %v2467_v5  ;;  %v2473_v23 = vmov 20   ;;  %v176_v30 = vand.u32 127, %v175_v28  ;;  %v2475_v36 = vmov 16   ;;  %v2476_v37 = vmov 15   ;;  %s2481_s25 = smov 2  }
  0x12   : > { %s166_s20 = scalar_lea.vmem %s3837_s0, %s2248_s17  ;;  %367 = vperm.xlu1 %2354, %v2586_v1   ;;  %v2477_v41 = vmov 14   ;;  %v2478_v42 = vmov 23   ;;  %vm452_vm5 = vcmask 138240   ;;  %s2482_s26 = smov 127   ;;  %vm481_vm6 = vcmask 916480  }
  0x13   : > { %v2596_v3 = vld [vmem:[%s166_s20] sm:$0xff]  ;;  %v177_v31 = vadd.s32 128, %v176_v30  ;;  %v2620_v32 = vand.u32 15, %v176_v30  ;;  %vm504_vm7 = vcmask 785408   ;;  %vm645_vm8 = vcmask 15360   ;;  %s2483_s27 = smov 126  }
  0x14   : > { %370 = vrot.lane.b32.xlu0 %v2586_v1, %s2466_s21  ;;  %v2602_v4 = vcombine.high %v2596_v3, %v2596_v3  ;;  %s2484_s28 = smov 83   ;;  %vm577_vm11 = vcmask 1039360   ;;  %vm662_vm12 = vcmask 1031168   ;;  %vm681_vm13 = vcmask 261312   ;;  %s2485_s29 = smov 8  }
  0x15   : > { %2356 = vset.pattern.permute.xlu0 %v2468_v6  ;;  %3869 = vst [vmem:[#allocation3_spill] sm:$0xff] %v2620_v32  ;;  %v2622_v33 = vand.u32 15, %v177_v31  ;;  %v238_v34 = vadd.s32 1, %v2620_v32  ;;  %s2487_s30 = smov 88   ;;  %vm2493_vm14 = vmmov 1   ;;  %s2507_s6 = smov 1  }
  0x16   : > { %2236 = vmatprep.subr.msk.mxu0 %vm284_vm0, %v2602_v4  ;;  %2355 = vset.pattern.permute.xlu1 %v2469_v7  ;;  %vm2251_vm15 = vmpackc.low %vm284_vm0, %vm2493_vm14  ;;  %s2535_s7 = smov 5   ;;  %s2540_s10 = smov 67   ;;  %vm963_vm14 = vcmask 654336  }
  0x17   : > { %2237 = vmatpush1.msk.msra.mxu0 %vm284_vm0, %v2596_v3  ;;  %521 = vperm.xlu1 %2355, %v2586_v1   ;;  %3870 = vst [vmem:[#allocation4_spill] sm:$0xff] %v2622_v33  ;;  %v239_v35 = vadd.s32 1, %v2622_v33  ;;  %vm242_vm3 = vcmp.lt.s32.totalorder %v238_v34, 16  ;;  %s2541_s11 = smov 4   ;;  %s2542_s12 = smov 51  }
  0x18   : > { %2238 = vmatmul.mubr.msk.f32.vlgmr.msra.gmra.mrb[0].mxu0 %vm281_vm1, %v2586_v1  ;;  %592 = vperm.xlu0 %2356, %v2586_v1   ;;  %v2230_v38 = vsel %vm242_vm3, 1.0, %v3841_v0  ;;  %vm730_vm3 = vcmask 97280   ;;  %s2543_s13 = smov 80   ;;  %s2544_s2 = smov 64  }
  0x19   : > { %799 = vmatprep.mubr.f32.mxu0 %v3841_v0  ;;  %vm243_vm4 = vcmp.lt.s32.totalorder %v239_v35, 16  ;;  %s2545_s16 = smov 48   ;;  %s2546_s17 = smov 32  }
  0x1a   : > { %v2231_v39 = vsel %vm243_vm4, 1.0, %v3841_v0  ;;  %s2547_s18 = smov 6   ;;  %s2548_s19 = smov 125  }
  0x1b   : > { %2357 = vset.pattern.permute.xlu1 %v2470_v8  ;;  %v2631_v40 = vpack.i.bf16 %v2231_v39, %v2230_v38  ;;  %s2549_s20 = smov 124  }
  0x1c   : > { %545 = vperm.xlu1 %2357, %v2586_v1   ;;  %2359 = vset.pattern.permute.xlu0 %v2472_v22 }
  0x20   : > { %2358 = vset.pattern.permute.xlu1 %v2471_v9 }
  0x21   : > { %616 = vperm.xlu1 %2358, %v2586_v1  }
  0x25   : > { %2360 = vset.pattern.permute.xlu1 %v2473_v23 }
  0x8f   : > { %v277_v10 = vpop.permute.xlu0 %276 }
  0x91   : > { %v368_v24 = vpop.permute.xlu1 %367 }
  0x93   : > { %v371_v20 = vpop.permute.xlu0 %370 }
  0x96   : > { %v522_v43 = vpop.permute.xlu1 %521 }
  0x97   : > { %v593_v45 = vpop.permute.xlu0 %592 }
  0x9b   : > { %v546_v44 = vpop.permute.xlu1 %545 }
  0xa0   : > { %v617_v46 = vpop.permute.xlu1 %616 }
  0xeb   : > { %v355_v11 = vpop.f32.mrb[0].mxu0 }
  0xec   : > { %v356_v12 = vadd.f32 %v355_v11, %v277_v10  ;;  %v357_v13 = vpop.f32.mrb[1].mxu0 }
  0xed   : > { %v358_v14 = vadd.f32 %v357_v13, %v277_v10 }
  0xee   : > { %v360_v15 = vmul.f32 0.001, %v356_v12 }
  0xef   : > { %v361_v16 = vmul.f32 0.001, %v358_v14 }
  0xf0   : > { %v362_v17 = vmax.f32 %v360_v15, %v356_v12 }
  0xf1   : > { %v363_v18 = vmax.f32 %v361_v16, %v358_v14 }
  0xf2   : > { %v364_v21 = vmin.f32 %v362_v17, 6.0 }
  0xf3   : > { %v365_v19 = vmin.f32 %v363_v18, 6.0 }
  0xf5   : > { %375 = vmatprep.subr.mxu1 %v365_v19 }
  0xf6   : > { %376 = vmatpush1.msra.mxu1 %v364_v21 }
  0xf7   : > { %2239 = vmatmul.mubr.msk.f32.vlgmr.msra.gmra.mrb[0].mxu1 %vm372_vm2, %v371_v20 }
  0xf8   : > { %805 = vmatprep.mubr.f32.mxu1 %v3841_v0 }
 0x1ca   : > { %v441_v25 = vpop.f32.mrb[0].mxu1 }
 0x1cb   : > { %v442_v26 = vadd.f32 %v441_v25, %v368_v24  ;;  %v443_v27 = vpop.f32.mrb[1].mxu1 }
 0x1cc   : > { %v444_v29 = vadd.f32 %v443_v27, %v368_v24 }
 0x1cd   : > { %448 = vrot.lane.b32.xlu0 %v442_v26, %s2474_s22 }
 0x1ce   : > { %450 = vrot.lane.b32.xlu1 %v444_v29, %s2474_s22  ;;  %s2550_s22 = smov 122  }
 0x1d1   : > { %466 = vperm.xlu0 %2359, %v2586_v1  }
 0x1d2   : > { %489 = vperm.xlu1 %2360, %v2586_v1  }
 0x1d5   : > { %2362 = vset.pattern.permute.xlu0 %v2475_v36 }
 0x1d6   : > { %2361 = vset.pattern.permute.xlu1 %v2476_v37  ;;  %585 = vperm.xlu0 %2362, %v2586_v1  }
 0x1d7   : > { %514 = vperm.xlu1 %2361, %v2586_v1  }
 0x1da   : > { %2369 = vset.pattern.permute.xlu0 %v2478_v42 }
 0x1db   : > { %2368 = vset.pattern.permute.xlu1 %v2477_v41 }
 0x23f   : > { %v449_v47 = vpop.permute.xlu0 %448 }
 0x240   : > { %v2633_v48 = vsel %vm452_vm5, 0.0, %v449_v47  ;;  %v451_v49 = vpop.permute.xlu1 %450 }
 0x241   : > { %v548_v50 = vmul.f32 %v546_v44, %v2633_v48  ;;  %v524_v51 = vmul.f32 %v522_v43, %v2633_v48  ;;  %v2637_v52 = vsel %vm452_vm5, %v451_v49, 0.0  ;;  %v595_v54 = vmul.f32 %v593_v45, %v2633_v48 }
 0x242   : > { %v526_v53 = vmul.f32 %v522_v43, %v2637_v52  ;;  %v2643_v55 = vsel %vm452_vm5, %v449_v47, %v451_v49  ;;  %v619_v56 = vmul.f32 %v617_v46, %v2633_v48  ;;  %v550_v58 = vmul.f32 %v546_v44, %v2637_v52 }
 0x243   : > { %554 = vrot.lane.b32.xlu0 %v548_v50, %s2479_s23  ;;  %530 = vrot.lane.b32.xlu1 %v524_v51, %s2480_s24  ;;  %v596_v57 = vmul.f32 %v593_v45, %v2643_v55  ;;  %v525_v59 = vmul.f32 %v522_v43, %v2643_v55  ;;  %v620_v60 = vmul.f32 %v617_v46, %v2643_v55  ;;  %vm817_vm5 = vcmask 499112  }
 0x244   : > { %v597_v61 = vmul.f32 %v593_v45, %v2637_v52  ;;  %v549_v62 = vmul.f32 %v546_v44, %v2643_v55  ;;  %v621_v2 = vmul.f32 %v617_v46, %v2637_v52 }
 0x247   : > { %534 = vrot.lane.b32.xlu0 %v526_v53, %s2480_s24  ;;  %601 = vrot.lane.b32.xlu1 %v595_v54, %s2480_s24 }
 0x24b   : > { %625 = vrot.lane.b32.xlu1 %v619_v56, %s2479_s23  ;;  %603 = vrot.lane.b32.xlu0 %v596_v57, %s2480_s24 }
 0x24f   : > { %558 = vrot.lane.b32.xlu0 %v550_v58, %s2479_s23  ;;  %532 = vrot.lane.b32.xlu1 %v525_v59, %s2480_s24 }
 0x250   : > { %v467_v63 = vpop.permute.xlu0 %466 }
 0x251   : > { %v469_v5 = vmul.f32 %v467_v63, %v2633_v48  ;;  %v490_v6 = vpop.permute.xlu1 %489  ;;  %v471_v8 = vmul.f32 %v467_v63, %v2637_v52  ;;  %v470_v9 = vmul.f32 %v467_v63, %v2643_v55 }
 0x252   : > { %v492_v7 = vmul.f32 %v490_v6, %v2633_v48  ;;  %v493_v10 = vmul.f32 %v490_v6, %v2643_v55  ;;  %v494_v11 = vmul.f32 %v490_v6, %v2637_v52 }
 0x253   : > { %627 = vrot.lane.b32.xlu0 %v620_v60, %s2479_s23  ;;  %605 = vrot.lane.b32.xlu1 %v597_v61, %s2480_s24 }
 0x255   : > { %v586_v12 = vpop.permute.xlu0 %585 }
 0x256   : > { %v515_v13 = vpop.permute.xlu1 %514  ;;  %v589_v39 = vmul.f32 %v586_v12, %v2643_v55  ;;  %v588_v46 = vmul.f32 %v586_v12, %v2633_v48  ;;  %v590_v57 = vmul.f32 %v586_v12, %v2637_v52 }
 0x257   : > { %2364 = vrot.lane.b32.xlu0 %v2631_v40, %s2481_s25  ;;  %556 = vrot.lane.b32.xlu1 %v549_v62, %s2479_s23  ;;  %v519_v20 = vmul.f32 %v515_v13, %v2637_v52  ;;  %v517_v29 = vmul.f32 %v515_v13, %v2633_v48  ;;  %v518_v41 = vmul.f32 %v515_v13, %v2643_v55 }
 0x25b   : > { %629 = vrot.lane.b32.xlu1 %v621_v2, %s2479_s23  ;;  %475 = vrot.lane.b32.xlu0 %v469_v5, %s2480_s24 }
 0x25f   : > { %460 = vperm.xlu1 %2368, %v2586_v1   ;;  %670 = vperm.xlu0 %2369, %v2586_v1  }
 0x263   : > { %498 = vrot.lane.b32.xlu1 %v492_v7, %s2479_s23  ;;  %479 = vrot.lane.b32.xlu0 %v471_v8, %s2480_s24 }
 0x267   : > { %477 = vrot.lane.b32.xlu1 %v470_v9, %s2480_s24  ;;  %500 = vrot.lane.b32.xlu0 %v493_v10, %s2479_s23 }
 0x26b   : > { %502 = vrot.lane.b32.xlu1 %v494_v11, %s2479_s23 }
 0x2b5   : > { %v531_v14 = vpop.permute.xlu1 %530  ;;  %v555_v15 = vpop.permute.xlu0 %554 }
 0x2b9   : > { %v602_v16 = vpop.permute.xlu1 %601  ;;  %v535_v17 = vpop.permute.xlu0 %534 }
 0x2ba   : > { %v543_v21 = vadd.f32 %v535_v17, %v519_v20 }
 0x2bd   : > { %v626_v18 = vpop.permute.xlu1 %625  ;;  %v604_v19 = vpop.permute.xlu0 %603 }
 0x2be   : > { %v607_v43 = vsel %vm481_vm6, %v602_v16, %v604_v19 }
 0x2bf   : > { %v612_v56 = vadd.f32 %v607_v43, %v588_v46 }
 0x2c1   : > { %v533_v22 = vpop.permute.xlu1 %532  ;;  %v559_v23 = vpop.permute.xlu0 %558 }
 0x2c2   : > { %v567_v24 = vadd.f32 %v559_v23, %v543_v21  ;;  %v536_v27 = vsel %vm481_vm6, %v531_v14, %v533_v22  ;;  %v537_v35 = vsel %vm481_vm6, %v533_v22, %v535_v17  ;;  %v226_v14 = vadd.s32 4294967295, %v2620_v32 }
 0x2c3   : > { %v541_v30 = vadd.f32 %v536_v27, %v517_v29  ;;  %v542_v47 = vadd.f32 %v537_v35, %v518_v41  ;;  %v227_v17 = vadd.s32 4294967295, %v2622_v33 }
 0x2c4   : > { %575 = vrot.lane.b32.xlu0 %v567_v24, %s2482_s26  ;;  %vm228_vm9 = vcmp.ge.s32.totalorder %v226_v14, 0  ;;  %v2490_v14 = vmov 87  }
 0x2c5   : > { %v606_v25 = vpop.permute.xlu1 %605  ;;  %v628_v26 = vpop.permute.xlu0 %627  ;;  %vm229_vm10 = vcmp.ge.s32.totalorder %v227_v17, 0 }
 0x2c6   : > { %v608_v36 = vsel %vm481_vm6, %v604_v19, %v606_v25  ;;  %v631_v51 = vsel %vm504_vm7, %v626_v18, %v628_v26  ;;  %v614_v60 = vadd.f32 %v606_v25, %v590_v57  ;;  %v2713_v29 = vsel %vm229_vm10, 1.0, %v3841_v0 }
 0x2c7   : > { %v613_v49 = vadd.f32 %v608_v36, %v589_v39  ;;  %v636_v61 = vadd.f32 %v631_v51, %v612_v56 }
 0x2c9   : > { %v557_v31 = vpop.permute.xlu1 %556  ;;  %v2365_v34 = vpop.permute.xlu0 %2364 }
 0x2ca   : > { %v560_v37 = vsel %vm504_vm7, %v555_v15, %v557_v31  ;;  %v2367_v38 = vunpack.i.h.bf16 %v2365_v34  ;;  %v561_v44 = vsel %vm504_vm7, %v557_v31, %v559_v23  ;;  %v2366_v45 = vunpack.i.l.bf16 %v2365_v34 }
 0x2cb   : > { %v565_v42 = vadd.f32 %v560_v37, %v541_v30  ;;  %v566_v59 = vadd.f32 %v561_v44, %v542_v47 }
 0x2cc   : > { %v646_v54 = vsel %vm645_vm8, %v2366_v45, %v2367_v38  ;;  %v650_v2 = vmul.f32 %v2366_v45, %v636_v61 }
 0x2cd   : > { %v630_v50 = vpop.permute.xlu1 %629  ;;  %571 = vrot.lane.b32.xlu1 %v565_v42, %s2482_s26  ;;  %v476_v6 = vpop.permute.xlu0 %475 }
 0x2ce   : > { %v632_v53 = vsel %vm504_vm7, %v628_v26, %v630_v50  ;;  %v638_v63 = vadd.f32 %v630_v50, %v614_v60  ;;  %v2710_v26 = vsel %vm228_vm9, 1.0, %v3841_v0  ;;  %v2723_v60 = vshrl.u32 %v175_v28, 7 }
 0x2cf   : > { %v637_v58 = vadd.f32 %v632_v53, %v613_v49 }
 0x2d0   : > { %v652_v5 = vmul.f32 %v2367_v38, %v638_v63 }
 0x2d1   : > { %573 = vrot.lane.b32.xlu1 %v566_v59, %s2482_s26  ;;  %v651_v62 = vmul.f32 %v646_v54, %v637_v58 }
 0x2d3   : > { %658 = vrot.lane.b32.xlu0 %v651_v62, %s2483_s27 }
 0x2d5   : > { %656 = vrot.lane.b32.xlu1 %v650_v2, %s2483_s27  ;;  %v696_v2 = vsub.s32 0, %v2723_v60 }
 0x2d9   : > { %660 = vrot.lane.b32.xlu1 %v652_v5, %s2483_s27 }
 0x2dd   : > { %689 = vrot.lane.b32.xlu1 %v2586_v1, %s2484_s28 }
 0x2de   : > { %v461_v52 = vpop.permute.xlu1 %460  ;;  %v671_v8 = vpop.permute.xlu0 %670 }
 0x2df   : > { %v463_v13 = vmul.f32 %v461_v52, %v2633_v48  ;;  %v464_v20 = vmul.f32 %v461_v52, %v2643_v55 }
 0x2e2   : > { %v499_v7 = vpop.permute.xlu1 %498  ;;  %v480_v10 = vpop.permute.xlu0 %479 }
 0x2e6   : > { %v478_v9 = vpop.permute.xlu1 %477  ;;  %v501_v16 = vpop.permute.xlu0 %500 }
 0x2e7   : > { %v482_v12 = vsel %vm481_vm6, %v476_v6, %v478_v9  ;;  %v483_v19 = vsel %vm481_vm6, %v478_v9, %v480_v10  ;;  %v505_v21 = vsel %vm504_vm7, %v499_v7, %v501_v16  ;;  %v2486_v6 = vmov 52   ;;  %v174_v10 = vld [vmem:[%s3838_s1 + $0x8] sm:$0xff] }
 0x2e8   : > { %v486_v15 = vadd.f32 %v482_v12, %v463_v13  ;;  %v487_v23 = vadd.f32 %v483_v19, %v464_v20  ;;  %2370 = vset.pattern.permute.xlu1 %v2486_v6  ;;  %v2488_v12 = vmov 85   ;;  %v2489_v13 = vmov 86  }
 0x2e9   : > { %2379 = vset.pattern.permute.xlu0 %v2488_v12  ;;  %v2519_v12 = vmov 96  }
 0x2ea   : > { %v503_v11 = vpop.permute.xlu1 %502  ;;  %v509_v24 = vadd.f32 %v505_v21, %v486_v15  ;;  %v2491_v15 = vmov 88  }
 0x2eb   : > { %v506_v22 = vsel %vm504_vm7, %v501_v16, %v503_v11  ;;  %v825_v11 = vrot.slane %v2586_v1, 1  ;;  %v2492_v16 = vmov 102  }
 0x2ec   : > { %v510_v27 = vadd.f32 %v506_v22, %v487_v23  ;;  %v511_v30 = vmul.f32 %v2710_v26, %v509_v24 }
 0x2ee   : > { %v512_v37 = vmul.f32 %v2713_v29, %v510_v27 }
 0x336   : > { %v576_v48 = vpop.permute.xlu0 %575 }
 0x33f   : > { %v572_v18 = vpop.permute.xlu1 %571 }
 0x343   : > { %v574_v25 = vpop.permute.xlu1 %573 }
 0x344   : > { %v578_v55 = vsel %vm577_vm11, %v572_v18, %v574_v25  ;;  %v579_v35 = vsel %vm577_vm11, %v574_v25, %v576_v48 }
 0x345   : > { %v659_v31 = vpop.permute.xlu0 %658  ;;  %v582_v38 = vadd.f32 %v578_v55, %v511_v30  ;;  %v583_v39 = vadd.f32 %v579_v35, %v512_v37  ;;  %v2494_v35 = vmov 77   ;;  %v2498_v37 = vmov 105  }
 0x347   : > { %v657_v34 = vpop.permute.xlu1 %656 }
 0x348   : > { %v663_v36 = vsel %vm662_vm12, %v657_v34, %v659_v31 }
 0x349   : > { %v667_v41 = vadd.f32 %v663_v36, %v582_v38  ;;  %v2495_v36 = vmov 84   ;;  %v2499_v38 = vmov 112  }
 0x34b   : > { %v661_v42 = vpop.permute.xlu1 %660  ;;  %v673_v45 = vadd.f32 %v671_v8, %v667_v41  ;;  %v2501_v41 = vmov 78  }
 0x34c   : > { %v664_v43 = vsel %vm662_vm12, %v659_v31, %v661_v42  ;;  %v2502_v42 = vmov 92  }
 0x34d   : > { %v668_v44 = vadd.f32 %v664_v43, %v583_v39  ;;  %v2500_v39 = vmov 119   ;;  %v2503_v43 = vmov 99  }
 0x34f   : > { %v674_v46 = vadd.f32 %v671_v8, %v668_v44  ;;  %v690_v61 = vpop.permute.xlu1 %689  ;;  %v2504_v44 = vmov 106  }
 0x351   : > { %v675_v47 = vadd.f32 %v674_v46, %v673_v45 }
 0x353   : > { %676 = vadd.xlane.f32.xlu0 %v675_v47  ;;  %v2505_v47 = vmov 113  }
 0x369   : > { %726 = vrot.lane.b32.xlu0 %v2586_v1, %s2487_s30 }
 0x36d   : > { %1049 = vperm.xlu0 %2379, %v2586_v1  }
 0x371   : > { %2391 = vset.pattern.permute.xlu0 %v2489_v13 }
 0x372   : > { %1229 = vperm.xlu0 %2391, %v2586_v1  }
 0x376   : > { %2403 = vset.pattern.permute.xlu0 %v2490_v14 }
 0x377   : > { %1408 = vperm.xlu0 %2403, %v2586_v1  }
 0x37b   : > { %2406 = vset.pattern.permute.xlu0 %v2491_v15 }
 0x37c   : > { %1575 = vperm.xlu0 %2406, %v2586_v1  }
 0x380   : > { %2409 = vset.pattern.permute.xlu0 %v2492_v16 }
 0x381   : > { %1623 = vperm.xlu0 %2409, %v2586_v1  }
 0x3e0   : > { %v677_v49 = vpop.xlane.xlu0 %676 }
 0x3e1   : > { %v679_v50 = vmul.f32 0.00390625, %v677_v49 }
 0x3e3   : > { %v680_v51 = vmul.f32 %v679_v50, %v2586_v1 }
 0x3e4   : > { %v727_v31 = vpop.permute.xlu0 %726 }
 0x3e5   : > { %v682_v53 = vsel %vm681_vm13, %v680_v51, 0.0  ;;  %v2506_v51 = vmov 120   ;;  %vm890_vm13 = vcmask 416768  }
 0x3e6   : > { %v683_v54 = vrot.slane %v682_v53, 4 }
 0x3e8   : > { %v684_v56 = vadd.f32 %v683_v54, %v682_v53  ;;  %v2508_v54 = vmov 79  }
 0x3ea   : > { %v685_v57 = vrot.slane %v684_v56, 2 }
 0x3ec   : > { %v686_v58 = vadd.f32 %v685_v57, %v684_v56  ;;  %v2509_v56 = vmov 93   ;;  %v2510_v57 = vmov 100   ;;  %v2796_v13 = vpop.permute.xlu0 %1049 }
 0x3ee   : > { %v687_v59 = vrot.slane %v686_v58, 1 }
 0x3f0   : > { %v688_v62 = vadd.f32 %v687_v59, %v686_v58  ;;  %v2511_v58 = vmov 107   ;;  %v2512_v59 = vmov 114  }
 0x3f1   : > { %v2798_v14 = vpop.permute.xlu0 %1229 }
 0x3f2   : > { %v692_v63 = vadd.f32 %v690_v61, %v688_v62  ;;  %v2513_v61 = vmov 121   ;;  %v2397_v62 = vpack.i.bf16 %v2713_v29, %v2710_v26 }
 0x3f4   : > { %v693_v5 = vmax.f32 %v692_v63, 0.0  ;;  %v2514_v63 = vmov 80  }
 0x3f6   : > { %v697_v52 = vrot.slane %v693_v5, %v696_v2  ;;  %v2515_v5 = vmov 94   ;;  %v2800_v15 = vpop.permute.xlu0 %1408 }
 0x3f8   : > { %699 = vrot.lane.b32.xlu1 %v697_v52, %s2485_s29  ;;  %v2516_v52 = vmov 101  }
 0x46a   : > { %v700_v7 = vpop.permute.xlu1 %699 }
 0x46b   : > { %v702_v8 = vmul.f32 %v700_v7, %v2586_v1 }
 0x46d   : > { %704 = vrot.lane.b32.xlu1 %v702_v8, %s2479_s23 }
 0x4df   : > { %v705_v28 = vpop.permute.xlu1 %704 }
 0x4e0   : > { %v707_v9 = vsel %vm372_vm2, %v705_v28, 0.0 }
 0x4e1   : > { %708 = vadd.xlane.f32.xlu1 %v707_v9 }
 0x4f2   : > { %718 = vperm.xlu1 %2370, %v2586_v1  }
 0x4f6   : > { %723 = vperm.xlu1 %2370, %v174_v10  }
 0x4fa   : > { %826 = vrot.lane.b32.xlu1 %v825_v11, %s2480_s24  ;;  %v2518_v11 = vmov 89  }
 0x4fb   : > { %2371 = vset.pattern.permute.xlu1 %v2494_v35 }
 0x4fe   : > { %728 = vrot.lane.b32.xlu1 %v174_v10, %s2487_s30  ;;  %v2517_v10 = vmov 95  }
 0x502   : > { %898 = vperm.xlu1 %2371, %v2586_v1  }
 0x506   : > { %2372 = vset.pattern.permute.xlu1 %v2495_v36 }
 0x507   : > { %904 = vperm.xlu1 %2372, %v2586_v1  }
 0x56e   : > { %v709_v17 = vpop.xlane.xlu1 %708 }
 0x56f   : > { %v710_v18 = vadd.f32 3.0, %v709_v17  ;;  %v2804_v17 = vpop.permute.xlu0 %1575 }
 0x571   : > { %v711_v19 = vmul.f32 0.001, %v710_v18 }
 0x572   : > { %v2744_v20 = vpop.permute.xlu1 %718 }
 0x573   : > { %v712_v21 = vmax.f32 %v711_v19, %v710_v18  ;;  %v2808_v19 = vpop.permute.xlu0 %1623 }
 0x575   : > { %v713_v22 = vmin.f32 %v712_v21, 6.0 }
 0x576   : > { %v2746_v23 = vpop.permute.xlu1 %723 }
 0x577   : > { %3871 = vst [vmem:[#allocation5_spill] sm:$0xff] %v2746_v23  ;;  %v714_v24 = vmul.f32 0.16666667, %v713_v22 }
 0x579   : > { %v715_v48 = vmul.f32 %v714_v24, %v673_v45  ;;  %v716_v25 = vmul.f32 %v714_v24, %v674_v46  ;;  %v214_v45 = vadd.s32 4294967294, %v2620_v32  ;;  %v215_v46 = vadd.s32 4294967294, %v2622_v33 }
 0x57a   : > { %v2749_v27 = vpop.permute.xlu1 %826 }
 0x57b   : > { %v2253_v55 = vpack.c.bf16 %v2596_v3, %v715_v48  ;;  %v2250_v30 = vpack.c.bf16 %v2602_v4, %v716_v25  ;;  %v2496_v3 = vmov 91   ;;  %v2497_v4 = vmov 98  }
 0x57c   : > { %2373 = vset.pattern.permute.xlu1 %v2496_v3  ;;  %vm216_vm0 = vcmp.ge.s32.totalorder %v214_v45, 0  ;;  %vm217_vm4 = vcmp.ge.s32.totalorder %v215_v46, 0  ;;  %v2520_v3 = vmov 108   ;;  %v2522_v45 = vmov 90  }
 0x57d   : > { %2252 = vmatprep.subr.msk.bf16.mxu0 %vm2251_vm15, %v2250_v30  ;;  %2256 = vmatprep.subr.msk.bf16.mxu1 %vm2251_vm15, %v2250_v30  ;;  %v2226_v49 = vsel %vm216_vm0, 1.0, %v3841_v0  ;;  %v2227_v50 = vsel %vm217_vm4, 1.0, %v3841_v0  ;;  %v2525_v46 = vmov 123   ;;  %vm1032_vm0 = vcmask 261120  }
 0x57e   : > { %2255 = vmatpush1.bf16.msk.msra.mxu0 %vm2251_vm15, %v2253_v55  ;;  %2257 = vmatpush1.bf16.msk.msra.mxu1 %vm2251_vm15, %v2253_v55  ;;  %v729_v34 = vpop.permute.xlu1 %728  ;;  %v2385_v53 = vpack.i.bf16 %v2227_v50, %v2226_v49  ;;  %v2526_v49 = vmov 103   ;;  %v2527_v50 = vmov 124   ;;  %vm986_vm15 = vcmask 523264  }
 0x57f   : > { %926 = vperm.xlu1 %2373, %v2586_v1   ;;  %2412 = vset.pattern.permute.xlu0 %v2520_v3 }
 0x581   : > { %2242 = vmatmul.mubr.msk.f32.vlgmr.msra.gmra.mrb[2].mxu0 %vm730_vm3, %v727_v31  ;;  %2243 = vmatmul.mubr.msk.f32.vlgmr.msra.gmra.mrb[2].mxu1 %vm730_vm3, %v729_v34  ;;  %vm1009_vm3 = vcmask 392192  }
 0x582   : > { %v2802_v16 = vpop.permute.xlu1 %898 }
 0x583   : > { %2374 = vset.pattern.permute.xlu1 %v2497_v4  ;;  %3874 = vst [vmem:[#allocation8_spill] sm:$0xff] %v2802_v16 }
 0x584   : > { %948 = vperm.xlu1 %2374, %v2586_v1  }
 0x586   : > { %v2806_v18 = vpop.permute.xlu1 %904 }
 0x588   : > { %2375 = vset.pattern.permute.xlu1 %v2498_v37 }
 0x589   : > { %971 = vperm.xlu1 %2375, %v2586_v1  }
 0x58d   : > { %2376 = vset.pattern.permute.xlu1 %v2499_v38 }
 0x58e   : > { %994 = vperm.xlu1 %2376, %v2586_v1  }
 0x592   : > { %2377 = vset.pattern.permute.xlu1 %v2500_v39 }
 0x593   : > { %1017 = vperm.xlu1 %2377, %v2586_v1  }
 0x597   : > { %2378 = vset.pattern.permute.xlu1 %v2501_v41 }
 0x598   : > { %1042 = vperm.xlu1 %2378, %v2586_v1  }
 0x59c   : > { %2380 = vset.pattern.permute.xlu1 %v2502_v42 }
 0x59d   : > { %1073 = vperm.xlu1 %2380, %v2586_v1  }
 0x5a1   : > { %2381 = vset.pattern.permute.xlu1 %v2503_v43 }
 0x5a2   : > { %1097 = vperm.xlu1 %2381, %v2586_v1  }
 0x5a6   : > { %2382 = vset.pattern.permute.xlu1 %v2504_v44  ;;  %v2521_v44 = vmov 97  }
 0x5a7   : > { %1121 = vperm.xlu1 %2382, %v2586_v1  }
 0x5ab   : > { %2383 = vset.pattern.permute.xlu1 %v2505_v47 }
 0x5ac   : > { %1145 = vperm.xlu1 %2383, %v2586_v1  }
 0x5b0   : > { %2384 = vset.pattern.permute.xlu1 %v2506_v51 }
 0x5b1   : > { %1169 = vperm.xlu1 %2384, %v2586_v1  }
 0x5b5   : > { %2386 = vrot.lane.b32.xlu1 %v2385_v53, %s2507_s6  ;;  %v2528_v53 = vmov 115  }
 0x5b6   : > { %2390 = vset.pattern.permute.xlu1 %v2508_v54  ;;  %v2529_v54 = vmov 81  }
 0x5b9   : > { %1222 = vperm.xlu1 %2390, %v2586_v1  }
 0x5bd   : > { %2392 = vset.pattern.permute.xlu1 %v2509_v56 }
 0x5be   : > { %1253 = vperm.xlu1 %2392, %v2586_v1  }
 0x5c2   : > { %2393 = vset.pattern.permute.xlu1 %v2510_v57  ;;  %v2530_v57 = vmov 116  }
 0x5c3   : > { %1277 = vperm.xlu1 %2393, %v2586_v1  }
 0x5c7   : > { %2394 = vset.pattern.permute.xlu1 %v2511_v58  ;;  %v2531_v58 = vmov 125  }
 0x5c8   : > { %1301 = vperm.xlu1 %2394, %v2586_v1  }
 0x5cc   : > { %2395 = vset.pattern.permute.xlu1 %v2512_v59  ;;  %v2532_v59 = vmov 104  }
 0x5cd   : > { %1325 = vperm.xlu1 %2395, %v2586_v1  }
 0x5d1   : > { %2396 = vset.pattern.permute.xlu1 %v2513_v61 }
 0x5d2   : > { %1349 = vperm.xlu1 %2396, %v2586_v1  }
 0x5d6   : > { %2398 = vrot.lane.b32.xlu1 %v2397_v62, %s2481_s25  ;;  %v2533_v62 = vmov 122  }
 0x5d7   : > { %2402 = vset.pattern.permute.xlu1 %v2514_v63  ;;  %v250_v63 = vadd.s32 2, %v2620_v32 }
 0x5d9   : > { %vm254_vm9 = vcmp.lt.s32.totalorder %v250_v63, 16 }
 0x5da   : > { %1401 = vperm.xlu1 %2402, %v2586_v1  }
 0x5de   : > { %2404 = vset.pattern.permute.xlu1 %v2515_v5  ;;  %v251_v5 = vadd.s32 2, %v2622_v33 }
 0x5df   : > { %1432 = vperm.xlu1 %2404, %v2586_v1  }
 0x5e0   : > { %vm255_vm10 = vcmp.lt.s32.totalorder %v251_v5, 16 }
 0x5e3   : > { %2405 = vset.pattern.permute.xlu1 %v2516_v52 }
 0x5e4   : > { %1456 = vperm.xlu1 %2405, %v2586_v1  }
 0x5e8   : > { %2407 = vset.pattern.permute.xlu1 %v2517_v10  ;;  %v2534_v10 = vmov 117  }
 0x5e9   : > { %1599 = vperm.xlu1 %2407, %v2586_v1  }
 0x5ed   : > { %2408 = vset.pattern.permute.xlu1 %v2518_v11 }
 0x5ee   : > { %1753 = vperm.xlu1 %2408, %v2586_v1  }
 0x5f2   : > { %2410 = vset.pattern.permute.xlu1 %v2519_v12  ;;  %v2536_v12 = vmov 111  }
 0x654   : > { %v801_v6 = vpop.f32.mrb[2].mxu0  ;;  %v2782_v7 = vpop.f32.mrb[2].mxu1 }
 0x655   : > { %3872 = vst [vmem:[#allocation6_spill] sm:$0xff] %v2782_v7  ;;  %v2785_v26 = vadd.f32 %v801_v6, %v2744_v20  ;;  %v803_v29 = vpop.f32.mrb[3].mxu0  ;;  %v2787_v8 = vpop.f32.mrb[3].mxu1  ;;  %v2232_v6 = vsel %vm254_vm9, 1.0, %v3841_v0  ;;  %vm1902_vm9 = vcmask 39936  }
 0x656   : > { %3873 = vst [vmem:[#allocation7_spill] sm:$0xff] %v2787_v8  ;;  %v2790_v28 = vadd.f32 %v803_v29, %v2744_v20  ;;  %v2810_v20 = vpop.permute.xlu1 %926  ;;  %v2233_v29 = vsel %vm255_vm10, 1.0, %v3841_v0  ;;  %vm1198_vm10 = vcmask 7168  }
 0x658   : > { %v812_v9 = vadd.f32 %v2790_v28, %v2785_v26 }
 0x65a   : > { %813 = vadd.xlane.f32.xlu0 %v812_v9  ;;  %v2813_v48 = vpop.permute.xlu1 %948  ;;  %v2435_v9 = vpack.i.bf16 %v2233_v29, %v2232_v6 }
 0x65e   : > { %v2815_v34 = vpop.permute.xlu1 %971 }
 0x662   : > { %v2818_v37 = vpop.permute.xlu1 %994 }
 0x666   : > { %v2823_v42 = vpop.permute.xlu1 %1017 }
 0x66a   : > { %v2826_v43 = vpop.permute.xlu1 %1042 }
 0x66b   : > { %3875 = vst [vmem:[#allocation9_spill] sm:$0xff] %v2826_v43 }
 0x66e   : > { %v2831_v60 = vpop.permute.xlu1 %1073 }
 0x670   : > { %1480 = vperm.xlu0 %2412, %v2586_v1  }
 0x672   : > { %v2836_v47 = vpop.permute.xlu1 %1097 }
 0x674   : > { %2415 = vset.pattern.permute.xlu0 %v2521_v44 }
 0x675   : > { %1958 = vperm.xlu0 %2415, %v2586_v1  }
 0x676   : > { %v2840_v51 = vpop.permute.xlu1 %1121 }
 0x67a   : > { %v2844_v56 = vpop.permute.xlu1 %1145 }
 0x67e   : > { %v2847_v61 = vpop.permute.xlu1 %1169 }
 0x682   : > { %v2853_v52 = vpop.permute.xlu1 %2386 }
 0x683   : > { %3876 = vst [vmem:[#allocation10_spill] sm:$0xff] %v2853_v52 }
 0x686   : > { %v2857_v11 = vpop.permute.xlu1 %1222 }
 0x687   : > { %3877 = vst [vmem:[#allocation11_spill] sm:$0xff] %v2857_v11 }
 0x6e7   : > { %v814_v21 = vpop.xlane.xlu0 %813 }
 0x6e8   : > { %v815_v22 = vmul.f32 0.00390625, %v814_v21  ;;  %v2861_v21 = vpop.permute.xlu1 %1253 }
 0x6ea   : > { %v816_v24 = vmul.f32 %v815_v22, %v2586_v1  ;;  %v2537_v22 = vmov 118  }
 0x6ec   : > { %v818_v25 = vsel %vm817_vm5, %v816_v24, 0.0  ;;  %v2864_v24 = vpop.permute.xlu1 %1277 }
 0x6ed   : > { %v819_v55 = vrot.slane %v818_v25, 4 }
 0x6ef   : > { %v820_v30 = vadd.f32 %v819_v55, %v818_v25  ;;  %v2538_v55 = vmov 82  }
 0x6f0   : > { %v2867_v25 = vpop.permute.xlu1 %1301 }
 0x6f1   : > { %v821_v31 = vrot.slane %v820_v30, 2 }
 0x6f3   : > { %v822_v35 = vadd.f32 %v821_v31, %v820_v30  ;;  %v2455_v30 = vld [vmem:[%s3838_s1] sm:$0xff] }
 0x6f4   : > { %v2872_v31 = vpop.permute.xlu1 %1325 }
 0x6f5   : > { %v823_v36 = vrot.slane %v822_v35, 1 }
 0x6f7   : > { %v824_v4 = vadd.f32 %v823_v36, %v822_v35  ;;  %v2539_v35 = vmov 83  }
 0x6f8   : > { %v2874_v36 = vpop.permute.xlu1 %1349 }
 0x6f9   : > { %v829_v38 = vadd.f32 %v2749_v27, %v824_v4  ;;  %v2523_v27 = vmov 110  }
 0x6fa   : > { %2418 = vset.pattern.permute.xlu0 %v2523_v27 }
 0x6fb   : > { %v830_v39 = vmax.f32 %v829_v38, 0.0  ;;  %1825 = vperm.xlu0 %2418, %v2586_v1  }
 0x6fc   : > { %v2876_v3 = vpop.permute.xlu1 %2398 }
 0x6fd   : > { %v834_v41 = vrot.slane %v830_v39, %v696_v2  ;;  %v2524_v2 = vmov 109   ;;  %3878 = vst [vmem:[#allocation12_spill] sm:$0xff] %v2876_v3 }
 0x6ff   : > { %836 = vrot.lane.b32.xlu1 %v834_v41, %s2485_s29  ;;  %2421 = vset.pattern.permute.xlu0 %v2525_v46 }
 0x700   : > { %1695 = vperm.xlu0 %2421, %v2586_v1   ;;  %v2878_v4 = vpop.permute.xlu1 %1401 }
 0x703   : > { %1777 = vperm.xlu1 %2410, %v2586_v1  }
 0x704   : > { %2424 = vset.pattern.permute.xlu0 %v2527_v50 }
 0x705   : > { %1873 = vperm.xlu0 %2424, %v2586_v1  }
 0x707   : > { %2411 = vset.pattern.permute.xlu1 %v2522_v45 }
 0x708   : > { %1934 = vperm.xlu1 %2411, %v2586_v1  }
 0x709   : > { %2427 = vset.pattern.permute.xlu0 %v2529_v54 }
 0x70a   : > { %1568 = vperm.xlu0 %2427, %v2586_v1  }
 0x70c   : > { %2413 = vset.pattern.permute.xlu1 %v2524_v2 }
 0x70d   : > { %1647 = vperm.xlu1 %2413, %v2586_v1  }
 0x70e   : > { %2445 = vset.pattern.permute.xlu0 %v2531_v58 }
 0x70f   : > { %2436 = vrot.lane.b32.xlu0 %v2435_v9, %s2535_s7 }
 0x711   : > { %2414 = vset.pattern.permute.xlu1 %v2526_v49 }
 0x712   : > { %1801 = vperm.xlu1 %2414, %v2586_v1  }
 0x716   : > { %2416 = vset.pattern.permute.xlu1 %v2528_v53 }
 0x717   : > { %1504 = vperm.xlu1 %2416, %v2586_v1  }
 0x71b   : > { %2417 = vset.pattern.permute.xlu1 %v2530_v57 }
 0x71c   : > { %1671 = vperm.xlu1 %2417, %v2586_v1  }
 0x720   : > { %2419 = vset.pattern.permute.xlu1 %v2532_v59 }
 0x721   : > { %1982 = vperm.xlu1 %2419, %v2586_v1  }
 0x725   : > { %2420 = vset.pattern.permute.xlu1 %v2533_v62 }
 0x726   : > { %1528 = vperm.xlu1 %2420, %v2586_v1  }
 0x72a   : > { %2422 = vset.pattern.permute.xlu1 %v2534_v10  ;;  %v2918_v10 = vpop.permute.xlu0 %1480 }
 0x72b   : > { %1849 = vperm.xlu1 %2422, %v2586_v1  }
 0x72f   : > { %2423 = vset.pattern.permute.xlu1 %v2536_v12  ;;  %v2920_v12 = vpop.permute.xlu0 %1958 }
 0x730   : > { %2006 = vperm.xlu1 %2423, %v2586_v1  }
 0x734   : > { %2425 = vset.pattern.permute.xlu1 %v2537_v22 }
 0x735   : > { %2030 = vperm.xlu1 %2425, %v2586_v1  }
 0x739   : > { %2426 = vset.pattern.permute.xlu1 %v2531_v58 }
 0x73a   : > { %2054 = vperm.xlu1 %2426, %v2586_v1   ;;  %v2880_v1 = vpop.permute.xlu1 %1432 }
 0x73e   : > { %2428 = vset.pattern.permute.xlu1 %v2538_v55  ;;  %v2882_v38 = vpop.permute.xlu1 %1456 }
 0x73f   : > { %1746 = vperm.xlu1 %2428, %v2455_v30  }
 0x742   : > { %v2884_v39 = vpop.permute.xlu1 %1599 }
 0x743   : > { %2429 = vset.pattern.permute.xlu1 %v2539_v35 }
 0x744   : > { %1927 = vperm.xlu1 %2429, %v2455_v30  }
 0x746   : > { %v2886_v41 = vpop.permute.xlu1 %1753 }
 0x771   : > { %v837_v44 = vpop.permute.xlu1 %836 }
 0x772   : > { %v839_v45 = vmul.f32 %v2455_v30, %v837_v44 }
 0x774   : > { %841 = vrot.lane.b32.xlu1 %v839_v45, %s2540_s10 }
 0x778   : > { %2431 = vrot.lane.b32.xlu1 %v2631_v40, %s2541_s11 }
 0x77a   : > { %v2922_v22 = vpop.permute.xlu0 %1825 }
 0x77f   : > { %v2924_v55 = vpop.permute.xlu0 %1695 }
 0x782   : > { %v2888_v27 = vpop.permute.xlu1 %1777 }
 0x784   : > { %v2926_v30 = vpop.permute.xlu0 %1873 }
 0x785   : > { %3883 = vst [vmem:[#allocation17_spill] sm:$0xff] %v2926_v30 }
 0x787   : > { %v2890_v2 = vpop.permute.xlu1 %1934 }
 0x789   : > { %v2928_v35 = vpop.permute.xlu0 %1568 }
 0x78a   : > { %3884 = vst [vmem:[#allocation18_spill] sm:$0xff] %v2928_v35 }
 0x78c   : > { %v2892_v46 = vpop.permute.xlu1 %1647 }
 0x78d   : > { %v2930_v44 = vpop.permute.xlu0 %2436 }
 0x78e   : > { %3885 = vst [vmem:[#allocation19_spill] sm:$0xff] %v2930_v44 }
 0x791   : > { %v2894_v49 = vpop.permute.xlu1 %1801 }
 0x796   : > { %v2896_v50 = vpop.permute.xlu1 %1504 }
 0x79b   : > { %v2898_v53 = vpop.permute.xlu1 %1671 }
 0x7a0   : > { %v2900_v54 = vpop.permute.xlu1 %1982 }
 0x7a5   : > { %v2902_v57 = vpop.permute.xlu1 %1528 }
 0x7aa   : > { %v2904_v58 = vpop.permute.xlu1 %1849 }
 0x7af   : > { %v2906_v59 = vpop.permute.xlu1 %2006 }
 0x7b4   : > { %v2908_v62 = vpop.permute.xlu1 %2030 }
 0x7b5   : > { %3879 = vst [vmem:[#allocation13_spill] sm:$0xff] %v2908_v62 }
 0x7b9   : > { %v2910_v63 = vpop.permute.xlu1 %2054 }
 0x7ba   : > { %3880 = vst [vmem:[#allocation14_spill] sm:$0xff] %v2910_v63 }
 0x7be   : > { %v2912_v5 = vpop.permute.xlu1 %1746 }
 0x7bf   : > { %3881 = vst [vmem:[#allocation15_spill] sm:$0xff] %v2912_v5 }
 0x7c3   : > { %v2914_v6 = vpop.permute.xlu1 %1927 }
 0x7c4   : > { %3882 = vst [vmem:[#allocation16_spill] sm:$0xff] %v2914_v6 }
 0x7e6   : > { %v842_v29 = vpop.permute.xlu1 %841 }
 0x7e7   : > { %v844_v9 = vsel %vm372_vm2, %v842_v29, 0.0  ;;  %vm881_vm2 = vcmask 1040384  }
 0x7e8   : > { %845 = vadd.xlane.f32.xlu0 %v844_v9 }
 0x875   : > { %v846_v45 = vpop.xlane.xlu0 %845 }
 0x876   : > { %v847_v29 = vadd.f32 3.0, %v846_v45 }
 0x878   : > { %v848_v9 = vmul.f32 0.001, %v847_v29 }
 0x87a   : > { %v849_v0 = vmax.f32 %v848_v9, %v847_v29 }
 0x87c   : > { %v850_v8 = vmin.f32 %v849_v0, 6.0 }
 0x87e   : > { %v851_v40 = vmul.f32 0.16666667, %v850_v8 }
 0x880   : > { %v2933_v7 = vmul.f32 %v851_v40, %v2785_v26  ;;  %v2936_v23 = vmul.f32 %v851_v40, %v2790_v28 }
 0x882   : > { %3886 = vst [vmem:[#allocation20_spill] sm:$0xff] %v2933_v7  ;;  %3887 = vst [vmem:[#allocation21_spill] sm:$0xff] %v2936_v23  ;;  %v860_v16 = vrot.slane %v2936_v23, 4  ;;  %v854_v3 = vrot.slane %v2933_v7, 4 }
 0x884   : > { %v861_v52 = vmax.f32 %v2936_v23, %v860_v16  ;;  %v873_v44 = vadd.f32 %v860_v16, %v2936_v23  ;;  %v855_v45 = vmax.f32 %v2933_v7, %v854_v3  ;;  %v867_v29 = vadd.f32 %v854_v3, %v2933_v7 }
 0x886   : > { %v862_v0 = vrot.slane %v861_v52, 2  ;;  %v874_v8 = vrot.slane %v873_v44, 2  ;;  %v856_v9 = vrot.slane %v855_v45, 2  ;;  %v868_v26 = vrot.slane %v867_v29, 2 }
 0x888   : > { %v863_v43 = vmax.f32 %v861_v52, %v862_v0  ;;  %v875_v6 = vadd.f32 %v874_v8, %v873_v44  ;;  %v857_v28 = vmax.f32 %v855_v45, %v856_v9  ;;  %v869_v40 = vadd.f32 %v868_v26, %v867_v29  ;;  %v2944_v52 = vpop.permute.xlu1 %2431 }
 0x88a   : > { %v864_v5 = vrot.slane %v863_v43, 1  ;;  %v876_v33 = vrot.slane %v875_v6, 1  ;;  %v858_v32 = vrot.slane %v857_v28, 1  ;;  %v870_v35 = vrot.slane %v869_v40, 1 }
 0x88c   : > { %v877_v63 = vadd.f32 %v876_v33, %v875_v6  ;;  %v871_v11 = vadd.f32 %v870_v35, %v869_v40  ;;  %v865_v16 = vmax.f32 %v863_v43, %v864_v5  ;;  %v859_v62 = vmax.f32 %v857_v28, %v858_v32 }
 0x88e   : > { %v880_v23 = vmul.f32 0.125, %v877_v63  ;;  %v879_v30 = vmul.f32 0.125, %v871_v11 }
 0x890   : > { %v883_v3 = vsel %vm881_vm2, %v865_v16, %v880_v23  ;;  %v882_v7 = vsel %vm881_vm2, %v859_v62, %v879_v30  ;;  %vm1738_vm2 = vcmask 1014784  }
 0x891   : > { %888 = vrot.lane.b32.xlu0 %v883_v3, %s2542_s12  ;;  %886 = vrot.lane.b32.xlu1 %v882_v7, %s2542_s12 }
 0x903   : > { %v887_v44 = vpop.permute.xlu1 %886  ;;  %v889_v29 = vpop.permute.xlu0 %888 }
 0x904   : > { %v2946_v45 = vsel %vm890_vm13, 0.0, %v887_v44  ;;  %v2950_v6 = vsel %vm890_vm13, %v887_v44, %v889_v29  ;;  %v2955_v23 = vsel %vm890_vm13, %v889_v29, 0.0  ;;  %vm2100_vm13 = vcmask 998400  }
 0x905   : > { %v907_v33 = vmul.f32 %v2806_v18, %v2946_v45  ;;  %v908_v32 = vmul.f32 %v2806_v18, %v2950_v6  ;;  %v909_v7 = vmul.f32 %v2806_v18, %v2955_v23  ;;  %v930_v43 = vmul.f32 %v2810_v20, %v2950_v6 }
 0x906   : > { %v952_v11 = vmul.f32 %v2813_v48, %v2950_v6  ;;  %v975_v62 = vmul.f32 %v2815_v34, %v2950_v6  ;;  %v929_v63 = vmul.f32 %v2810_v20, %v2946_v45  ;;  %v998_v18 = vmul.f32 %v2818_v37, %v2950_v6 }
 0x907   : > { %913 = vrot.lane.b32.xlu1 %v907_v33, %s2480_s24  ;;  %v931_v5 = vmul.f32 %v2810_v20, %v2955_v23  ;;  %v1021_v30 = vmul.f32 %v2823_v42, %v2950_v6  ;;  %v951_v35 = vmul.f32 %v2813_v48, %v2946_v45  ;;  %v1052_v0 = vmul.f32 %v2796_v13, %v2946_v45 }
 0x908   : > { %935 = vrot.lane.b32.xlu0 %v929_v63, %s2479_s23  ;;  %v953_v20 = vmul.f32 %v2813_v48, %v2955_v23  ;;  %v1053_v8 = vmul.f32 %v2796_v13, %v2950_v6  ;;  %v974_v9 = vmul.f32 %v2815_v34, %v2946_v45  ;;  %v1077_v26 = vmul.f32 %v2831_v60, %v2950_v6 }
 0x909   : > { %v976_v48 = vmul.f32 %v2815_v34, %v2955_v23  ;;  %v1101_v28 = vmul.f32 %v2836_v47, %v2950_v6  ;;  %v997_v40 = vmul.f32 %v2818_v37, %v2946_v45  ;;  %v1125_v16 = vmul.f32 %v2840_v51, %v2950_v6 }
 0x90a   : > { %v999_v34 = vmul.f32 %v2818_v37, %v2955_v23  ;;  %v1149_v3 = vmul.f32 %v2844_v56, %v2950_v6  ;;  %v1020_v44 = vmul.f32 %v2823_v42, %v2946_v45  ;;  %v1173_v29 = vmul.f32 %v2847_v61, %v2950_v6 }
 0x90b   : > { %915 = vrot.lane.b32.xlu1 %v908_v32, %s2480_s24  ;;  %v1022_v37 = vmul.f32 %v2823_v42, %v2955_v23  ;;  %v1232_v33 = vmul.f32 %v2798_v14, %v2946_v45  ;;  %v1054_v32 = vmul.f32 %v2796_v13, %v2955_v23  ;;  %v1076_v42 = vmul.f32 %v2831_v60, %v2946_v45 }
 0x90c   : > { %939 = vrot.lane.b32.xlu0 %v931_v5, %s2479_s23  ;;  %v1078_v13 = vmul.f32 %v2831_v60, %v2955_v23  ;;  %v1102_v63 = vmul.f32 %v2836_v47, %v2955_v23  ;;  %v1305_v60 = vmul.f32 %v2867_v25, %v2950_v6  ;;  %v1329_v5 = vmul.f32 %v2872_v31, %v2950_v6 }
 0x90f   : > { %917 = vrot.lane.b32.xlu1 %v909_v7, %s2480_s24  ;;  %v1233_v7 = vmul.f32 %v2798_v14, %v2950_v6 }
 0x910   : > { %957 = vrot.lane.b32.xlu0 %v951_v35, %s2543_s13  ;;  %v1148_v35 = vmul.f32 %v2844_v56, %v2946_v45 }
 0x913   : > { %937 = vrot.lane.b32.xlu1 %v930_v43, %s2479_s23  ;;  %v1257_v43 = vmul.f32 %v2861_v21, %v2950_v6 }
 0x914   : > { %961 = vrot.lane.b32.xlu0 %v953_v20, %s2543_s13  ;;  %v1412_v20 = vmul.f32 %v2800_v15, %v2950_v6 }
 0x917   : > { %959 = vrot.lane.b32.xlu1 %v952_v11, %s2543_s13  ;;  %v1281_v11 = vmul.f32 %v2864_v24, %v2950_v6 }
 0x918   : > { %980 = vrot.lane.b32.xlu0 %v974_v9, %s2544_s2  ;;  %v1436_v9 = vmul.f32 %v2880_v1, %v2950_v6 }
 0x91b   : > { %982 = vrot.lane.b32.xlu1 %v975_v62, %s2544_s2  ;;  %v1100_v62 = vmul.f32 %v2836_v47, %v2946_v45  ;;  %v1126_v47 = vmul.f32 %v2840_v51, %v2955_v23 }
 0x91c   : > { %984 = vrot.lane.b32.xlu0 %v976_v48, %s2544_s2  ;;  %v1234_v48 = vmul.f32 %v2798_v14, %v2955_v23  ;;  %v1258_v14 = vmul.f32 %v2861_v21, %v2955_v23 }
 0x91f   : > { %1005 = vrot.lane.b32.xlu1 %v998_v18, %s2545_s16  ;;  %v1124_v18 = vmul.f32 %v2840_v51, %v2946_v45  ;;  %v1150_v51 = vmul.f32 %v2844_v56, %v2955_v23  ;;  %v1174_v56 = vmul.f32 %v2847_v61, %v2955_v23 }
 0x920   : > { %1003 = vrot.lane.b32.xlu0 %v997_v40, %s2545_s16  ;;  %v1256_v40 = vmul.f32 %v2861_v21, %v2946_v45  ;;  %v1282_v21 = vmul.f32 %v2864_v24, %v2955_v23 }
 0x923   : > { %1028 = vrot.lane.b32.xlu1 %v1021_v30, %s2546_s17  ;;  %v1353_v30 = vmul.f32 %v2874_v36, %v2950_v6 }
 0x924   : > { %1007 = vrot.lane.b32.xlu0 %v999_v34, %s2545_s16  ;;  %v1280_v34 = vmul.f32 %v2864_v24, %v2946_v45  ;;  %v1306_v24 = vmul.f32 %v2867_v25, %v2955_v23 }
 0x927   : > { %1058 = vrot.lane.b32.xlu1 %v1052_v0, %s2480_s24  ;;  %v1411_v0 = vmul.f32 %v2800_v15, %v2946_v45 }
 0x928   : > { %1026 = vrot.lane.b32.xlu0 %v1020_v44, %s2546_s17 }
 0x92b   : > { %1060 = vrot.lane.b32.xlu1 %v1053_v8, %s2480_s24  ;;  %v1172_v8 = vmul.f32 %v2847_v61, %v2946_v45  ;;  %v1604_v61 = vmul.f32 %v2884_v39, %v2955_v23 }
 0x92c   : > { %1030 = vrot.lane.b32.xlu0 %v1022_v37, %s2546_s17 }
 0x92f   : > { %1084 = vrot.lane.b32.xlu1 %v1077_v26, %s2479_s23  ;;  %v1579_v26 = vmul.f32 %v2804_v17, %v2950_v6 }
 0x930   : > { %1062 = vrot.lane.b32.xlu0 %v1054_v32, %s2480_s24  ;;  %v1627_v32 = vmul.f32 %v2808_v19, %v2950_v6 }
 0x933   : > { %1108 = vrot.lane.b32.xlu1 %v1101_v28, %s2543_s13  ;;  %v1602_v28 = vmul.f32 %v2884_v39, %v2946_v45 }
 0x934   : > { %1082 = vrot.lane.b32.xlu0 %v1076_v42, %s2479_s23  ;;  %v1780_v42 = vmul.f32 %v2888_v27, %v2946_v45 }
 0x937   : > { %1132 = vrot.lane.b32.xlu1 %v1125_v16, %s2544_s2  ;;  %v1757_v16 = vmul.f32 %v2886_v41, %v2950_v6 }
 0x938   : > { %1086 = vrot.lane.b32.xlu0 %v1078_v13, %s2479_s23  ;;  %v1782_v13 = vmul.f32 %v2888_v27, %v2955_v23 }
 0x93b   : > { %1156 = vrot.lane.b32.xlu1 %v1149_v3, %s2545_s16  ;;  %v1459_v3 = vmul.f32 %v2882_v38, %v2946_v45 }
 0x93c   : > { %1106 = vrot.lane.b32.xlu0 %v1100_v62, %s2543_s13 }
 0x93f   : > { %1180 = vrot.lane.b32.xlu1 %v1173_v29, %s2546_s17  ;;  %v1461_v29 = vmul.f32 %v2882_v38, %v2955_v23 }
 0x940   : > { %1110 = vrot.lane.b32.xlu0 %v1102_v63, %s2543_s13  ;;  %v1938_v63 = vmul.f32 %v2890_v2, %v2950_v6 }
 0x943   : > { %1238 = vrot.lane.b32.xlu1 %v1232_v33, %s2480_s24  ;;  %v1304_v33 = vmul.f32 %v2867_v25, %v2946_v45  ;;  %v1330_v25 = vmul.f32 %v2872_v31, %v2955_v23 }
 0x944   : > { %1130 = vrot.lane.b32.xlu0 %v1124_v18, %s2544_s2 }
 0x947   : > { %1240 = vrot.lane.b32.xlu1 %v1233_v7, %s2480_s24 }
 0x948   : > { %1134 = vrot.lane.b32.xlu0 %v1126_v47, %s2544_s2  ;;  %v1483_v47 = vmul.f32 %v2918_v10, %v2946_v45 }
 0x94b   : > { %1264 = vrot.lane.b32.xlu1 %v1257_v43, %s2479_s23 }
 0x94c   : > { %1154 = vrot.lane.b32.xlu0 %v1148_v35, %s2545_s16  ;;  %v1354_v35 = vmul.f32 %v2874_v36, %v2955_v23 }
 0x94f   : > { %1288 = vrot.lane.b32.xlu1 %v1281_v11, %s2543_s13  ;;  %v1328_v11 = vmul.f32 %v2872_v31, %v2946_v45 }
 0x950   : > { %1158 = vrot.lane.b32.xlu0 %v1150_v51, %s2545_s16 }
 0x953   : > { %1312 = vrot.lane.b32.xlu1 %v1305_v60, %s2544_s2 }
 0x954   : > { %1178 = vrot.lane.b32.xlu0 %v1172_v8, %s2546_s17  ;;  %v1413_v8 = vmul.f32 %v2800_v15, %v2955_v23 }
 0x957   : > { %1336 = vrot.lane.b32.xlu1 %v1329_v5, %s2545_s16  ;;  %v1352_v5 = vmul.f32 %v2874_v36, %v2946_v45 }
 0x958   : > { %1182 = vrot.lane.b32.xlu0 %v1174_v56, %s2546_s17 }
 0x95b   : > { %1360 = vrot.lane.b32.xlu1 %v1353_v30, %s2546_s17 }
 0x95c   : > { %1242 = vrot.lane.b32.xlu0 %v1234_v48, %s2480_s24  ;;  %v1804_v48 = vmul.f32 %v2894_v49, %v2946_v45 }
 0x95f   : > { %1417 = vrot.lane.b32.xlu1 %v1411_v0, %s2480_s24  ;;  %v1485_v0 = vmul.f32 %v2918_v10, %v2955_v23 }
 0x960   : > { %1262 = vrot.lane.b32.xlu0 %v1256_v40, %s2479_s23  ;;  %v1806_v40 = vmul.f32 %v2894_v49, %v2955_v23 }
 0x963   : > { %1419 = vrot.lane.b32.xlu1 %v1412_v20, %s2480_s24 }
 0x964   : > { %1266 = vrot.lane.b32.xlu0 %v1258_v14, %s2479_s23 }
 0x967   : > { %1443 = vrot.lane.b32.xlu1 %v1436_v9, %s2479_s23  ;;  %v1651_v9 = vmul.f32 %v2892_v46, %v2950_v6 }
 0x968   : > { %1286 = vrot.lane.b32.xlu0 %v1280_v34, %s2543_s13  ;;  %v1578_v34 = vmul.f32 %v2804_v17, %v2946_v45 }
 0x96b   : > { %1586 = vrot.lane.b32.xlu1 %v1579_v26, %s2480_s24  ;;  %v1435_v26 = vmul.f32 %v2880_v1, %v2946_v45 }
 0x96c   : > { %1290 = vrot.lane.b32.xlu0 %v1282_v21, %s2543_s13 }
 0x96f   : > { %1608 = vrot.lane.b32.xlu1 %v1602_v28, %s2479_s23 }
 0x970   : > { %1310 = vrot.lane.b32.xlu0 %v1304_v33, %s2544_s2  ;;  %v1507_v33 = vmul.f32 %v2896_v50, %v2946_v45 }
 0x973   : > { %1612 = vrot.lane.b32.xlu1 %v1604_v61, %s2479_s23  ;;  %v1437_v61 = vmul.f32 %v2880_v1, %v2955_v23 }
 0x974   : > { %1314 = vrot.lane.b32.xlu0 %v1306_v24, %s2544_s2 }
 0x977   : > { %1764 = vrot.lane.b32.xlu1 %v1757_v16, %s2480_s24 }
 0x978   : > { %1334 = vrot.lane.b32.xlu0 %v1328_v11, %s2545_s16 }
 0x979   : > { %v3115_v44 = vpop.permute.xlu1 %913 }
 0x97a   : > { %3888 = vst [vmem:[#allocation22_spill] sm:$0xff] %v3115_v44  ;;  %v3155_v60 = vpop.permute.xlu0 %935 }
 0x97b   : > { %1465 = vrot.lane.b32.xlu1 %v1459_v3, %s2543_s13  ;;  %3893 = vst [vmem:[#allocation27_spill] sm:$0xff] %v3155_v60  ;;  %v1962_v3 = vmul.f32 %v2920_v12, %v2950_v6 }
 0x97c   : > { %1338 = vrot.lane.b32.xlu0 %v1330_v25, %s2545_s16  ;;  %v1675_v25 = vmul.f32 %v2898_v53, %v2950_v6 }
 0x97d   : > { %v3123_v37 = vpop.permute.xlu1 %915 }
 0x97e   : > { %3889 = vst [vmem:[#allocation23_spill] sm:$0xff] %v3123_v37  ;;  %v3165_v30 = vpop.permute.xlu0 %939 }
 0x97f   : > { %1469 = vrot.lane.b32.xlu1 %v1461_v29, %s2543_s13  ;;  %3895 = vst [vmem:[#allocation29_spill] sm:$0xff] %v3165_v30  ;;  %v1580_v29 = vmul.f32 %v2804_v17, %v2955_v23 }
 0x980   : > { %1358 = vrot.lane.b32.xlu0 %v1352_v5, %s2546_s17 }
 0x981   : > { %v3131_v7 = vpop.permute.xlu1 %917 }
 0x982   : > { %3890 = vst [vmem:[#allocation24_spill] sm:$0xff] %v3131_v7  ;;  %v3175_v51 = vpop.permute.xlu0 %957 }
 0x983   : > { %1634 = vrot.lane.b32.xlu1 %v1627_v32, %s2543_s13  ;;  %3897 = vst [vmem:[#allocation31_spill] sm:$0xff] %v3175_v51 }
 0x984   : > { %1362 = vrot.lane.b32.xlu0 %v1354_v35, %s2546_s17  ;;  %v1828_v35 = vmul.f32 %v2922_v22, %v2946_v45 }
 0x985   : > { %v3139_v43 = vpop.permute.xlu1 %937 }
 0x986   : > { %3891 = vst [vmem:[#allocation25_spill] sm:$0xff] %v3139_v43  ;;  %v3185_v56 = vpop.permute.xlu0 %961 }
 0x987   : > { %1786 = vrot.lane.b32.xlu1 %v1780_v42, %s2479_s23  ;;  %3899 = vst [vmem:[#allocation33_spill] sm:$0xff] %v3185_v56  ;;  %v1509_v42 = vmul.f32 %v2896_v50, %v2955_v23 }
 0x988   : > { %1421 = vrot.lane.b32.xlu0 %v1413_v8, %s2480_s24 }
 0x989   : > { %v3147_v62 = vpop.permute.xlu1 %959 }
 0x98a   : > { %3892 = vst [vmem:[#allocation26_spill] sm:$0xff] %v3147_v62  ;;  %v3195_v28 = vpop.permute.xlu0 %980 }
 0x98b   : > { %1790 = vrot.lane.b32.xlu1 %v1782_v13, %s2479_s23  ;;  %3900 = vst [vmem:[#allocation34_spill] sm:$0xff] %v3195_v28  ;;  %v1603_v13 = vmul.f32 %v2884_v39, %v2950_v6  ;;  %v1758_v39 = vmul.f32 %v2886_v41, %v2955_v23 }
 0x98c   : > { %1441 = vrot.lane.b32.xlu0 %v1435_v26, %s2479_s23  ;;  %v1460_v26 = vmul.f32 %v2882_v38, %v2950_v6  ;;  %v1628_v38 = vmul.f32 %v2808_v19, %v2955_v23 }
 0x98d   : > { %v3157_v18 = vpop.permute.xlu1 %982 }
 0x98e   : > { %3894 = vst [vmem:[#allocation28_spill] sm:$0xff] %v3157_v18  ;;  %v3205_v14 = vpop.permute.xlu0 %984 }
 0x98f   : > { %1945 = vrot.lane.b32.xlu1 %v1938_v63, %s2480_s24  ;;  %3901 = vst [vmem:[#allocation35_spill] sm:$0xff] %v3205_v14  ;;  %v1756_v63 = vmul.f32 %v2886_v41, %v2946_v45  ;;  %v3908_v14 = vld [vmem:[#allocation11_spill] sm:$0xff] }
 0x990   : > { %1445 = vrot.lane.b32.xlu0 %v1437_v61, %s2479_s23  ;;  %v1626_v61 = vmul.f32 %v2808_v19, %v2946_v45  ;;  %v1225_v28 = vmul.f32 %v3908_v14, %v2946_v45 }
 0x991   : > { %v3167_v31 = vpop.permute.xlu1 %1005 }
 0x992   : > { %3896 = vst [vmem:[#allocation30_spill] sm:$0xff] %v3167_v31  ;;  %v3215_v21 = vpop.permute.xlu0 %1003 }
 0x993   : > { %1489 = vrot.lane.b32.xlu1 %v1483_v47, %s2544_s2  ;;  %3902 = vst [vmem:[#allocation36_spill] sm:$0xff] %v3215_v21 }
 0x994   : > { %1584 = vrot.lane.b32.xlu0 %v1578_v34, %s2480_s24 }
 0x995   : > { %v3177_v20 = vpop.permute.xlu1 %1028 }
 0x996   : > { %3898 = vst [vmem:[#allocation32_spill] sm:$0xff] %v3177_v20  ;;  %v3225_v32 = vpop.permute.xlu0 %1007 }
 0x997   : > { %1493 = vrot.lane.b32.xlu1 %v1485_v0, %s2544_s2  ;;  %3903 = vst [vmem:[#allocation37_spill] sm:$0xff] %v3225_v32 }
 0x998   : > { %1588 = vrot.lane.b32.xlu0 %v1580_v29, %s2480_s24  ;;  %v1531_v29 = vmul.f32 %v2902_v57, %v2946_v45 }
 0x999   : > { %v3187_v36 = vpop.permute.xlu1 %1058 }
 0x99a   : > { %v3235_v11 = vpop.permute.xlu0 %1026 }
 0x99b   : > { %1658 = vrot.lane.b32.xlu1 %v1651_v9, %s2544_s2  ;;  %3904 = vst [vmem:[#allocation38_spill] sm:$0xff] %v3235_v11  ;;  %v1830_v9 = vmul.f32 %v2922_v22, %v2955_v23  ;;  %v3906_v11 = vld [vmem:[#allocation17_spill] sm:$0xff] }
 0x99c   : > { %1610 = vrot.lane.b32.xlu0 %v1603_v13, %s2479_s23  ;;  %v1533_v13 = vmul.f32 %v2902_v57, %v2955_v23  ;;  %v1877_v20 = vmul.f32 %v3906_v11, %v2950_v6 }
 0x99d   : > { %v3197_v15 = vpop.permute.xlu1 %1060 }
 0x99e   : > { %v3245_v5 = vpop.permute.xlu0 %1030 }
 0x99f   : > { %1810 = vrot.lane.b32.xlu1 %v1804_v48, %s2543_s13  ;;  %3905 = vst [vmem:[#allocation39_spill] sm:$0xff] %v3245_v5 }
 0x9a0   : > { %1762 = vrot.lane.b32.xlu0 %v1756_v63, %s2480_s24 }
 0x9a1   : > { %v3207_v16 = vpop.permute.xlu1 %1084 }
 0x9a2   : > { %v3255_v0 = vpop.permute.xlu0 %1062 }
 0x9a3   : > { %1814 = vrot.lane.b32.xlu1 %v1806_v40, %s2543_s13  ;;  %v1986_v40 = vmul.f32 %v2900_v54, %v2950_v6 }
 0x9a4   : > { %1766 = vrot.lane.b32.xlu0 %v1758_v39, %s2480_s24  ;;  %v1699_v39 = vmul.f32 %v2924_v55, %v2950_v6 }
 0x9a5   : > { %v3217_v1 = vpop.permute.xlu1 %1108 }
 0x9a6   : > { %v3265_v48 = vpop.permute.xlu0 %1082 }
 0x9a7   : > { %1969 = vrot.lane.b32.xlu1 %v1962_v3, %s2479_s23 }
 0x9a8   : > { %1467 = vrot.lane.b32.xlu0 %v1460_v26, %s2543_s13 }
 0x9a9   : > { %v3227_v24 = vpop.permute.xlu1 %1132 }
 0x9aa   : > { %v3275_v34 = vpop.permute.xlu0 %1086 }
 0x9ab   : > { %1513 = vrot.lane.b32.xlu1 %v1507_v33, %s2545_s16 }
 0x9ac   : > { %1632 = vrot.lane.b32.xlu0 %v1626_v61, %s2543_s13  ;;  %v1852_v61 = vmul.f32 %v2904_v58, %v2946_v45 }
 0x9ad   : > { %v3237_v17 = vpop.permute.xlu1 %1156 }
 0x9ae   : > { %v3285_v33 = vpop.permute.xlu0 %1106 }
 0x9af   : > { %1517 = vrot.lane.b32.xlu1 %v1509_v42, %s2545_s16 }
 0x9b0   : > { %1636 = vrot.lane.b32.xlu0 %v1628_v38, %s2543_s13 }
 0x9b1   : > { %v3247_v47 = vpop.permute.xlu1 %1180 }
 0x9b2   : > { %v3295_v63 = vpop.permute.xlu0 %1110 }
 0x9b3   : > { %1682 = vrot.lane.b32.xlu1 %v1675_v25, %s2545_s16  ;;  %v1781_v25 = vmul.f32 %v2888_v27, %v2950_v6  ;;  %v1939_v27 = vmul.f32 %v2890_v2, %v2955_v23 }
 0x9b5   : > { %v3257_v8 = vpop.permute.xlu1 %1238  ;;  %1788 = vrot.lane.b32.xlu0 %v1781_v25, %s2479_s23 }
 0x9b7   : > { %1834 = vrot.lane.b32.xlu1 %v1828_v35, %s2544_s2  ;;  %v1937_v35 = vmul.f32 %v2890_v2, %v2946_v45 }
 0x9b9   : > { %v3267_v41 = vpop.permute.xlu1 %1240  ;;  %1943 = vrot.lane.b32.xlu0 %v1937_v35, %s2480_s24  ;;  %v2010_v35 = vmul.f32 %v2906_v59, %v2950_v6 }
 0x9bb   : > { %1838 = vrot.lane.b32.xlu1 %v1830_v9, %s2544_s2  ;;  %v3305_v9 = vpop.permute.xlu0 %1130 }
 0x9bd   : > { %v3277_v3 = vpop.permute.xlu1 %1264  ;;  %1947 = vrot.lane.b32.xlu0 %v1939_v27, %s2480_s24 }
 0x9bf   : > { %1993 = vrot.lane.b32.xlu1 %v1986_v40, %s2543_s13  ;;  %v3315_v40 = vpop.permute.xlu0 %1134 }
 0x9c1   : > { %v3287_v42 = vpop.permute.xlu1 %1288 }
 0x9c3   : > { %1537 = vrot.lane.b32.xlu1 %v1531_v29, %s2546_s17  ;;  %v1854_v29 = vmul.f32 %v2904_v58, %v2955_v23  ;;  %v3325_v25 = vpop.permute.xlu0 %1154 }
 0x9c5   : > { %v3297_v19 = vpop.permute.xlu1 %1312 }
 0x9c7   : > { %1541 = vrot.lane.b32.xlu1 %v1533_v13, %s2546_s17  ;;  %v1484_v13 = vmul.f32 %v2918_v10, %v2950_v6  ;;  %v3333_v27 = vpop.permute.xlu0 %1158 }
 0x9c9   : > { %v3307_v26 = vpop.permute.xlu1 %1336  ;;  %1491 = vrot.lane.b32.xlu0 %v1484_v13, %s2544_s2 }
 0x9cb   : > { %1706 = vrot.lane.b32.xlu1 %v1699_v39, %s2546_s17  ;;  %v1650_v39 = vmul.f32 %v2892_v46, %v2946_v45  ;;  %v3349_v32 = vpop.permute.xlu0 %1178 }
 0x9cd   : > { %v3317_v38 = vpop.permute.xlu1 %1360  ;;  %1656 = vrot.lane.b32.xlu0 %v1650_v39, %s2544_s2  ;;  %v3907_v39 = vld [vmem:[#allocation13_spill] sm:$0xff] }
 0x9cf   : > { %1858 = vrot.lane.b32.xlu1 %v1852_v61, %s2545_s16  ;;  %v1404_v61 = vmul.f32 %v2878_v4, %v2946_v45 }
 0x9d1   : > { %v1418_v2 = vpop.permute.xlu1 %1417 }
 0x9d3   : > { %1862 = vrot.lane.b32.xlu1 %v1854_v29, %s2545_s16  ;;  %v1652_v29 = vmul.f32 %v2892_v46, %v2955_v23 }
 0x9d5   : > { %v3337_v5 = vpop.permute.xlu1 %1419  ;;  %1660 = vrot.lane.b32.xlu0 %v1652_v29, %s2544_s2 }
 0x9d6   : > { %v1423_v10 = vsel %vm481_vm6, %v1418_v2, %v3337_v5  ;;  %v1805_v2 = vmul.f32 %v2894_v49, %v2950_v6  ;;  %v1244_v49 = vsel %vm481_vm6, %v3257_v8, %v3267_v41 }
 0x9d7   : > { %v3342_v13 = vadd.f32 %v1423_v10, %v1404_v61  ;;  %2017 = vrot.lane.b32.xlu1 %v2010_v35, %s2544_s2  ;;  %v2033_v35 = vmul.f32 %v3907_v39, %v2946_v45  ;;  %v3359_v61 = vpop.permute.xlu0 %1182  ;;  %v2035_v10 = vmul.f32 %v3907_v39, %v2955_v23  ;;  %v1249_v56 = vadd.f32 %v1244_v49, %v1225_v28 }
 0x9d8   : > { %v1508_v28 = vmul.f32 %v2896_v50, %v2950_v6 }
 0x9d9   : > { %v3351_v21 = vpop.permute.xlu1 %1443  ;;  %1812 = vrot.lane.b32.xlu0 %v1805_v2, %s2543_s13  ;;  %v1963_v2 = vmul.f32 %v2920_v12, %v2955_v23 }
 0x9db   : > { %1884 = vrot.lane.b32.xlu1 %v1877_v20, %s2546_s17  ;;  %v1961_v20 = vmul.f32 %v2920_v12, %v2946_v45  ;;  %v1243_v29 = vpop.permute.xlu0 %1242 }
 0x9dc   : > { %v1245_v8 = vsel %vm481_vm6, %v3267_v41, %v1243_v29 }
 0x9dd   : > { %v3361_v46 = vpop.permute.xlu1 %1586  ;;  %1967 = vrot.lane.b32.xlu0 %v1961_v20, %s2479_s23  ;;  %v1226_v20 = vmul.f32 %v3908_v14, %v2950_v6 }
 0x9df   : > { %2039 = vrot.lane.b32.xlu1 %v2033_v35, %s2545_s16  ;;  %v3909_v35 = vld [vmem:[#allocation14_spill] sm:$0xff]  ;;  %v1263_v51 = vpop.permute.xlu0 %1262  ;;  %v1250_v49 = vadd.f32 %v1245_v8, %v1226_v20 }
 0x9e0   : > { %v2057_v18 = vmul.f32 %v3909_v35, %v2946_v45  ;;  %v1268_v30 = vsel %vm504_vm7, %v1263_v51, %v3277_v3  ;;  %v2059_v12 = vmul.f32 %v3909_v35, %v2955_v23 }
 0x9e1   : > { %v3369_v31 = vpop.permute.xlu1 %1608  ;;  %1971 = vrot.lane.b32.xlu0 %v1963_v2, %s2479_s23  ;;  %s2249_s23 = sshll.u32 %s3948_s15, 4 }
 0x9e3   : > { %2043 = vrot.lane.b32.xlu1 %v2035_v10, %s2545_s16  ;;  %v1273_v10 = vadd.f32 %v1268_v30, %v1249_v56  ;;  %v1267_v60 = vpop.permute.xlu0 %1266 }
 0x9e4   : > { %v1269_v51 = vsel %vm504_vm7, %v3277_v3, %v1267_v60  ;;  %v1676_v3 = vmul.f32 %v2898_v53, %v2955_v23 }
 0x9e5   : > { %v3382_v62 = vpop.permute.xlu1 %1612  ;;  %v1274_v43 = vadd.f32 %v1269_v51, %v1250_v49  ;;  %1515 = vrot.lane.b32.xlu0 %v1508_v28, %s2545_s16  ;;  %v1829_v49 = vmul.f32 %v2922_v22, %v2950_v6 }
 0x9e7   : > { %2063 = vrot.lane.b32.xlu1 %v2057_v18, %s2546_s17  ;;  %v1674_v18 = vmul.f32 %v2898_v53, %v2946_v45  ;;  %v1287_v30 = vpop.permute.xlu0 %1286 }
 0x9e8   : > { %v1292_v50 = vsel %vm963_vm14, %v1287_v30, %v3287_v42  ;;  %v1985_v30 = vmul.f32 %v2900_v54, %v2946_v45 }
 0x9e9   : > { %v3396_v41 = vpop.permute.xlu1 %1764  ;;  %v1297_v2 = vadd.f32 %v1292_v50, %v1273_v10  ;;  %1680 = vrot.lane.b32.xlu0 %v1674_v18, %s2545_s16 }
 0x9eb   : > { %2067 = vrot.lane.b32.xlu1 %v2059_v12, %s2546_s17  ;;  %v1291_v8 = vpop.permute.xlu0 %1290 }
 0x9ec   : > { %v1293_v12 = vsel %vm963_vm14, %v3287_v42, %v1291_v8 }
 0x9ed   : > { %v3404_v56 = vpop.permute.xlu1 %1465  ;;  %v1298_v28 = vadd.f32 %v1293_v12, %v1274_v43  ;;  %1684 = vrot.lane.b32.xlu0 %v1676_v3, %s2545_s16  ;;  %v1987_v3 = vmul.f32 %v2900_v54, %v2955_v23 }
 0x9ef   : > { %v1311_v51 = vpop.permute.xlu0 %1310 }
 0x9f0   : > { %v1316_v18 = vsel %vm986_vm15, %v1311_v51, %v3297_v19 }
 0x9f1   : > { %v3411_v20 = vpop.permute.xlu1 %1469  ;;  %v1321_v53 = vadd.f32 %v1316_v18, %v1297_v2  ;;  %1836 = vrot.lane.b32.xlu0 %v1829_v49, %s2544_s2  ;;  %v1227_v49 = vmul.f32 %v3908_v14, %v2955_v23 }
 0x9f3   : > { %v1315_v42 = vpop.permute.xlu0 %1314 }
 0x9f4   : > { %v1317_v50 = vsel %vm986_vm15, %v3297_v19, %v1315_v42  ;;  %v1251_v19 = vadd.f32 %v1243_v29, %v1227_v49 }
 0x9f5   : > { %v3418_v10 = vpop.permute.xlu1 %1634  ;;  %v1322_v22 = vadd.f32 %v1317_v50, %v1298_v28  ;;  %1991 = vrot.lane.b32.xlu0 %v1985_v30, %s2543_s13  ;;  %v1532_v28 = vmul.f32 %v2902_v57, %v2950_v6 }
 0x9f6   : > { %v1275_v54 = vadd.f32 %v1267_v60, %v1251_v19 }
 0x9f7   : > { %v1335_v12 = vpop.permute.xlu0 %1334 }
 0x9f8   : > { %v1340_v51 = vsel %vm1009_vm3, %v1335_v12, %v3307_v26  ;;  %v1299_v14 = vadd.f32 %v1291_v8, %v1275_v54 }
 0x9f9   : > { %v3425_v43 = vpop.permute.xlu1 %1786  ;;  %v1345_v18 = vadd.f32 %v1340_v51, %v1321_v53  ;;  %1995 = vrot.lane.b32.xlu0 %v1987_v3, %s2543_s13  ;;  %v1698_v53 = vmul.f32 %v2924_v55, %v2946_v45 }
 0x9fa   : > { %v1323_v12 = vadd.f32 %v1315_v42, %v1299_v14 }
 0x9fb   : > { %v1339_v30 = vpop.permute.xlu0 %1338 }
 0x9fc   : > { %v1341_v7 = vsel %vm1009_vm3, %v3307_v26, %v1339_v30  ;;  %v1347_v60 = vadd.f32 %v1339_v30, %v1323_v12  ;;  %v2011_v12 = vmul.f32 %v2906_v59, %v2955_v23 }
 0x9fd   : > { %v3432_v2 = vpop.permute.xlu1 %1790  ;;  %v1346_v44 = vadd.f32 %v1341_v7, %v1322_v22  ;;  %1539 = vrot.lane.b32.xlu0 %v1532_v28, %s2546_s17  ;;  %v1700_v7 = vmul.f32 %v2924_v55, %v2955_v23  ;;  %v1405_v28 = vmul.f32 %v2878_v4, %v2950_v6 }
 0x9ff   : > { %v1359_v3 = vpop.permute.xlu0 %1358 }
 0xa00   : > { %v1364_v57 = vsel %vm1032_vm0, %v1359_v3, %v3317_v38 }
 0xa01   : > { %v3441_v50 = vpop.permute.xlu1 %1945  ;;  %v3452_v49 = vadd.f32 %v1364_v57, %v1345_v18  ;;  %1704 = vrot.lane.b32.xlu0 %v1698_v53, %s2546_s17  ;;  %v1853_v18 = vmul.f32 %v2904_v58, %v2950_v6  ;;  %v1406_v58 = vmul.f32 %v2878_v4, %v2955_v23 }
 0xa03   : > { %v1363_v26 = vpop.permute.xlu0 %1362 }
 0xa04   : > { %v1365_v22 = vsel %vm1032_vm0, %v3317_v38, %v1363_v26  ;;  %v3461_v51 = vadd.f32 %v1363_v26, %v1347_v60 }
 0xa05   : > { %v3448_v29 = vpop.permute.xlu1 %1489  ;;  %v3463_v42 = vadd.f32 %v1365_v22, %v1346_v44  ;;  %1708 = vrot.lane.b32.xlu0 %v1700_v7, %s2546_s17  ;;  %v2009_v44 = vmul.f32 %v2906_v59, %v2946_v45 }
 0xa07   : > { %v1422_v19 = vpop.permute.xlu0 %1421 }
 0xa08   : > { %v1424_v30 = vsel %vm481_vm6, %v3337_v5, %v1422_v19  ;;  %v1430_v5 = vadd.f32 %v1422_v19, %v1406_v58 }
 0xa09   : > { %v3457_v8 = vpop.permute.xlu1 %1493  ;;  %v1429_v54 = vadd.f32 %v1424_v30, %v1405_v28  ;;  %1860 = vrot.lane.b32.xlu0 %v1853_v18, %s2545_s16  ;;  %v3910_v18 = vld [vmem:[#allocation18_spill] sm:$0xff] }
 0xa0a   : > { %v1571_v19 = vmul.f32 %v3910_v18, %v2946_v45  ;;  %v1572_v58 = vmul.f32 %v3910_v18, %v2950_v6 }
 0xa0b   : > { %v1442_v38 = vpop.permute.xlu0 %1441 }
 0xa0c   : > { %v1447_v53 = vsel %vm504_vm7, %v1442_v38, %v3351_v21 }
 0xa0d   : > { %v3470_v55 = vpop.permute.xlu1 %1658  ;;  %v3484_v3 = vadd.f32 %v1447_v53, %v3342_v13  ;;  %2015 = vrot.lane.b32.xlu0 %v2009_v44, %s2544_s2  ;;  %v1876_v13 = vmul.f32 %v3906_v11, %v2946_v45  ;;  %v1878_v44 = vmul.f32 %v3906_v11, %v2955_v23  ;;  %v3911_v53 = vld [vmem:[#allocation3_spill] sm:$0xff]  ;;  %v2034_v11 = vmul.f32 %v3907_v39, %v2950_v6 }
 0xa0e   : > { %v2058_v39 = vmul.f32 %v3909_v35, %v2950_v6 }
 0xa0f   : > { %v1446_v57 = vpop.permute.xlu0 %1445 }
 0xa10   : > { %v1448_v7 = vsel %vm504_vm7, %v3351_v21, %v1446_v57  ;;  %v1454_v26 = vadd.f32 %v1446_v57, %v1430_v5  ;;  %v262_v5 = vadd.s32 3, %v3911_v53 }
 0xa11   : > { %v3477_v14 = vpop.permute.xlu1 %1810  ;;  %v1453_v4 = vadd.f32 %v1448_v7, %v1429_v54  ;;  %2019 = vrot.lane.b32.xlu0 %v2011_v12, %s2544_s2  ;;  %v1573_v54 = vmul.f32 %v3910_v18, %v2955_v23  ;;  %v3912_v12 = vld [vmem:[#allocation4_spill] sm:$0xff] }
 0xa12   : > { %v3495_v22 = vadd.f32 %v3411_v20, %v1454_v26  ;;  %v263_v57 = vadd.s32 3, %v3912_v12  ;;  %vm266_vm4 = vcmp.lt.s32.totalorder %v262_v5, 16  ;;  %v3914_v5 = vld [vmem:[#allocation15_spill] sm:$0xff] }
 0xa13   : > { %v1585_v59 = vpop.permute.xlu0 %1584 }
 0xa14   : > { %v1590_v30 = vsel %vm481_vm6, %v1585_v59, %v3361_v46  ;;  %vm267_vm5 = vcmp.lt.s32.totalorder %v263_v57, 16  ;;  %v1749_v57 = vmul.f32 %v3914_v5, %v2946_v45 }
 0xa15   : > { %v3489_v60 = vpop.permute.xlu1 %1814  ;;  %v1595_v21 = vadd.f32 %v1590_v30, %v1571_v19  ;;  %1882 = vrot.lane.b32.xlu0 %v1876_v13, %s2546_s17 }
 0xa17   : > { %v1589_v38 = vpop.permute.xlu0 %1588 }
 0xa18   : > { %v1591_v26 = vsel %vm481_vm6, %v3361_v46, %v1589_v38  ;;  %v1597_v13 = vadd.f32 %v1589_v38, %v1573_v54 }
 0xa19   : > { %v3501_v28 = vpop.permute.xlu1 %1969  ;;  %v1596_v19 = vadd.f32 %v1591_v26, %v1572_v58  ;;  %1886 = vrot.lane.b32.xlu0 %v1878_v44, %s2546_s17  ;;  %v3913_v44 = vmov 0.0  }
 0xa1a   : > { %v1621_v59 = vadd.f32 %v3382_v62, %v1597_v13  ;;  %v2234_v58 = vsel %vm266_vm4, 1.0, %v3913_v44  ;;  %v2235_v26 = vsel %vm267_vm5, 1.0, %v3913_v44 }
 0xa1b   : > { %v1611_v30 = vpop.permute.xlu0 %1610 }
 0xa1c   : > { %v1614_v12 = vsel %vm504_vm7, %v3369_v31, %v1611_v30  ;;  %v1615_v46 = vsel %vm504_vm7, %v1611_v30, %v3382_v62 }
 0xa1d   : > { %v3514_v7 = vpop.permute.xlu1 %1513  ;;  %v1619_v54 = vadd.f32 %v1614_v12, %v1595_v21  ;;  %v1620_v38 = vadd.f32 %v1615_v46, %v1596_v19  ;;  %2041 = vrot.lane.b32.xlu0 %v2034_v11, %s2545_s16  ;;  %v2440_v21 = vpack.i.bf16 %v2235_v26, %v2234_v58  ;;  %v1751_v12 = vmul.f32 %v3914_v5, %v2955_v23 }
 0xa1e   : > { %v1750_v19 = vmul.f32 %v3914_v5, %v2950_v6 }
 0xa1f   : > { %v1763_v13 = vpop.permute.xlu0 %1762 }
 0xa20   : > { %v1768_v62 = vsel %vm481_vm6, %v1763_v13, %v3396_v41 }
 0xa21   : > { %v3522_v18 = vpop.permute.xlu1 %1517  ;;  %v1773_v31 = vadd.f32 %v1768_v62, %v1749_v57  ;;  %2065 = vrot.lane.b32.xlu0 %v2058_v39, %s2546_s17 }
 0xa23   : > { %v1767_v35 = vpop.permute.xlu0 %1766 }
 0xa24   : > { %v1769_v30 = vsel %vm481_vm6, %v3396_v41, %v1767_v35  ;;  %v1775_v46 = vadd.f32 %v1767_v35, %v1751_v12 }
 0xa25   : > { %v3535_v53 = vpop.permute.xlu1 %1682  ;;  %v1774_v44 = vadd.f32 %v1769_v30, %v1750_v19  ;;  %2441 = vrot.lane.b32.xlu0 %v2440_v21, %s2547_s18 }
 0xa26   : > { %v1799_v57 = vadd.f32 %v3432_v2, %v1775_v46 }
 0xa27   : > { %v1468_v39 = vpop.permute.xlu0 %1467 }
 0xa28   : > { %v1823_v26 = vadd.f32 %v3489_v60, %v1799_v57  ;;  %v1471_v5 = vsel %vm963_vm14, %v3404_v56, %v1468_v39  ;;  %v1472_v13 = vsel %vm963_vm14, %v1468_v39, %v3411_v20  ;;  %v1502_v56 = vadd.f32 %v3457_v8, %v3495_v22 }
 0xa29   : > { %v3544_v11 = vpop.permute.xlu1 %1834  ;;  %v1476_v62 = vadd.f32 %v1471_v5, %v3484_v3  ;;  %v1477_v41 = vadd.f32 %v1472_v13, %v1453_v4 }
 0xa2a   : > { %v1526_v39 = vadd.f32 %v3522_v18, %v1502_v56 }
 0xa2b   : > { %v1633_v21 = vpop.permute.xlu0 %1632 }
 0xa2c   : > { %v1638_v35 = vsel %vm963_vm14, %v1633_v21, %v3418_v10 }
 0xa2d   : > { %v3549_v58 = vpop.permute.xlu1 %1838  ;;  %v1643_v30 = vadd.f32 %v1638_v35, %v1619_v54 }
 0xa2e   : > { %v3558_v12 = vadd.f32 %v3549_v58, %v1823_v26 }
 0xa2f   : > { %v1637_v46 = vpop.permute.xlu0 %1636 }
 0xa30   : > { %v1639_v20 = vsel %vm963_vm14, %v3418_v10, %v1637_v46  ;;  %v3570_v3 = vadd.f32 %v1637_v46, %v1621_v59  ;;  %v3915_v10 = vld [vmem:[#allocation16_spill] sm:$0xff] }
 0xa31   : > { %v3560_v19 = vpop.permute.xlu1 %1993  ;;  %v1644_v4 = vadd.f32 %v1639_v20, %v1620_v38  ;;  %v1930_v59 = vmul.f32 %v3915_v10, %v2946_v45 }
 0xa33   : > { %v1789_v26 = vpop.permute.xlu0 %1788 }
 0xa34   : > { %v1792_v54 = vsel %vm504_vm7, %v3425_v43, %v1789_v26  ;;  %v1793_v13 = vsel %vm504_vm7, %v1789_v26, %v3432_v2  ;;  %v1932_v43 = vmul.f32 %v3915_v10, %v2955_v23  ;;  %v1931_v2 = vmul.f32 %v3915_v10, %v2950_v6 }
 0xa35   : > { %v3564_v57 = vpop.permute.xlu1 %1537  ;;  %v1797_v22 = vadd.f32 %v1792_v54, %v1773_v31  ;;  %v1798_v35 = vadd.f32 %v1793_v13, %v1774_v44 }
 0xa37   : > { %v1944_v38 = vpop.permute.xlu0 %1943 }
 0xa38   : > { %v1949_v46 = vsel %vm481_vm6, %v1944_v38, %v3441_v50 }
 0xa39   : > { %v3573_v5 = vpop.permute.xlu1 %1541  ;;  %v1954_v56 = vadd.f32 %v1949_v46, %v1930_v59 }
 0xa3a   : > { %v1550_v21 = vadd.f32 %v3573_v5, %v1526_v39 }
 0xa3b   : > { %v1948_v20 = vpop.permute.xlu0 %1947 }
 0xa3c   : > { %1558 = vrot.lane.b32.xlu1 %v1550_v21, %s2548_s19  ;;  %v1950_v44 = vsel %vm481_vm6, %v3441_v50, %v1948_v20  ;;  %v1956_v31 = vadd.f32 %v1948_v20, %v1932_v43 }
 0xa3d   : > { %v1955_v39 = vadd.f32 %v1950_v44, %v1931_v2 }
 0xa3f   : > { %v1492_v26 = vpop.permute.xlu0 %1491 }
 0xa40   : > { %v1495_v54 = vsel %vm986_vm15, %v3448_v29, %v1492_v26  ;;  %v1496_v13 = vsel %vm986_vm15, %v1492_v26, %v3457_v8 }
 0xa41   : > { %v1500_v21 = vadd.f32 %v1495_v54, %v1476_v62  ;;  %v1501_v59 = vadd.f32 %v1496_v13, %v1477_v41 }
 0xa43   : > { %v1657_v38 = vpop.permute.xlu0 %1656 }
 0xa44   : > { %v1662_v46 = vsel %vm986_vm15, %v1657_v38, %v3470_v55 }
 0xa45   : > { %v1667_v10 = vadd.f32 %v1662_v46, %v1643_v30 }
 0xa47   : > { %v1661_v37 = vpop.permute.xlu0 %1660 }
 0xa48   : > { %v1663_v50 = vsel %vm986_vm15, %v3470_v55, %v1661_v37 }
 0xa49   : > { %v1668_v43 = vadd.f32 %v1663_v50, %v1644_v4 }
 0xa4b   : > { %v1813_v2 = vpop.permute.xlu0 %1812 }
 0xa4c   : > { %v1816_v20 = vsel %vm963_vm14, %v3477_v14, %v1813_v2  ;;  %v1817_v29 = vsel %vm963_vm14, %v1813_v2, %v3489_v60 }
 0xa4d   : > { %v1821_v8 = vadd.f32 %v1816_v20, %v1797_v22  ;;  %v1822_v62 = vadd.f32 %v1817_v29, %v1798_v35 }
 0xa4f   : > { %v1968_v41 = vpop.permute.xlu0 %1967 }
 0xa50   : > { %v1973_v44 = vsel %vm504_vm7, %v1968_v41, %v3501_v28 }
 0xa51   : > { %v1978_v26 = vadd.f32 %v1973_v44, %v1954_v56 }
 0xa53   : > { %v1972_v30 = vpop.permute.xlu0 %1971 }
 0xa54   : > { %v1974_v54 = vsel %vm504_vm7, %v3501_v28, %v1972_v30  ;;  %v3607_v55 = vadd.f32 %v1972_v30, %v1956_v31 }
 0xa55   : > { %v1979_v4 = vadd.f32 %v1974_v54, %v1955_v39 }
 0xa57   : > { %v1516_v13 = vpop.permute.xlu0 %1515 }
 0xa58   : > { %v1519_v14 = vsel %vm1009_vm3, %v3514_v7, %v1516_v13  ;;  %v1520_v60 = vsel %vm1009_vm3, %v1516_v13, %v3522_v18 }
 0xa59   : > { %v1524_v22 = vadd.f32 %v1519_v14, %v1500_v21  ;;  %v1525_v35 = vadd.f32 %v1520_v60, %v1501_v59  ;;  %v3916_v21 = vld [vmem:[#allocation9_spill] sm:$0xff] }
 0xa5a   : > { %v1047_v59 = vmul.f32 %v3916_v21, %v2955_v23 }
 0xa5b   : > { %v1681_v38 = vpop.permute.xlu0 %1680 }
 0xa5c   : > { %v1686_v56 = vsel %vm1009_vm3, %v1681_v38, %v3535_v53  ;;  %v1071_v20 = vadd.f32 %v3255_v0, %v1047_v59 }
 0xa5d   : > { %v3615_v46 = vadd.f32 %v1686_v56, %v1667_v10 }
 0xa5f   : > { %v1685_v50 = vpop.permute.xlu0 %1684 }
 0xa60   : > { %v1687_v28 = vsel %vm1009_vm3, %v3535_v53, %v1685_v50 }
 0xa61   : > { %v3619_v31 = vadd.f32 %v1687_v28, %v1668_v43  ;;  %v1095_v43 = vadd.f32 %v3275_v34, %v1071_v20  ;;  %v1088_v28 = vsel %vm504_vm7, %v3265_v48, %v3207_v16  ;;  %v1136_v48 = vsel %vm986_vm15, %v3305_v9, %v3227_v24  ;;  %v3918_v20 = vld [vmem:[#allocation12_spill] sm:$0xff] }
 0xa63   : > { %v1837_v39 = vpop.permute.xlu0 %1836 }
 0xa64   : > { %v1840_v7 = vsel %vm986_vm15, %v3544_v11, %v1837_v39  ;;  %v1841_v18 = vsel %vm986_vm15, %v1837_v39, %v3549_v58  ;;  %v3637_v11 = vpop.permute.xlu1 %1706  ;;  %v1119_v58 = vadd.f32 %v3295_v63, %v1095_v43 }
 0xa65   : > { %v3627_v2 = vadd.f32 %v1840_v7, %v1821_v8  ;;  %v3629_v10 = vadd.f32 %v1841_v18, %v1822_v62 }
 0xa66   : > { %v1143_v8 = vadd.f32 %v3315_v40, %v1119_v58 }
 0xa67   : > { %v1992_v29 = vpop.permute.xlu0 %1991 }
 0xa68   : > { %v1997_v53 = vsel %vm963_vm14, %v1992_v29, %v3560_v19  ;;  %v1167_v30 = vadd.f32 %v3333_v27, %v1143_v8  ;;  %v3652_v13 = vpop.permute.xlu1 %1858  ;;  %v2401_v29 = vunpack.i.h.bf16 %v3918_v20 }
 0xa69   : > { %v3635_v41 = vadd.f32 %v1997_v53, %v1978_v26  ;;  %v1064_v26 = vsel %vm481_vm6, %v3187_v36, %v3197_v15  ;;  %v3917_v36 = vld [vmem:[#allocation10_spill] sm:$0xff] }
 0xa6a   : > { %v2389_v39 = vunpack.i.h.bf16 %v3917_v36 }
 0xa6b   : > { %v3640_v44 = vpop.permute.xlu0 %1995 }
 0xa6c   : > { %v1998_v23 = vsel %vm963_vm14, %v3560_v19, %v3640_v44  ;;  %v1045_v19 = vmul.f32 %v3916_v21, %v2946_v45  ;;  %v1863_v59 = vpop.permute.xlu1 %1862 }
 0xa6d   : > { %v3646_v62 = vadd.f32 %v1998_v23, %v1979_v4  ;;  %v1191_v4 = vadd.f32 %v3359_v61, %v1167_v30 }
 0xa6e   : > { %v1069_v7 = vadd.f32 %v1064_v26, %v1045_v19  ;;  %v1046_v19 = vmul.f32 %v3916_v21, %v2950_v6 }
 0xa6f   : > { %v1540_v54 = vpop.permute.xlu0 %1539 }
 0xa70   : > { %v1543_v14 = vsel %vm1032_vm0, %v3564_v57, %v1540_v54  ;;  %v1544_v60 = vsel %vm1032_vm0, %v1540_v54, %v3573_v5  ;;  %v1112_v57 = vsel %vm963_vm14, %v3285_v33, %v3217_v1  ;;  %v1093_v5 = vadd.f32 %v1088_v28, %v1069_v7  ;;  %v3694_v54 = vpop.permute.xlu1 %2017 }
 0xa71   : > { %v1548_v38 = vadd.f32 %v1543_v14, %v1524_v22  ;;  %v1549_v56 = vadd.f32 %v1544_v60, %v1525_v35  ;;  %v1205_v22 = vmul.f32 %v2389_v39, %v1191_v4  ;;  %v1669_v35 = vadd.f32 %v1661_v37, %v3570_v3 }
 0xa72   : > { %v1117_v53 = vadd.f32 %v1112_v57, %v1093_v5  ;;  %v1160_v33 = vsel %vm1009_vm3, %v3325_v25, %v3237_v17  ;;  %v1384_v37 = vmul.f32 %v2401_v29, %v3461_v51  ;;  %v1184_v3 = vsel %vm1032_vm0, %v3349_v32, %v3247_v47 }
 0xa73   : > { %v1705_v18 = vpop.permute.xlu0 %1704  ;;  %1554 = vrot.lane.b32.xlu1 %v1548_v38, %s2548_s19  ;;  %1556 = vrot.lane.b32.xlu0 %v1549_v56, %s2548_s19  ;;  %v1693_v43 = vadd.f32 %v1685_v50, %v1669_v35  ;;  %v2434_v50 = vunpack.i.h.bf16 %v2944_v52  ;;  %v2388_v51 = vunpack.i.l.bf16 %v3917_v36  ;;  %v1065_v32 = vsel %vm481_vm6, %v3197_v15, %v3255_v0 }
 0xa74   : > { %v1141_v23 = vadd.f32 %v1136_v48, %v1117_v53  ;;  %v1885_v4 = vpop.permute.xlu1 %1884  ;;  %v1710_v38 = vsel %vm1032_vm0, %v1705_v18, %v3637_v11  ;;  %v2400_v56 = vunpack.i.l.bf16 %v3918_v20  ;;  %v1089_v28 = vsel %vm504_vm7, %v3207_v16, %v3275_v34 }
 0xa75   : > { %v1070_v57 = vadd.f32 %v1065_v32, %v1046_v19  ;;  %v1113_v15 = vsel %vm963_vm14, %v3217_v1, %v3295_v63  ;;  %v1715_v21 = vadd.f32 %v1710_v38, %v3615_v46  ;;  %v2433_v5 = vunpack.i.l.bf16 %v2944_v52 }
 0xa76   : > { %v1165_v8 = vadd.f32 %v1160_v33, %v1141_v23  ;;  %v1382_v0 = vmul.f32 %v2400_v56, %v3452_v49  ;;  %v1137_v16 = vsel %vm986_vm15, %v3227_v24, %v3315_v40  ;;  %v1161_v1 = vsel %vm1009_vm3, %v3237_v17, %v3333_v27  ;;  %v3919_v49 = vld [vmem:[#allocation19_spill] sm:$0xff] }
 0xa77   : > { %v3677_v58 = vpop.permute.xlu0 %1708  ;;  %1213 = vrot.lane.b32.xlu0 %v1205_v22, %s2482_s26  ;;  %v1094_v18 = vadd.f32 %v1089_v28, %v1070_v57  ;;  %v1726_v63 = vmul.f32 %v2433_v5, %v1715_v21  ;;  %v2439_v46 = vunpack.i.h.bf16 %v3919_v49  ;;  %v2438_v53 = vunpack.i.l.bf16 %v3919_v49  ;;  %v3921_v49 = vld [vmem:[#allocation22_spill] sm:$0xff] }
 0xa78   : > { %v1717_v9 = vadd.f32 %v3677_v58, %v1693_v43  ;;  %v1189_v25 = vadd.f32 %v1184_v3, %v1165_v8  ;;  %v2040_v35 = vpop.permute.xlu1 %2039  ;;  %v1871_v24 = vadd.f32 %v1863_v59, %v3558_v12  ;;  %v1185_v40 = vsel %vm1032_vm0, %v3247_v47, %v3359_v61 }
 0xa79   : > { %v1118_v22 = vadd.f32 %v1113_v15, %v1094_v18  ;;  %v1199_v47 = vsel %vm1198_vm10, %v2388_v51, %v2389_v39  ;;  %v2004_v32 = vadd.f32 %v3640_v44, %v3607_v55 }
 0xa7a   : > { %v1728_v26 = vmul.f32 %v2434_v50, %v1717_v9  ;;  %v1203_v60 = vmul.f32 %v2388_v51, %v1189_v25  ;;  %v1903_v25 = vsel %vm1902_vm9, %v2438_v53, %v2439_v46  ;;  %v1378_v51 = vsel %vm645_vm8, %v2400_v56, %v2401_v29 }
 0xa7b   : > { %v3691_v30 = vpop.permute.xlu0 %1860  ;;  %1392 = vrot.lane.b32.xlu0 %v1384_v37, %s2483_s27  ;;  %v1142_v43 = vadd.f32 %v1137_v16, %v1118_v22  ;;  %v1383_v44 = vmul.f32 %v1378_v51, %v3463_v42  ;;  %vm2083_vm8 = vcmask 48128  }
 0xa7c   : > { %v1865_v48 = vsel %vm1009_vm3, %v3691_v30, %v1863_v59  ;;  %v2044_v8 = vpop.permute.xlu1 %2043  ;;  %v1864_v55 = vsel %vm1009_vm3, %v3652_v13, %v3691_v30  ;;  %v1722_v13 = vsel %vm281_vm1, %v2433_v5, %v2434_v50 }
 0xa7d   : > { %v1870_v33 = vadd.f32 %v1865_v48, %v3629_v10  ;;  %v1166_v37 = vadd.f32 %v1161_v1, %v1142_v43  ;;  %v1869_v15 = vadd.f32 %v1864_v55, %v3627_v2  ;;  %v3922_v43 = vld [vmem:[#allocation24_spill] sm:$0xff]  ;;  %v3933_v55 = vld [vmem:[#allocation3_spill] sm:$0xff] }
 0xa7f   : > { %v2016_v14 = vpop.permute.xlu0 %2015  ;;  %1736 = vrot.lane.b32.xlu0 %v1728_v26, %s2549_s20  ;;  %v1190_v3 = vadd.f32 %v1185_v40, %v1166_v37  ;;  %v3925_v37 = vld [vmem:[#allocation27_spill] sm:$0xff] }
 0xa80   : > { %v2021_v61 = vsel %vm986_vm15, %v2016_v14, %v3694_v54  ;;  %v2064_v28 = vpop.permute.xlu1 %2063 }
 0xa81   : > { %v1204_v10 = vmul.f32 %v1199_v47, %v1190_v3  ;;  %v2026_v36 = vadd.f32 %v2021_v61, %v3635_v41  ;;  %v3929_v47 = vld [vmem:[#allocation33_spill] sm:$0xff] }
 0xa83   : > { %v3711_v7 = vpop.permute.xlu0 %2019  ;;  %1209 = vrot.lane.b32.xlu0 %v1203_v60, %s2482_s26  ;;  %v1711_v60 = vsel %vm1032_vm0, %v3637_v11, %v3677_v58 }
 0xa84   : > { %v2028_v39 = vadd.f32 %v3711_v7, %v2004_v32  ;;  %v1716_v58 = vadd.f32 %v1711_v60, %v3619_v31  ;;  %v2022_v42 = vsel %vm986_vm15, %v3694_v54, %v3711_v7  ;;  %v2068_v56 = vpop.permute.xlu1 %2067  ;;  %v3930_v32 = vld [vmem:[#allocation28_spill] sm:$0xff]  ;;  %v3931_v60 = vld [vmem:[#allocation34_spill] sm:$0xff] }
 0xa85   : > { %v2027_v18 = vadd.f32 %v2022_v42, %v3646_v62  ;;  %v3939_v42 = vld [vmem:[#allocation38_spill] sm:$0xff] }
 0xa86   : > { %v1727_v31 = vmul.f32 %v1722_v13, %v1716_v58  ;;  %v3938_v13 = vld [vmem:[#allocation32_spill] sm:$0xff] }
 0xa87   : > { %v1883_v34 = vpop.permute.xlu0 %1882  ;;  %1388 = vrot.lane.b32.xlu0 %v1382_v0, %s2483_s27  ;;  %v2052_v0 = vadd.f32 %v2044_v8, %v2028_v39 }
 0xa88   : > { %v1888_v41 = vsel %vm1032_vm0, %v1883_v34, %v1885_v4 }
 0xa89   : > { %v1893_v29 = vadd.f32 %v1888_v41, %v1869_v15  ;;  %v2076_v16 = vadd.f32 %v2068_v56, %v2052_v0  ;;  %v3936_v41 = vld [vmem:[#allocation36_spill] sm:$0xff]  ;;  %v3937_v15 = vld [vmem:[#allocation37_spill] sm:$0xff] }
 0xa8b   : > { %v1887_v23 = vpop.permute.xlu0 %1886  ;;  %1732 = vrot.lane.b32.xlu0 %v1726_v63, %s2549_s20  ;;  %v1907_v50 = vmul.f32 %v2438_v53, %v1893_v29  ;;  %v3920_v63 = vld [vmem:[#allocation23_spill] sm:$0xff] }
 0xa8c   : > { %v1889_v17 = vsel %vm1032_vm0, %v1885_v4, %v1887_v23  ;;  %v1895_v27 = vadd.f32 %v1887_v23, %v1871_v24  ;;  %v920_v53 = vsel %vm481_vm6, %v3920_v63, %v3922_v43  ;;  %v3923_v24 = vld [vmem:[#allocation8_spill] sm:$0xff]  ;;  %v3924_v23 = vld [vmem:[#allocation25_spill] sm:$0xff]  ;;  %v3940_v29 = vld [vmem:[#allocation39_spill] sm:$0xff] }
 0xa8d   : > { %v1894_v9 = vadd.f32 %v1889_v17, %v1870_v33  ;;  %v901_v40 = vmul.f32 %v3923_v24, %v2946_v45  ;;  %v902_v33 = vmul.f32 %v3923_v24, %v2950_v6  ;;  %v941_v17 = vsel %vm504_vm7, %v3925_v37, %v3924_v23 }
 0xa8e   : > { %v1909_v12 = vmul.f32 %v2439_v46, %v1895_v27  ;;  %v919_v46 = vsel %vm481_vm6, %v3921_v49, %v3920_v63  ;;  %v3926_v27 = vld [vmem:[#allocation29_spill] sm:$0xff] }
 0xa8f   : > { %v1908_v59 = vmul.f32 %v1903_v25, %v1894_v9  ;;  %v2042_v26 = vpop.permute.xlu0 %2041  ;;  %v942_v9 = vsel %vm504_vm7, %v3924_v23, %v3926_v27  ;;  %v923_v3 = vadd.f32 %v919_v46, %v901_v40  ;;  %vm1560_vm7 = vcmask 1022976  }
 0xa90   : > { %1917 = vrot.lane.b32.xlu1 %v1909_v12, %s2466_s21  ;;  %v2045_v19 = vsel %vm1009_vm3, %v2040_v35, %v2042_v26  ;;  %v2046_v2 = vsel %vm1009_vm3, %v2042_v26, %v2044_v8  ;;  %v924_v8 = vadd.f32 %v920_v53, %v902_v33  ;;  %v3927_v12 = vld [vmem:[#allocation26_spill] sm:$0xff] }
 0xa91   : > { %1915 = vrot.lane.b32.xlu0 %v1908_v59, %s2466_s21  ;;  %v2050_v14 = vadd.f32 %v2045_v19, %v2026_v36  ;;  %v2051_v5 = vadd.f32 %v2046_v2, %v2027_v18  ;;  %v3928_v59 = vld [vmem:[#allocation31_spill] sm:$0xff]  ;;  %v965_v45 = vsel %vm963_vm14, %v3927_v12, %v3929_v47  ;;  %v945_v6 = vadd.f32 %v941_v17, %v923_v3 }
 0xa92   : > { %v964_v26 = vsel %vm963_vm14, %v3928_v59, %v3927_v12  ;;  %v946_v61 = vadd.f32 %v942_v9, %v924_v8  ;;  %v987_v19 = vsel %vm986_vm15, %v3931_v60, %v3930_v32 }
 0xa93   : > { %v2066_v38 = vpop.permute.xlu0 %2065  ;;  %v968_v36 = vadd.f32 %v964_v26, %v945_v6 }
 0xa94   : > { %1211 = vrot.lane.b32.xlu1 %v1204_v10, %s2482_s26  ;;  %v2069_v11 = vsel %vm1032_vm0, %v2064_v28, %v2066_v38  ;;  %v2070_v52 = vsel %vm1032_vm0, %v2066_v38, %v2068_v56  ;;  %v3932_v38 = vld [vmem:[#allocation35_spill] sm:$0xff]  ;;  %v969_v39 = vadd.f32 %v965_v45, %v946_v61  ;;  %s171_s26 = scalar_lea.vmem %s3840_s3, %s2249_s23 }
 0xa95   : > { %v2074_v20 = vadd.f32 %v2069_v11, %v2050_v14  ;;  %v2075_v34 = vadd.f32 %v2070_v52, %v2051_v5  ;;  %v988_v28 = vsel %vm986_vm15, %v3930_v32, %v3932_v38  ;;  %v202_v11 = vadd.s32 4294967293, %v3933_v55  ;;  %v3935_v14 = vld [vmem:[#allocation30_spill] sm:$0xff] }
 0xa96   : > { %v1011_v0 = vsel %vm1009_vm3, %v3935_v14, %v3937_v15 }
 0xa97   : > { %v2442_v57 = vpop.permute.xlu0 %2441  ;;  %vm204_vm1 = vcmp.ge.s32.totalorder %v202_v11, 0 }
 0xa98   : > { %v2443_v21 = vunpack.i.l.bf16 %v2442_v57  ;;  %1390 = vrot.lane.b32.xlu1 %v1383_v44, %s2483_s27  ;;  %v2444_v30 = vunpack.i.h.bf16 %v2442_v57  ;;  %v3934_v44 = vld [vmem:[#allocation4_spill] sm:$0xff]  ;;  %v1010_v57 = vsel %vm1009_vm3, %v3936_v41, %v3935_v14 }
 0xa99   : > { %v203_v58 = vadd.s32 4294967293, %v3934_v44 }
 0xa9a   : > { %v2088_v4 = vmul.f32 %v2443_v21, %v2074_v20  ;;  %v2090_v54 = vmul.f32 %v2444_v30, %v2076_v16  ;;  %v2084_v7 = vsel %vm2083_vm8, %v2443_v21, %v2444_v30  ;;  %v991_v20 = vadd.f32 %v987_v19, %v968_v36 }
 0xa9b   : > { %v2089_v22 = vmul.f32 %v2084_v7, %v2075_v34  ;;  %v992_v21 = vadd.f32 %v988_v28, %v969_v39  ;;  %v1034_v30 = vsel %vm1032_vm0, %v3938_v13, %v3940_v29  ;;  %vm205_vm6 = vcmp.ge.s32.totalorder %v203_v58, 0 }
 0xa9c   : > { %1734 = vrot.lane.b32.xlu1 %v1727_v31, %s2549_s20  ;;  %2094 = vrot.lane.b32.xlu0 %v2088_v4, %s2550_s22  ;;  %v1033_v31 = vsel %vm1032_vm0, %v3939_v42, %v3938_v13  ;;  %v1014_v4 = vadd.f32 %v1010_v57, %v991_v20 }
 0xa9d   : > { %v1015_v56 = vadd.f32 %v1011_v0, %v992_v21 }
 0xa9e   : > { %v1037_v16 = vadd.f32 %v1033_v31, %v1014_v4 }
 0xa9f   : > { %v1038_v52 = vadd.f32 %v1034_v30, %v1015_v56 }
 0xaa0   : > { %1913 = vrot.lane.b32.xlu1 %v1907_v50, %s2466_s21  ;;  %2098 = vrot.lane.b32.xlu0 %v2090_v54, %s2550_s22  ;;  %v3941_v50 = vmov 0.0   ;;  %s2122_s21 = sld [smem:[#allocation2]] }
 0xaa1   : > { %v2224_v5 = vsel %vm204_vm1, 1.0, %v3941_v50  ;;  %v2225_v54 = vsel %vm205_vm6, 1.0, %v3941_v50 }
 0xaa2   : > { %v1039_v49 = vmul.f32 %v2224_v5, %v1037_v16  ;;  %v1040_v46 = vmul.f32 %v2225_v54, %v1038_v52 }
 0xaa4   : > { %2096 = vrot.lane.b32.xlu1 %v2089_v22, %s2550_s22 }
 0xaa6   : > { %v2123_v0 = vstv %s2122_s21 }
 0xaae   : > { %v1559_v25 = vpop.permute.xlu1 %1558 }
 0xae5   : > { %v1557_v35 = vpop.permute.xlu0 %1556  ;;  %v1555_v51 = vpop.permute.xlu1 %1554 }
 0xae6   : > { %v1562_v27 = vsel %vm1560_vm7, %v1557_v35, %v1559_v25  ;;  %v1561_v8 = vsel %vm1560_vm7, %v1555_v51, %v1557_v35 }
 0xae9   : > { %v1214_v62 = vpop.permute.xlu0 %1213 }
 0xaed   : > { %v1393_v48 = vpop.permute.xlu0 %1392 }
 0xaf1   : > { %v1737_v1 = vpop.permute.xlu0 %1736 }
 0xaf5   : > { %v1210_v10 = vpop.permute.xlu0 %1209 }
 0xaf9   : > { %v1389_v2 = vpop.permute.xlu0 %1388 }
 0xafd   : > { %v1733_v63 = vpop.permute.xlu0 %1732 }
 0xb02   : > { %v1918_v18 = vpop.permute.xlu1 %1917 }
 0xb03   : > { %v1916_v23 = vpop.permute.xlu0 %1915 }
 0xb06   : > { %v1212_v7 = vpop.permute.xlu1 %1211 }
 0xb07   : > { %v1215_v34 = vsel %vm577_vm11, %v1210_v10, %v1212_v7  ;;  %v1216_v22 = vsel %vm577_vm11, %v1212_v7, %v1214_v62  ;;  %vm1919_vm11 = vcmask 1006592  }
 0xb08   : > { %v1219_v43 = vadd.f32 %v1215_v34, %v1039_v49  ;;  %v1220_v53 = vadd.f32 %v1216_v22, %v1040_v46  ;;  %v1921_v10 = vsel %vm1919_vm11, %v1916_v23, %v1918_v18 }
 0xb0a   : > { %v1391_v24 = vpop.permute.xlu1 %1390 }
 0xb0b   : > { %v1394_v40 = vsel %vm662_vm12, %v1389_v2, %v1391_v24  ;;  %v1395_v33 = vsel %vm662_vm12, %v1391_v24, %v1393_v48  ;;  %vm2107_vm12 = vcmask 1041408  }
 0xb0c   : > { %v1398_v37 = vadd.f32 %v1394_v40, %v1219_v43  ;;  %v1399_v17 = vadd.f32 %v1395_v33, %v1220_v53  ;;  %v3942_v43 = vld [vmem:[#allocation5_spill] sm:$0xff]  ;;  %v3943_v53 = vld [vmem:[#allocation6_spill] sm:$0xff]  ;;  %v3944_v40 = vld [vmem:[#allocation20_spill] sm:$0xff] }
 0xb0d   : > { %v808_v24 = vadd.f32 %v3943_v53, %v3942_v43 }
 0xb0e   : > { %v1566_v9 = vadd.f32 %v1562_v27, %v1399_v17  ;;  %v1735_v3 = vpop.permute.xlu1 %1734  ;;  %v1565_v12 = vadd.f32 %v1561_v8, %v1398_v37  ;;  %v2095_v59 = vpop.permute.xlu0 %2094  ;;  %v3946_v17 = vld [vmem:[#allocation21_spill] sm:$0xff] }
 0xb0f   : > { %v1740_v62 = vsel %vm1738_vm2, %v1735_v3, %v1737_v1  ;;  %v1739_v26 = vsel %vm1738_vm2, %v1733_v63, %v1735_v3 }
 0xb10   : > { %v1744_v47 = vadd.f32 %v1740_v62, %v1566_v9  ;;  %v1743_v61 = vadd.f32 %v1739_v26, %v1565_v12 }
 0xb12   : > { %v1914_v45 = vpop.permute.xlu1 %1913  ;;  %v2099_v32 = vpop.permute.xlu0 %2098  ;;  %v1925_v19 = vadd.f32 %v1921_v10, %v1744_v47 }
 0xb13   : > { %v1920_v6 = vsel %vm1919_vm11, %v1914_v45, %v1916_v23  ;;  %v3945_v23 = vld [vmem:[#allocation7_spill] sm:$0xff] }
 0xb14   : > { %v1924_v48 = vadd.f32 %v1920_v6, %v1743_v61  ;;  %v810_v37 = vadd.f32 %v3945_v23, %v3942_v43 }
 0xb16   : > { %v2097_v60 = vpop.permute.xlu1 %2096 }
 0xb17   : > { %v2101_v25 = vsel %vm2100_vm13, %v2095_v59, %v2097_v60  ;;  %v2102_v38 = vsel %vm2100_vm13, %v2097_v60, %v2099_v32 }
 0xb18   : > { %v2105_v28 = vadd.f32 %v2101_v25, %v1924_v48  ;;  %v2106_v35 = vadd.f32 %v2102_v38, %v1925_v19 }
 0xb1a   : > { %v2108_v1 = vsel %vm2107_vm12, %v2105_v28, 0.0  ;;  %v2115_v36 = vsel %vm2107_vm12, %v2106_v35, 0.0 }
 0xb1b   : > { %v2109_v39 = vrot.slane %v2108_v1, 4  ;;  %v2116_v51 = vrot.slane %v2115_v36, 4 }
 0xb1d   : > { %v2110_v55 = vadd.f32 %v2109_v39, %v2108_v1  ;;  %v2117_v11 = vadd.f32 %v2116_v51, %v2115_v36 }
 0xb1f   : > { %v2111_v44 = vrot.slane %v2110_v55, 2  ;;  %v2118_v58 = vrot.slane %v2117_v11, 2 }
 0xb21   : > { %v2112_v14 = vadd.f32 %v2111_v44, %v2110_v55  ;;  %v2119_v41 = vadd.f32 %v2118_v58, %v2117_v11 }
 0xb23   : > { %v2113_v57 = vrot.slane %v2112_v14, 1  ;;  %v2120_v15 = vrot.slane %v2119_v41, 1 }
 0xb25   : > { %v2114_v20 = vadd.f32 %v2113_v57, %v2112_v14  ;;  %v2121_v21 = vadd.f32 %v2120_v15, %v2119_v41 }
 0xb27   : > { %v2124_v13 = vadd.f32 %v2123_v0, %v2114_v20  ;;  %v2125_v42 = vadd.f32 %v2123_v0, %v2121_v21 }
 0xb29   : > { %v2126_v31 = vadd.f32 3.0, %v2124_v13  ;;  %v2127_v29 = vadd.f32 3.0, %v2125_v42 }
 0xb2b   : > { %v2128_v30 = vmul.f32 0.001, %v2126_v31  ;;  %v2129_v4 = vmul.f32 0.001, %v2127_v29 }
 0xb2d   : > { %v2130_v56 = vmax.f32 %v2128_v30, %v2126_v31  ;;  %v2131_v2 = vmax.f32 %v2129_v4, %v2127_v29 }
 0xb2f   : > { %v2132_v18 = vmin.f32 %v2130_v56, 6.0  ;;  %v2133_v16 = vmin.f32 %v2131_v2, 6.0 }
 0xb31   : > { %v2244_v52 = vmul.f32 -0.16666667, %v2132_v18  ;;  %v2245_v50 = vmul.f32 -0.16666667, %v2133_v16 }
 0xb33   : > { %v2138_v5 = vmul.f32 1.442695, %v2244_v52  ;;  %v2140_v54 = vmul.f32 1.442695, %v2245_v50 }
 0xb35   : > { %2447 = vpow2.f32 %v2138_v5 }
 0xb36   : > { %2449 = vpow2.f32 %v2140_v54 }
 0xb3f   : > { %v2448_v7 = vpop.eup %2447 }
 0xb40   : > { %v2450_v34 = vpop.eup %2449  ;;  %v2142_v22 = vadd.f32 1.0, %v2448_v7 }
 0xb41   : > { %v2143_v63 = vadd.f32 1.0, %v2450_v34 }
 0xb42   : > { %2451 = vrcp.f32 %v2142_v22 }
 0xb43   : > { %2453 = vrcp.f32 %v2143_v63 }
 0xb4c   : > { %v2452_v49 = vpop.eup %2451 }
 0xb4d   : > { %v2454_v46 = vpop.eup %2453  ;;  %v2148_v33 = vmul.f32 %v2452_v49, %v3944_v40 }
 0xb4e   : > { %v2149_v27 = vmul.f32 %v2454_v46, %v3946_v17 }
 0xb4f   : > { %v2150_v9 = vadd.f32 %v2148_v33, %v808_v24 }
 0xb50   : > { %v2151_v3 = vadd.f32 %v2149_v27, %v810_v37 }
 0xb51   : > { %v2152_v8 = vmul.f32 0.001, %v2150_v9 }
 0xb52   : > { %v2153_v62 = vmul.f32 0.001, %v2151_v3 }
 0xb53   : > { %v2154_v12 = vmax.f32 %v2152_v8, %v2150_v9 }
 0xb54   : > { %v2155_v59 = vmax.f32 %v2153_v62, %v2151_v3 }
 0xb55   : > { %v2156_v26 = vmin.f32 %v2154_v12, 6.0 }
 0xb56   : > { %v2157_v47 = vmin.f32 %v2155_v59, 6.0 }
 0xb57   : > { %2158 = vst [vmem:[%s171_s26] sm:$0xff] %v2156_v26 }
 0xb58   : > { %2159 = vst [vmem:[%s171_s26 + $0x8] sm:$0xff] %v2157_v47 }
 0xb59 PF: > { %s14_s14 = sadd.s32 1, %s2462_s14  }
 0xb5a   : > { %p11_p4 = scmp.ge.s32.totalorder %s14_s14, 4  }
 0xb5c   :  { %13 = sbr.rel (!%p11_p4) target bundleno = 2 (0x2), region = 62 }

</bundles_post_ra>
